<compile_context>
chip_gen: v7x
topology: tpu7x:2x2x1
jax: 0.10.0
libtpu: 0.0.40
codegen_flags: <defaults>
</compile_context>

<pallas_src>
import functools

import jax
import jax.numpy as jnp
from jax import lax
from jax.experimental import pallas as pl
from jax.experimental.pallas import tpu as pltpu

EPS = 1e-5


def _round_up(n, m):
    return ((n + m - 1) // m) * m


# ----------------------------------------------------------------------------
# Flattened (Kronecker) 2-D DFT constants.
# ----------------------------------------------------------------------------
def _dft_consts(H, W):
    HW = H * W
    # TODO(synk): for H*W > ~4096 the flat Kronecker DFT matrix gets too large;
    # switch to the separable (2H,H) / (W,2W) form with W folded into lanes.
    assert HW <= 4096, "flat Kronecker DFT intended for small images only"
    q = jnp.arange(HW, dtype=jnp.int32)
    u, v = q // W, q % W                       # frequency (u,v)  /  pixel (h,w)
    # modular reduction BEFORE the divide keeps angles small and f32-exact
    ph = (jnp.outer(u, u) % H).astype(jnp.float32) * (1.0 / H)
    pw = (jnp.outer(v, v) % W).astype(jnp.float32) * (1.0 / W)
    ang = (2.0 * jnp.pi) * (ph + pw)           # symmetric (HW, HW)
    cosm, sinm = jnp.cos(ang), jnp.sin(ang)
    # forward:  t(row) @ [C | -S]  ->  [Fr | Fi]
    dft_cs = jnp.concatenate([cosm, -sinm], axis=1)                  # (HW, 2HW)
    # inverse:  [gr | gi] @ [[C, S], [-S, C]]  ->  HW * [Rr | Ri]
    idft = jnp.concatenate(
        [jnp.concatenate([cosm, sinm], axis=1),
         jnp.concatenate([-sinm, cosm], axis=1)], axis=0)            # (2HW, 2HW)
    return dft_cs, idft


# ----------------------------------------------------------------------------
# The fused kernel: one batch element per grid step, channel-major (CP, H*W).
# ----------------------------------------------------------------------------
def _fem_kernel(x_ref,
                t1w_ref, t1b_ref, t2w_ref, t2b_ref, t3w_ref, t3b_ref,
                s1w_ref, s1b_ref, s2w_ref, s2b_ref, s3w_ref, s3b_ref,
                f1w_ref, f1b_ref, f2w_ref, f2b_ref,
                cs_ref, idft_ref, sc_ref, sh_ref,
                out_ref, *, H, W, CP, C_out):
    HW = H * W

    # Pixel coordinates from an in-kernel iota (no DMA'd index streams).  Use
    # the float path (floor-div) so we only rely on plain VPU ops.
    pixf = lax.broadcasted_iota(jnp.int32, (1, HW), 1).astype(jnp.float32)
    hhf = jnp.floor((pixf + 0.5) * (1.0 / W))
    wwf = pixf - hhf * W
    # The 8 boundary masks are built once and reused by all four 3x3 convs.
    masks = {}
    for dh in (-1, 0, 1):
        for dw in (-1, 0, 1):
            if dh == 0 and dw == 0:
                continue
            ok = ((hhf + dh >= 0.0) & (hhf + dh <= H - 1.0) &
                  (wwf + dw >= 0.0) & (wwf + dw <= W - 1.0))
            masks[(dh, dw)] = ok.astype(jnp.float32)

    def conv3x3(t, w9_ref, b_ref):
        # all 9 taps as one stacked GEMM, then lane rolls + boundary masks
        z = jnp.dot(w9_ref[...], t, preferred_element_type=jnp.float32)
        acc = b_ref[...] + z[4 * CP:5 * CP, :]          # centre tap (dh=dw=0)
        k = 0
        for dh in (-1, 0, 1):
            for dw in (-1, 0, 1):
                if dh == 0 and dw == 0:
                    k += 1
                    continue
                zt = z[k * CP:(k + 1) * CP, :]
                # want out[:, i] = z[:, i + d]  ==  jnp.roll(z, -d, axis=1);
                # pltpu.roll follows the jnp.roll convention
                # (out[i] = in[(i - shift) % n]).
                zt = pltpu.roll(zt, (-(dh * W + dw)) % HW, 1)
                acc = acc + zt * masks[(dh, dw)]
                k += 1
        return acc

    x = x_ref[...]                                       # (CsP, HW)
    # temporal branch: 1x1+BN, 3x3+BN, 3x3+BN, ReLU  (BN folded into W/b)
    t = jnp.dot(t1w_ref[...], x, preferred_element_type=jnp.float32) + t1b_ref[...]
    t = conv3x3(t, t2w_ref, t2b_ref)
    t = conv3x3(t, t3w_ref, t3b_ref)
    t = jnp.maximum(t, 0.0)
    # spatial branch on temporal_feat
    s = jnp.dot(s1w_ref[...], t, preferred_element_type=jnp.float32) + s1b_ref[...]
    s = conv3x3(s, s2w_ref, s2b_ref)
    s = conv3x3(s, s3w_ref, s3b_ref)
    s = jnp.maximum(s, 0.0)

    # fft2 of every channel image as ONE lane-dense MXU matmul
    fstack = jnp.dot(t, cs_ref[...], preferred_element_type=jnp.float32)  # (CP, 2HW)
    fr = fstack[:, :HW]
    fi = fstack[:, HW:]

    # frequency attention (1x1+BN+ReLU -> 1x1+sigmoid), fused - no HBM trip
    a1 = jnp.dot(f1w_ref[...], fr, preferred_element_type=jnp.float32) + f1b_ref[...]
    a1 = jnp.maximum(a1, 0.0)
    logits = jnp.dot(f2w_ref[...], a1, preferred_element_type=jnp.float32) + f2b_ref[...]
    w_att = pl.reciprocal(1.0 + jnp.exp(-logits), approx=True)     # sigmoid via EUP

    # ifft2(w * F) as one matmul, then |.| + folded BN + ReLU + residual
    g = jnp.concatenate([w_att * fr, w_att * fi], axis=1)          # (CP, 2HW)
    r = jnp.dot(g, idft_ref[...], preferred_element_type=jnp.float32)
    rr = r[:, :HW]
    ri = r[:, HW:]
    mag = jnp.sqrt(rr * rr + ri * ri)
    y = jnp.maximum(mag * sc_ref[...] + sh_ref[...], 0.0)   # scale folds 1/(H*W)
    out_ref[...] = (s + y)[:C_out, :]


# ----------------------------------------------------------------------------
# Wrapper
# ----------------------------------------------------------------------------
_CONST_KEYS = ("t1_w", "t1_b", "t2_w", "t2_b", "t3_w", "t3_b",
               "s1_w", "s1_b", "s2_w", "s2_b", "s3_w", "s3_b",
               "f1_w", "f1_b", "f2_w", "f2_b",
               "dft_cs", "idft", "scale", "shift")


def _vmem_budget(CP, CsP, IP, HW):
    """Explicit VMEM budget (bytes) for the fused kernel -> vmem_limit_bytes."""
    const_b = 4 * (2 * HW * HW                     # forward DFT matrix [C|-S]
                   + 4 * HW * HW                   # inverse DFT matrix
                   + CP * CsP + 4 * 9 * CP * CP + CP * CP
                   + IP * CP + CP * IP + 10 * CP + 2 * IP)
    act_b = 4 * HW * (CsP + 9 * CP + 12 * CP)      # x, stacked-tap GEMM, live acts
    need = 2 * (const_b + 2 * act_b) + (8 << 20)   # double buffering + headroom
    try:
        cap = int(pltpu.get_tpu_info().vmem_capacity_bytes)
    except Exception:
        cap = 64 << 20                             # v7x per-core VMEM (tightest)
    return int(min(max(need, 32 << 20), (cap * 3) // 4))


def frequency_enhanced_forward(x_nchw, p):
    B, Cs, H, W = x_nchw.shape
    C, CP, CsP, IP = p["C"], p["CP"], p["CsP"], p["IP"]
    HW = H * W

    # NCHW -> (B, CsP, H*W): pure reshape + channel zero-pad, no HBM transpose.
    x3 = x_nchw.astype(jnp.float32).reshape(B, Cs, HW)
    if CsP > Cs:
        x3 = jnp.pad(x3, ((0, 0), (0, CsP - Cs), (0, 0)))

    consts = [p[k] for k in _CONST_KEYS]
    kernel = functools.partial(_fem_kernel, H=H, W=W, CP=CP, C_out=C)

    def const_spec(a):
        return pl.BlockSpec(a.shape, lambda b: (0, 0))

    out = pl.pallas_call(
        kernel,
        out_shape=jax.ShapeDtypeStruct((B, C, HW), jnp.float32),
        grid=(B,),    # one batch element per step; >=2 steps keeps both v7x TCs busy
        in_specs=[pl.BlockSpec((None, CsP, HW), lambda b: (b, 0, 0))]
                 + [const_spec(a) for a in consts],
        out_specs=pl.BlockSpec((None, C, HW), lambda b: (b, 0, 0)),
        compiler_params=pltpu.CompilerParams(
            dimension_semantics=("parallel",),
            vmem_limit_bytes=_vmem_budget(CP, CsP, IP, HW)),
    )(x3, *consts)
    return out.reshape(B, C, H, W)


# ----------------------------------------------------------------------------
# Parameters: raw (reference) + folded/padded (kernel).
# ----------------------------------------------------------------------------
def init_raw_params(key, C, s):
    inter = max(C // 16, 1)
    ks = iter(jax.random.split(key, 64))

    def w(co, ci, k):
        return 0.1 * jax.random.normal(next(ks), (co, ci, k, k), jnp.float32)

    def b(n):
        return 0.1 * jax.random.normal(next(ks), (n,), jnp.float32)

    def bn(n):
        g = 1.0 + 0.1 * jax.random.normal(next(ks), (n,), jnp.float32)
        be = 0.1 * jax.random.normal(next(ks), (n,), jnp.float32)
        m = 0.1 * jax.random.normal(next(ks), (n,), jnp.float32)
        v = 1.0 + 0.1 * jnp.abs(jax.random.normal(next(ks), (n,), jnp.float32))
        return (g, be, m, v)

    return dict(
        t1_w=w(C, C * s, 1), t1_b=b(C), t1_bn=bn(C),
        t2_w=w(C, C, 3), t2_b=b(C), t2_bn=bn(C),
        t3_w=w(C, C, 3), t3_b=b(C), t3_bn=bn(C),
        s1_w=w(C, C, 1), s1_b=b(C), s1_bn=bn(C),
        s2_w=w(C, C, 3), s2_b=b(C), s2_bn=bn(C),
        s3_w=w(C, C, 3), s3_b=b(C), s3_bn=bn(C),
        f1_w=w(inter, C, 1), f1_b=b(inter), f1_bn=bn(inter),
        f2_w=w(C, inter, 1), f2_b=b(C),
        norm_bn=bn(C),
    )


def fold_params(raw, C, s, H, W):
    CP, CsP = _round_up(C, 8), _round_up(C * s, 8)
    inter = max(C // 16, 1)
    IP = _round_up(inter, 8)
    HW = H * W

    def bn_affine(bnp):
        g, be, m, v = bnp
        a = g / jnp.sqrt(v + EPS)
        return a, be - m * a

    def pad_w(wmat, rp, cp):
        return jnp.pad(wmat, ((0, rp - wmat.shape[0]), (0, cp - wmat.shape[1])))

    def pad_b(bvec, rp):
        return jnp.pad(bvec, (0, rp - bvec.shape[0])).reshape(rp, 1)

    def fold1x1(wk, bk, bnk, rp, cp):
        a, c = bn_affine(bnk)
        return pad_w(wk[:, :, 0, 0] * a[:, None], rp, cp), pad_b(bk * a + c, rp)

    def fold3x3(wk, bk, bnk, rp, cp):
        a, c = bn_affine(bnk)
        co, ci = wk.shape[0], wk.shape[1]
        w9 = jnp.transpose(wk * a[:, None, None, None], (2, 3, 0, 1)).reshape(9, co, ci)
        w9 = jnp.pad(w9, ((0, 0), (0, rp - co), (0, cp - ci))).reshape(9 * rp, cp)
        return w9, pad_b(bk * a + c, rp)

    p = dict(C=C, CP=CP, CsP=CsP, IP=IP)
    p["t1_w"], p["t1_b"] = fold1x1(raw["t1_w"], raw["t1_b"], raw["t1_bn"], CP, CsP)
    p["t2_w"], p["t2_b"] = fold3x3(raw["t2_w"], raw["t2_b"], raw["t2_bn"], CP, CP)
    p["t3_w"], p["t3_b"] = fold3x3(raw["t3_w"], raw["t3_b"], raw["t3_bn"], CP, CP)
    p["s1_w"], p["s1_b"] = fold1x1(raw["s1_w"], raw["s1_b"], raw["s1_bn"], CP, CP)
    p["s2_w"], p["s2_b"] = fold3x3(raw["s2_w"], raw["s2_b"], raw["s2_bn"], CP, CP)
    p["s3_w"], p["s3_b"] = fold3x3(raw["s3_w"], raw["s3_b"], raw["s3_bn"], CP, CP)
    p["f1_w"], p["f1_b"] = fold1x1(raw["f1_w"], raw["f1_b"], raw["f1_bn"], IP, CP)
    p["f2_w"] = pad_w(raw["f2_w"][:, :, 0, 0], CP, IP)
    p["f2_b"] = pad_b(raw["f2_b"], CP)
    na, nc = bn_affine(raw["norm_bn"])
    p["scale"] = pad_b(na * (1.0 / HW), CP)    # fold the 1/(H*W) iDFT factor
    p["shift"] = pad_b(nc, CP)
    p["dft_cs"], p["idft"] = _dft_consts(H, W)
    return p


# ----------------------------------------------------------------------------
# Pure-JAX reference (semantic spec of the PyTorch module, inference-mode BN).
# ----------------------------------------------------------------------------
def reference_forward(x, raw):
    def bn(y, bnp):
        g, be, m, v = bnp
        inv = g / jnp.sqrt(v + EPS)
        return (y - m[None, :, None, None]) * inv[None, :, None, None] \
            + be[None, :, None, None]

    def conv(y, wk, bk, pad):
        out = lax.conv_general_dilated(
            y, wk, window_strides=(1, 1), padding=[(pad, pad), (pad, pad)],
            dimension_numbers=("NCHW", "OIHW", "NCHW"))
        return out + bk[None, :, None, None]

    t = bn(conv(x, raw["t1_w"], raw["t1_b"], 0), raw["t1_bn"])
    t = bn(conv(t, raw["t2_w"], raw["t2_b"], 1), raw["t2_bn"])
    t = bn(conv(t, raw["t3_w"], raw["t3_b"], 1), raw["t3_bn"])
    t = jax.nn.relu(t)
    s = bn(conv(t, raw["s1_w"], raw["s1_b"], 0), raw["s1_bn"])
    s = bn(conv(s, raw["s2_w"], raw["s2_b"], 1), raw["s2_bn"])
    s = bn(conv(s, raw["s3_w"], raw["s3_b"], 1), raw["s3_bn"])
    s = jax.nn.relu(s)
    freq = jnp.fft.fft2(t)
    fr = jnp.real(freq)
    a = jax.nn.relu(bn(conv(fr, raw["f1_w"], raw["f1_b"], 0), raw["f1_bn"]))
    w_att = jax.nn.sigmoid(conv(a, raw["f2_w"], raw["f2_b"], 0))
    en = jnp.abs(jnp.fft.ifft2(w_att * freq))
    en = jax.nn.relu(bn(en, raw["norm_bn"]))
    return s + en


if __name__ == "__main__":
    B, C, S_FACTOR, H, W = 2, 4, 2, 16, 16
    key = jax.random.PRNGKey(0)
    kx, kp = jax.random.split(key)
    x = jax.random.normal(kx, (B, C * S_FACTOR, H, W), jnp.float32)   # NCHW input

    raw = init_raw_params(kp, C, S_FACTOR)
    kparams = fold_params(raw, C, S_FACTOR, H, W)

    fwd = jax.jit(lambda xx: frequency_enhanced_forward(xx, kparams))
    out = fwd(x)
    jax.block_until_ready(out)
    assert out.shape == (B, C, H, W)
    assert bool(jnp.all(jnp.isfinite(out)))

    # Correctness check against the pure-JAX reference of the PyTorch module.
    ref = reference_forward(x, raw)
    err = float(jnp.max(jnp.abs(out - ref)))
    scale = float(jnp.max(jnp.abs(ref)))
    assert err <= 0.03 * scale + 0.03, f"mismatch: max_abs_err={err:.4g} ref_scale={scale:.4g}"

    print("KERNEL_OK")
</pallas_src>

<mosaic_0001>
module attributes {stable_mosaic.version = 11 : i64} {
  func.func @_fem_kernel(%arg0: i32, %arg1: memref<1x8x256xf32, #tpu.memory_space<vmem>>, %arg2: memref<8x8xf32, #tpu.memory_space<vmem>>, %arg3: memref<8x1xf32, #tpu.memory_space<vmem>>, %arg4: memref<72x8xf32, #tpu.memory_space<vmem>>, %arg5: memref<8x1xf32, #tpu.memory_space<vmem>>, %arg6: memref<72x8xf32, #tpu.memory_space<vmem>>, %arg7: memref<8x1xf32, #tpu.memory_space<vmem>>, %arg8: memref<8x8xf32, #tpu.memory_space<vmem>>, %arg9: memref<8x1xf32, #tpu.memory_space<vmem>>, %arg10: memref<72x8xf32, #tpu.memory_space<vmem>>, %arg11: memref<8x1xf32, #tpu.memory_space<vmem>>, %arg12: memref<72x8xf32, #tpu.memory_space<vmem>>, %arg13: memref<8x1xf32, #tpu.memory_space<vmem>>, %arg14: memref<8x8xf32, #tpu.memory_space<vmem>>, %arg15: memref<8x1xf32, #tpu.memory_space<vmem>>, %arg16: memref<8x8xf32, #tpu.memory_space<vmem>>, %arg17: memref<8x1xf32, #tpu.memory_space<vmem>>, %arg18: memref<256x512xf32, #tpu.memory_space<vmem>>, %arg19: memref<512x512xf32, #tpu.memory_space<vmem>>, %arg20: memref<8x1xf32, #tpu.memory_space<vmem>>, %arg21: memref<8x1xf32, #tpu.memory_space<vmem>>, %arg22: memref<1x4x256xf32, #tpu.memory_space<vmem>>) attributes {dimension_semantics = [#tpu.dimension_semantics<parallel>], iteration_bounds = array<i64: 2>, scalar_prefetch = 0 : i64, scratch_operands = 0 : i64, tpu.core_type = #tpu.core_type<tc>, window_params = [{transform_indices = @transform_0, window_bounds = array<i64: 1, 8, 256>}, {pipeline_mode = #tpu.pipeline_mode<synchronous>, transform_indices = @transform_1, window_bounds = array<i64: 8, 8>}, {pipeline_mode = #tpu.pipeline_mode<synchronous>, transform_indices = @transform_2, window_bounds = array<i64: 8, 1>}, {pipeline_mode = #tpu.pipeline_mode<synchronous>, transform_indices = @transform_3, window_bounds = array<i64: 72, 8>}, {pipeline_mode = #tpu.pipeline_mode<synchronous>, transform_indices = @transform_4, window_bounds = array<i64: 8, 1>}, {pipeline_mode = #tpu.pipeline_mode<synchronous>, transform_indices = @transform_5, window_bounds = array<i64: 72, 8>}, {pipeline_mode = #tpu.pipeline_mode<synchronous>, transform_indices = @transform_6, window_bounds = array<i64: 8, 1>}, {pipeline_mode = #tpu.pipeline_mode<synchronous>, transform_indices = @transform_7, window_bounds = array<i64: 8, 8>}, {pipeline_mode = #tpu.pipeline_mode<synchronous>, transform_indices = @transform_8, window_bounds = array<i64: 8, 1>}, {pipeline_mode = #tpu.pipeline_mode<synchronous>, transform_indices = @transform_9, window_bounds = array<i64: 72, 8>}, {pipeline_mode = #tpu.pipeline_mode<synchronous>, transform_indices = @transform_10, window_bounds = array<i64: 8, 1>}, {pipeline_mode = #tpu.pipeline_mode<synchronous>, transform_indices = @transform_11, window_bounds = array<i64: 72, 8>}, {pipeline_mode = #tpu.pipeline_mode<synchronous>, transform_indices = @transform_12, window_bounds = array<i64: 8, 1>}, {pipeline_mode = #tpu.pipeline_mode<synchronous>, transform_indices = @transform_13, window_bounds = array<i64: 8, 8>}, {pipeline_mode = #tpu.pipeline_mode<synchronous>, transform_indices = @transform_14, window_bounds = array<i64: 8, 1>}, {pipeline_mode = #tpu.pipeline_mode<synchronous>, transform_indices = @transform_15, window_bounds = array<i64: 8, 8>}, {pipeline_mode = #tpu.pipeline_mode<synchronous>, transform_indices = @transform_16, window_bounds = array<i64: 8, 1>}, {pipeline_mode = #tpu.pipeline_mode<synchronous>, transform_indices = @transform_17, window_bounds = array<i64: 256, 512>}, {pipeline_mode = #tpu.pipeline_mode<synchronous>, transform_indices = @transform_18, window_bounds = array<i64: 512, 512>}, {pipeline_mode = #tpu.pipeline_mode<synchronous>, transform_indices = @transform_19, window_bounds = array<i64: 8, 1>}, {pipeline_mode = #tpu.pipeline_mode<synchronous>, transform_indices = @transform_20, window_bounds = array<i64: 8, 1>}, {transform_indices = @transform_21, window_bounds = array<i64: 1, 4, 256>}]} {
    %0 = tpu.iota {dimensions = array<i32: 1>} : vector<1x256xi32>
    %1 = arith.sitofp %0 : vector<1x256xi32> to vector<1x256xf32>
    %cst = arith.constant 5.000000e-01 : f32
    %2 = vector.broadcast %cst : f32 to vector<1x256xf32>
    %3 = arith.addf %1, %2 : vector<1x256xf32>
    %cst_0 = arith.constant 6.250000e-02 : f32
    %4 = vector.broadcast %cst_0 : f32 to vector<1x256xf32>
    %5 = arith.mulf %3, %4 : vector<1x256xf32>
    %6 = math.floor %5 : vector<1x256xf32>
    %cst_1 = arith.constant 1.600000e+01 : f32
    %7 = vector.broadcast %cst_1 : f32 to vector<1x256xf32>
    %8 = arith.mulf %6, %7 : vector<1x256xf32>
    %9 = arith.subf %1, %8 : vector<1x256xf32>
    %cst_2 = arith.constant -1.000000e+00 : f32
    %10 = vector.broadcast %cst_2 : f32 to vector<1x256xf32>
    %11 = arith.addf %6, %10 : vector<1x256xf32>
    %cst_3 = arith.constant 0.000000e+00 : f32
    %12 = vector.broadcast %cst_3 : f32 to vector<1x256xf32>
    %13 = arith.cmpf oge, %11, %12 : vector<1x256xf32>
    %cst_4 = arith.constant -1.000000e+00 : f32
    %14 = vector.broadcast %cst_4 : f32 to vector<1x256xf32>
    %15 = arith.addf %6, %14 : vector<1x256xf32>
    %cst_5 = arith.constant 1.500000e+01 : f32
    %16 = vector.broadcast %cst_5 : f32 to vector<1x256xf32>
    %17 = arith.cmpf ole, %15, %16 : vector<1x256xf32>
    %18 = arith.andi %13, %17 : vector<1x256xi1>
    %cst_6 = arith.constant -1.000000e+00 : f32
    %19 = vector.broadcast %cst_6 : f32 to vector<1x256xf32>
    %20 = arith.addf %9, %19 : vector<1x256xf32>
    %cst_7 = arith.constant 0.000000e+00 : f32
    %21 = vector.broadcast %cst_7 : f32 to vector<1x256xf32>
    %22 = arith.cmpf oge, %20, %21 : vector<1x256xf32>
    %23 = arith.andi %18, %22 : vector<1x256xi1>
    %cst_8 = arith.constant -1.000000e+00 : f32
    %24 = vector.broadcast %cst_8 : f32 to vector<1x256xf32>
    %25 = arith.addf %9, %24 : vector<1x256xf32>
    %cst_9 = arith.constant 1.500000e+01 : f32
    %26 = vector.broadcast %cst_9 : f32 to vector<1x256xf32>
    %27 = arith.cmpf ole, %25, %26 : vector<1x256xf32>
    %28 = arith.andi %23, %27 : vector<1x256xi1>
    %29 = arith.extui %28 : vector<1x256xi1> to vector<1x256xi32>
    %30 = arith.sitofp %29 : vector<1x256xi32> to vector<1x256xf32>
    %cst_10 = arith.constant -1.000000e+00 : f32
    %31 = vector.broadcast %cst_10 : f32 to vector<1x256xf32>
    %32 = arith.addf %6, %31 : vector<1x256xf32>
    %cst_11 = arith.constant 0.000000e+00 : f32
    %33 = vector.broadcast %cst_11 : f32 to vector<1x256xf32>
    %34 = arith.cmpf oge, %32, %33 : vector<1x256xf32>
    %cst_12 = arith.constant -1.000000e+00 : f32
    %35 = vector.broadcast %cst_12 : f32 to vector<1x256xf32>
    %36 = arith.addf %6, %35 : vector<1x256xf32>
    %cst_13 = arith.constant 1.500000e+01 : f32
    %37 = vector.broadcast %cst_13 : f32 to vector<1x256xf32>
    %38 = arith.cmpf ole, %36, %37 : vector<1x256xf32>
    %39 = arith.andi %34, %38 : vector<1x256xi1>
    %cst_14 = arith.constant 0.000000e+00 : f32
    %40 = vector.broadcast %cst_14 : f32 to vector<1x256xf32>
    %41 = arith.addf %9, %40 : vector<1x256xf32>
    %cst_15 = arith.constant 0.000000e+00 : f32
    %42 = vector.broadcast %cst_15 : f32 to vector<1x256xf32>
    %43 = arith.cmpf oge, %41, %42 : vector<1x256xf32>
    %44 = arith.andi %39, %43 : vector<1x256xi1>
    %cst_16 = arith.constant 0.000000e+00 : f32
    %45 = vector.broadcast %cst_16 : f32 to vector<1x256xf32>
    %46 = arith.addf %9, %45 : vector<1x256xf32>
    %cst_17 = arith.constant 1.500000e+01 : f32
    %47 = vector.broadcast %cst_17 : f32 to vector<1x256xf32>
    %48 = arith.cmpf ole, %46, %47 : vector<1x256xf32>
    %49 = arith.andi %44, %48 : vector<1x256xi1>
    %50 = arith.extui %49 : vector<1x256xi1> to vector<1x256xi32>
    %51 = arith.sitofp %50 : vector<1x256xi32> to vector<1x256xf32>
    %cst_18 = arith.constant -1.000000e+00 : f32
    %52 = vector.broadcast %cst_18 : f32 to vector<1x256xf32>
    %53 = arith.addf %6, %52 : vector<1x256xf32>
    %cst_19 = arith.constant 0.000000e+00 : f32
    %54 = vector.broadcast %cst_19 : f32 to vector<1x256xf32>
    %55 = arith.cmpf oge, %53, %54 : vector<1x256xf32>
    %cst_20 = arith.constant -1.000000e+00 : f32
    %56 = vector.broadcast %cst_20 : f32 to vector<1x256xf32>
    %57 = arith.addf %6, %56 : vector<1x256xf32>
    %cst_21 = arith.constant 1.500000e+01 : f32
    %58 = vector.broadcast %cst_21 : f32 to vector<1x256xf32>
    %59 = arith.cmpf ole, %57, %58 : vector<1x256xf32>
    %60 = arith.andi %55, %59 : vector<1x256xi1>
    %cst_22 = arith.constant 1.000000e+00 : f32
    %61 = vector.broadcast %cst_22 : f32 to vector<1x256xf32>
    %62 = arith.addf %9, %61 : vector<1x256xf32>
    %cst_23 = arith.constant 0.000000e+00 : f32
    %63 = vector.broadcast %cst_23 : f32 to vector<1x256xf32>
    %64 = arith.cmpf oge, %62, %63 : vector<1x256xf32>
    %65 = arith.andi %60, %64 : vector<1x256xi1>
    %cst_24 = arith.constant 1.000000e+00 : f32
    %66 = vector.broadcast %cst_24 : f32 to vector<1x256xf32>
    %67 = arith.addf %9, %66 : vector<1x256xf32>
    %cst_25 = arith.constant 1.500000e+01 : f32
    %68 = vector.broadcast %cst_25 : f32 to vector<1x256xf32>
    %69 = arith.cmpf ole, %67, %68 : vector<1x256xf32>
    %70 = arith.andi %65, %69 : vector<1x256xi1>
    %71 = arith.extui %70 : vector<1x256xi1> to vector<1x256xi32>
    %72 = arith.sitofp %71 : vector<1x256xi32> to vector<1x256xf32>
    %cst_26 = arith.constant 0.000000e+00 : f32
    %73 = vector.broadcast %cst_26 : f32 to vector<1x256xf32>
    %74 = arith.addf %6, %73 : vector<1x256xf32>
    %cst_27 = arith.constant 0.000000e+00 : f32
    %75 = vector.broadcast %cst_27 : f32 to vector<1x256xf32>
    %76 = arith.cmpf oge, %74, %75 : vector<1x256xf32>
    %cst_28 = arith.constant 0.000000e+00 : f32
    %77 = vector.broadcast %cst_28 : f32 to vector<1x256xf32>
    %78 = arith.addf %6, %77 : vector<1x256xf32>
    %cst_29 = arith.constant 1.500000e+01 : f32
    %79 = vector.broadcast %cst_29 : f32 to vector<1x256xf32>
    %80 = arith.cmpf ole, %78, %79 : vector<1x256xf32>
    %81 = arith.andi %76, %80 : vector<1x256xi1>
    %cst_30 = arith.constant -1.000000e+00 : f32
    %82 = vector.broadcast %cst_30 : f32 to vector<1x256xf32>
    %83 = arith.addf %9, %82 : vector<1x256xf32>
    %cst_31 = arith.constant 0.000000e+00 : f32
    %84 = vector.broadcast %cst_31 : f32 to vector<1x256xf32>
    %85 = arith.cmpf oge, %83, %84 : vector<1x256xf32>
    %86 = arith.andi %81, %85 : vector<1x256xi1>
    %cst_32 = arith.constant -1.000000e+00 : f32
    %87 = vector.broadcast %cst_32 : f32 to vector<1x256xf32>
    %88 = arith.addf %9, %87 : vector<1x256xf32>
    %cst_33 = arith.constant 1.500000e+01 : f32
    %89 = vector.broadcast %cst_33 : f32 to vector<1x256xf32>
    %90 = arith.cmpf ole, %88, %89 : vector<1x256xf32>
    %91 = arith.andi %86, %90 : vector<1x256xi1>
    %92 = arith.extui %91 : vector<1x256xi1> to vector<1x256xi32>
    %93 = arith.sitofp %92 : vector<1x256xi32> to vector<1x256xf32>
    %cst_34 = arith.constant 0.000000e+00 : f32
    %94 = vector.broadcast %cst_34 : f32 to vector<1x256xf32>
    %95 = arith.addf %6, %94 : vector<1x256xf32>
    %cst_35 = arith.constant 0.000000e+00 : f32
    %96 = vector.broadcast %cst_35 : f32 to vector<1x256xf32>
    %97 = arith.cmpf oge, %95, %96 : vector<1x256xf32>
    %cst_36 = arith.constant 0.000000e+00 : f32
    %98 = vector.broadcast %cst_36 : f32 to vector<1x256xf32>
    %99 = arith.addf %6, %98 : vector<1x256xf32>
    %cst_37 = arith.constant 1.500000e+01 : f32
    %100 = vector.broadcast %cst_37 : f32 to vector<1x256xf32>
    %101 = arith.cmpf ole, %99, %100 : vector<1x256xf32>
    %102 = arith.andi %97, %101 : vector<1x256xi1>
    %cst_38 = arith.constant 1.000000e+00 : f32
    %103 = vector.broadcast %cst_38 : f32 to vector<1x256xf32>
    %104 = arith.addf %9, %103 : vector<1x256xf32>
    %cst_39 = arith.constant 0.000000e+00 : f32
    %105 = vector.broadcast %cst_39 : f32 to vector<1x256xf32>
    %106 = arith.cmpf oge, %104, %105 : vector<1x256xf32>
    %107 = arith.andi %102, %106 : vector<1x256xi1>
    %cst_40 = arith.constant 1.000000e+00 : f32
    %108 = vector.broadcast %cst_40 : f32 to vector<1x256xf32>
    %109 = arith.addf %9, %108 : vector<1x256xf32>
    %cst_41 = arith.constant 1.500000e+01 : f32
    %110 = vector.broadcast %cst_41 : f32 to vector<1x256xf32>
    %111 = arith.cmpf ole, %109, %110 : vector<1x256xf32>
    %112 = arith.andi %107, %111 : vector<1x256xi1>
    %113 = arith.extui %112 : vector<1x256xi1> to vector<1x256xi32>
    %114 = arith.sitofp %113 : vector<1x256xi32> to vector<1x256xf32>
    %cst_42 = arith.constant 1.000000e+00 : f32
    %115 = vector.broadcast %cst_42 : f32 to vector<1x256xf32>
    %116 = arith.addf %6, %115 : vector<1x256xf32>
    %cst_43 = arith.constant 0.000000e+00 : f32
    %117 = vector.broadcast %cst_43 : f32 to vector<1x256xf32>
    %118 = arith.cmpf oge, %116, %117 : vector<1x256xf32>
    %cst_44 = arith.constant 1.000000e+00 : f32
    %119 = vector.broadcast %cst_44 : f32 to vector<1x256xf32>
    %120 = arith.addf %6, %119 : vector<1x256xf32>
    %cst_45 = arith.constant 1.500000e+01 : f32
    %121 = vector.broadcast %cst_45 : f32 to vector<1x256xf32>
    %122 = arith.cmpf ole, %120, %121 : vector<1x256xf32>
    %123 = arith.andi %118, %122 : vector<1x256xi1>
    %cst_46 = arith.constant -1.000000e+00 : f32
    %124 = vector.broadcast %cst_46 : f32 to vector<1x256xf32>
    %125 = arith.addf %9, %124 : vector<1x256xf32>
    %cst_47 = arith.constant 0.000000e+00 : f32
    %126 = vector.broadcast %cst_47 : f32 to vector<1x256xf32>
    %127 = arith.cmpf oge, %125, %126 : vector<1x256xf32>
    %128 = arith.andi %123, %127 : vector<1x256xi1>
    %cst_48 = arith.constant -1.000000e+00 : f32
    %129 = vector.broadcast %cst_48 : f32 to vector<1x256xf32>
    %130 = arith.addf %9, %129 : vector<1x256xf32>
    %cst_49 = arith.constant 1.500000e+01 : f32
    %131 = vector.broadcast %cst_49 : f32 to vector<1x256xf32>
    %132 = arith.cmpf ole, %130, %131 : vector<1x256xf32>
    %133 = arith.andi %128, %132 : vector<1x256xi1>
    %134 = arith.extui %133 : vector<1x256xi1> to vector<1x256xi32>
    %135 = arith.sitofp %134 : vector<1x256xi32> to vector<1x256xf32>
    %cst_50 = arith.constant 1.000000e+00 : f32
    %136 = vector.broadcast %cst_50 : f32 to vector<1x256xf32>
    %137 = arith.addf %6, %136 : vector<1x256xf32>
    %cst_51 = arith.constant 0.000000e+00 : f32
    %138 = vector.broadcast %cst_51 : f32 to vector<1x256xf32>
    %139 = arith.cmpf oge, %137, %138 : vector<1x256xf32>
    %cst_52 = arith.constant 1.000000e+00 : f32
    %140 = vector.broadcast %cst_52 : f32 to vector<1x256xf32>
    %141 = arith.addf %6, %140 : vector<1x256xf32>
    %cst_53 = arith.constant 1.500000e+01 : f32
    %142 = vector.broadcast %cst_53 : f32 to vector<1x256xf32>
    %143 = arith.cmpf ole, %141, %142 : vector<1x256xf32>
    %144 = arith.andi %139, %143 : vector<1x256xi1>
    %cst_54 = arith.constant 0.000000e+00 : f32
    %145 = vector.broadcast %cst_54 : f32 to vector<1x256xf32>
    %146 = arith.addf %9, %145 : vector<1x256xf32>
    %cst_55 = arith.constant 0.000000e+00 : f32
    %147 = vector.broadcast %cst_55 : f32 to vector<1x256xf32>
    %148 = arith.cmpf oge, %146, %147 : vector<1x256xf32>
    %149 = arith.andi %144, %148 : vector<1x256xi1>
    %cst_56 = arith.constant 0.000000e+00 : f32
    %150 = vector.broadcast %cst_56 : f32 to vector<1x256xf32>
    %151 = arith.addf %9, %150 : vector<1x256xf32>
    %cst_57 = arith.constant 1.500000e+01 : f32
    %152 = vector.broadcast %cst_57 : f32 to vector<1x256xf32>
    %153 = arith.cmpf ole, %151, %152 : vector<1x256xf32>
    %154 = arith.andi %149, %153 : vector<1x256xi1>
    %155 = arith.extui %154 : vector<1x256xi1> to vector<1x256xi32>
    %156 = arith.sitofp %155 : vector<1x256xi32> to vector<1x256xf32>
    %cst_58 = arith.constant 1.000000e+00 : f32
    %157 = vector.broadcast %cst_58 : f32 to vector<1x256xf32>
    %158 = arith.addf %6, %157 : vector<1x256xf32>
    %cst_59 = arith.constant 0.000000e+00 : f32
    %159 = vector.broadcast %cst_59 : f32 to vector<1x256xf32>
    %160 = arith.cmpf oge, %158, %159 : vector<1x256xf32>
    %cst_60 = arith.constant 1.000000e+00 : f32
    %161 = vector.broadcast %cst_60 : f32 to vector<1x256xf32>
    %162 = arith.addf %6, %161 : vector<1x256xf32>
    %cst_61 = arith.constant 1.500000e+01 : f32
    %163 = vector.broadcast %cst_61 : f32 to vector<1x256xf32>
    %164 = arith.cmpf ole, %162, %163 : vector<1x256xf32>
    %165 = arith.andi %160, %164 : vector<1x256xi1>
    %cst_62 = arith.constant 1.000000e+00 : f32
    %166 = vector.broadcast %cst_62 : f32 to vector<1x256xf32>
    %167 = arith.addf %9, %166 : vector<1x256xf32>
    %cst_63 = arith.constant 0.000000e+00 : f32
    %168 = vector.broadcast %cst_63 : f32 to vector<1x256xf32>
    %169 = arith.cmpf oge, %167, %168 : vector<1x256xf32>
    %170 = arith.andi %165, %169 : vector<1x256xi1>
    %cst_64 = arith.constant 1.000000e+00 : f32
    %171 = vector.broadcast %cst_64 : f32 to vector<1x256xf32>
    %172 = arith.addf %9, %171 : vector<1x256xf32>
    %cst_65 = arith.constant 1.500000e+01 : f32
    %173 = vector.broadcast %cst_65 : f32 to vector<1x256xf32>
    %174 = arith.cmpf ole, %172, %173 : vector<1x256xf32>
    %175 = arith.andi %170, %174 : vector<1x256xi1>
    %176 = arith.extui %175 : vector<1x256xi1> to vector<1x256xi32>
    %177 = arith.sitofp %176 : vector<1x256xi32> to vector<1x256xf32>
    %c0 = arith.constant 0 : index
    %c0_66 = arith.constant 0 : index
    %c0_67 = arith.constant 0 : index
    %178 = vector.load %arg1[%c0, %c0_66, %c0_67] : memref<1x8x256xf32, #tpu.memory_space<vmem>>, vector<1x8x256xf32>
    %179 = vector.shape_cast %178 : vector<1x8x256xf32> to vector<8x256xf32>
    %c0_68 = arith.constant 0 : index
    %c0_69 = arith.constant 0 : index
    %180 = vector.load %arg2[%c0_68, %c0_69] : memref<8x8xf32, #tpu.memory_space<vmem>>, vector<8x8xf32>
    %cst_70 = arith.constant dense<0.000000e+00> : vector<8x256xf32>
    %181 = tpu.matmul %180, %179, %cst_70 {dimension_numbers = #tpu.dot_dimension_numbers<[1], [0], [0], [1], [0, 0, 1, 1], [], []>} : vector<8x8xf32>, vector<8x256xf32>, vector<8x256xf32> -> vector<8x256xf32>
    %c0_71 = arith.constant 0 : index
    %c0_72 = arith.constant 0 : index
    %182 = vector.load %arg3[%c0_71, %c0_72] : memref<8x1xf32, #tpu.memory_space<vmem>>, vector<8x1xf32>
    %183 = vector.broadcast %182 : vector<8x1xf32> to vector<8x256xf32>
    %184 = arith.addf %181, %183 : vector<8x256xf32>
    %c0_73 = arith.constant 0 : index
    %c0_74 = arith.constant 0 : index
    %185 = vector.load %arg4[%c0_73, %c0_74] : memref<72x8xf32, #tpu.memory_space<vmem>>, vector<72x8xf32>
    %cst_75 = arith.constant dense<0.000000e+00> : vector<72x256xf32>
    %186 = tpu.matmul %185, %184, %cst_75 {dimension_numbers = #tpu.dot_dimension_numbers<[1], [0], [0], [1], [0, 0, 1, 1], [], []>} : vector<72x8xf32>, vector<8x256xf32>, vector<72x256xf32> -> vector<72x256xf32>
    %c0_76 = arith.constant 0 : index
    %c0_77 = arith.constant 0 : index
    %187 = vector.load %arg5[%c0_76, %c0_77] : memref<8x1xf32, #tpu.memory_space<vmem>>, vector<8x1xf32>
    %188 = vector.extract_strided_slice %186 {offsets = [32, 0], sizes = [8, 256], strides = [1, 1]} : vector<72x256xf32> to vector<8x256xf32>
    %189 = vector.broadcast %187 : vector<8x1xf32> to vector<8x256xf32>
    %190 = arith.addf %189, %188 : vector<8x256xf32>
    %191 = vector.extract_strided_slice %186 {offsets = [0, 0], sizes = [8, 256], strides = [1, 1]} : vector<72x256xf32> to vector<8x256xf32>
    %c17_i32 = arith.constant 17 : i32
    %192 = tpu.dynamic_rotate %191 by %c17_i32 dim 1 : vector<8x256xf32>, i32 -> vector<8x256xf32>
    %193 = vector.broadcast %30 : vector<1x256xf32> to vector<8x256xf32>
    %194 = arith.mulf %192, %193 : vector<8x256xf32>
    %195 = arith.addf %190, %194 : vector<8x256xf32>
    %196 = vector.extract_strided_slice %186 {offsets = [8, 0], sizes = [8, 256], strides = [1, 1]} : vector<72x256xf32> to vector<8x256xf32>
    %c16_i32 = arith.constant 16 : i32
    %197 = tpu.dynamic_rotate %196 by %c16_i32 dim 1 : vector<8x256xf32>, i32 -> vector<8x256xf32>
    %198 = vector.broadcast %51 : vector<1x256xf32> to vector<8x256xf32>
    %199 = arith.mulf %197, %198 : vector<8x256xf32>
    %200 = arith.addf %195, %199 : vector<8x256xf32>
    %201 = vector.extract_strided_slice %186 {offsets = [16, 0], sizes = [8, 256], strides = [1, 1]} : vector<72x256xf32> to vector<8x256xf32>
    %c15_i32 = arith.constant 15 : i32
    %202 = tpu.dynamic_rotate %201 by %c15_i32 dim 1 : vector<8x256xf32>, i32 -> vector<8x256xf32>
    %203 = vector.broadcast %72 : vector<1x256xf32> to vector<8x256xf32>
    %204 = arith.mulf %202, %203 : vector<8x256xf32>
    %205 = arith.addf %200, %204 : vector<8x256xf32>
    %206 = vector.extract_strided_slice %186 {offsets = [24, 0], sizes = [8, 256], strides = [1, 1]} : vector<72x256xf32> to vector<8x256xf32>
    %c1_i32 = arith.constant 1 : i32
    %207 = tpu.dynamic_rotate %206 by %c1_i32 dim 1 : vector<8x256xf32>, i32 -> vector<8x256xf32>
    %208 = vector.broadcast %93 : vector<1x256xf32> to vector<8x256xf32>
    %209 = arith.mulf %207, %208 : vector<8x256xf32>
    %210 = arith.addf %205, %209 : vector<8x256xf32>
    %211 = vector.extract_strided_slice %186 {offsets = [40, 0], sizes = [8, 256], strides = [1, 1]} : vector<72x256xf32> to vector<8x256xf32>
    %c255_i32 = arith.constant 255 : i32
    %212 = tpu.dynamic_rotate %211 by %c255_i32 dim 1 : vector<8x256xf32>, i32 -> vector<8x256xf32>
    %213 = vector.broadcast %114 : vector<1x256xf32> to vector<8x256xf32>
    %214 = arith.mulf %212, %213 : vector<8x256xf32>
    %215 = arith.addf %210, %214 : vector<8x256xf32>
    %216 = vector.extract_strided_slice %186 {offsets = [48, 0], sizes = [8, 256], strides = [1, 1]} : vector<72x256xf32> to vector<8x256xf32>
    %c241_i32 = arith.constant 241 : i32
    %217 = tpu.dynamic_rotate %216 by %c241_i32 dim 1 : vector<8x256xf32>, i32 -> vector<8x256xf32>
    %218 = vector.broadcast %135 : vector<1x256xf32> to vector<8x256xf32>
    %219 = arith.mulf %217, %218 : vector<8x256xf32>
    %220 = arith.addf %215, %219 : vector<8x256xf32>
    %221 = vector.extract_strided_slice %186 {offsets = [56, 0], sizes = [8, 256], strides = [1, 1]} : vector<72x256xf32> to vector<8x256xf32>
    %c240_i32 = arith.constant 240 : i32
    %222 = tpu.dynamic_rotate %221 by %c240_i32 dim 1 : vector<8x256xf32>, i32 -> vector<8x256xf32>
    %223 = vector.broadcast %156 : vector<1x256xf32> to vector<8x256xf32>
    %224 = arith.mulf %222, %223 : vector<8x256xf32>
    %225 = arith.addf %220, %224 : vector<8x256xf32>
    %226 = vector.extract_strided_slice %186 {offsets = [64, 0], sizes = [8, 256], strides = [1, 1]} : vector<72x256xf32> to vector<8x256xf32>
    %c239_i32 = arith.constant 239 : i32
    %227 = tpu.dynamic_rotate %226 by %c239_i32 dim 1 : vector<8x256xf32>, i32 -> vector<8x256xf32>
    %228 = vector.broadcast %177 : vector<1x256xf32> to vector<8x256xf32>
    %229 = arith.mulf %227, %228 : vector<8x256xf32>
    %230 = arith.addf %225, %229 : vector<8x256xf32>
    %c0_78 = arith.constant 0 : index
    %c0_79 = arith.constant 0 : index
    %231 = vector.load %arg6[%c0_78, %c0_79] : memref<72x8xf32, #tpu.memory_space<vmem>>, vector<72x8xf32>
    %cst_80 = arith.constant dense<0.000000e+00> : vector<72x256xf32>
    %232 = tpu.matmul %231, %230, %cst_80 {dimension_numbers = #tpu.dot_dimension_numbers<[1], [0], [0], [1], [0, 0, 1, 1], [], []>} : vector<72x8xf32>, vector<8x256xf32>, vector<72x256xf32> -> vector<72x256xf32>
    %c0_81 = arith.constant 0 : index
    %c0_82 = arith.constant 0 : index
    %233 = vector.load %arg7[%c0_81, %c0_82] : memref<8x1xf32, #tpu.memory_space<vmem>>, vector<8x1xf32>
    %234 = vector.extract_strided_slice %232 {offsets = [32, 0], sizes = [8, 256], strides = [1, 1]} : vector<72x256xf32> to vector<8x256xf32>
    %235 = vector.broadcast %233 : vector<8x1xf32> to vector<8x256xf32>
    %236 = arith.addf %235, %234 : vector<8x256xf32>
    %237 = vector.extract_strided_slice %232 {offsets = [0, 0], sizes = [8, 256], strides = [1, 1]} : vector<72x256xf32> to vector<8x256xf32>
    %c17_i32_83 = arith.constant 17 : i32
    %238 = tpu.dynamic_rotate %237 by %c17_i32_83 dim 1 : vector<8x256xf32>, i32 -> vector<8x256xf32>
    %239 = vector.broadcast %30 : vector<1x256xf32> to vector<8x256xf32>
    %240 = arith.mulf %238, %239 : vector<8x256xf32>
    %241 = arith.addf %236, %240 : vector<8x256xf32>
    %242 = vector.extract_strided_slice %232 {offsets = [8, 0], sizes = [8, 256], strides = [1, 1]} : vector<72x256xf32> to vector<8x256xf32>
    %c16_i32_84 = arith.constant 16 : i32
    %243 = tpu.dynamic_rotate %242 by %c16_i32_84 dim 1 : vector<8x256xf32>, i32 -> vector<8x256xf32>
    %244 = vector.broadcast %51 : vector<1x256xf32> to vector<8x256xf32>
    %245 = arith.mulf %243, %244 : vector<8x256xf32>
    %246 = arith.addf %241, %245 : vector<8x256xf32>
    %247 = vector.extract_strided_slice %232 {offsets = [16, 0], sizes = [8, 256], strides = [1, 1]} : vector<72x256xf32> to vector<8x256xf32>
    %c15_i32_85 = arith.constant 15 : i32
    %248 = tpu.dynamic_rotate %247 by %c15_i32_85 dim 1 : vector<8x256xf32>, i32 -> vector<8x256xf32>
    %249 = vector.broadcast %72 : vector<1x256xf32> to vector<8x256xf32>
    %250 = arith.mulf %248, %249 : vector<8x256xf32>
    %251 = arith.addf %246, %250 : vector<8x256xf32>
    %252 = vector.extract_strided_slice %232 {offsets = [24, 0], sizes = [8, 256], strides = [1, 1]} : vector<72x256xf32> to vector<8x256xf32>
    %c1_i32_86 = arith.constant 1 : i32
    %253 = tpu.dynamic_rotate %252 by %c1_i32_86 dim 1 : vector<8x256xf32>, i32 -> vector<8x256xf32>
    %254 = vector.broadcast %93 : vector<1x256xf32> to vector<8x256xf32>
    %255 = arith.mulf %253, %254 : vector<8x256xf32>
    %256 = arith.addf %251, %255 : vector<8x256xf32>
    %257 = vector.extract_strided_slice %232 {offsets = [40, 0], sizes = [8, 256], strides = [1, 1]} : vector<72x256xf32> to vector<8x256xf32>
    %c255_i32_87 = arith.constant 255 : i32
    %258 = tpu.dynamic_rotate %257 by %c255_i32_87 dim 1 : vector<8x256xf32>, i32 -> vector<8x256xf32>
    %259 = vector.broadcast %114 : vector<1x256xf32> to vector<8x256xf32>
    %260 = arith.mulf %258, %259 : vector<8x256xf32>
    %261 = arith.addf %256, %260 : vector<8x256xf32>
    %262 = vector.extract_strided_slice %232 {offsets = [48, 0], sizes = [8, 256], strides = [1, 1]} : vector<72x256xf32> to vector<8x256xf32>
    %c241_i32_88 = arith.constant 241 : i32
    %263 = tpu.dynamic_rotate %262 by %c241_i32_88 dim 1 : vector<8x256xf32>, i32 -> vector<8x256xf32>
    %264 = vector.broadcast %135 : vector<1x256xf32> to vector<8x256xf32>
    %265 = arith.mulf %263, %264 : vector<8x256xf32>
    %266 = arith.addf %261, %265 : vector<8x256xf32>
    %267 = vector.extract_strided_slice %232 {offsets = [56, 0], sizes = [8, 256], strides = [1, 1]} : vector<72x256xf32> to vector<8x256xf32>
    %c240_i32_89 = arith.constant 240 : i32
    %268 = tpu.dynamic_rotate %267 by %c240_i32_89 dim 1 : vector<8x256xf32>, i32 -> vector<8x256xf32>
    %269 = vector.broadcast %156 : vector<1x256xf32> to vector<8x256xf32>
    %270 = arith.mulf %268, %269 : vector<8x256xf32>
    %271 = arith.addf %266, %270 : vector<8x256xf32>
    %272 = vector.extract_strided_slice %232 {offsets = [64, 0], sizes = [8, 256], strides = [1, 1]} : vector<72x256xf32> to vector<8x256xf32>
    %c239_i32_90 = arith.constant 239 : i32
    %273 = tpu.dynamic_rotate %272 by %c239_i32_90 dim 1 : vector<8x256xf32>, i32 -> vector<8x256xf32>
    %274 = vector.broadcast %177 : vector<1x256xf32> to vector<8x256xf32>
    %275 = arith.mulf %273, %274 : vector<8x256xf32>
    %276 = arith.addf %271, %275 : vector<8x256xf32>
    %cst_91 = arith.constant 0.000000e+00 : f32
    %277 = vector.broadcast %cst_91 : f32 to vector<8x256xf32>
    %278 = arith.maximumf %276, %277 : vector<8x256xf32>
    %c0_92 = arith.constant 0 : index
    %c0_93 = arith.constant 0 : index
    %279 = vector.load %arg8[%c0_92, %c0_93] : memref<8x8xf32, #tpu.memory_space<vmem>>, vector<8x8xf32>
    %cst_94 = arith.constant dense<0.000000e+00> : vector<8x256xf32>
    %280 = tpu.matmul %279, %278, %cst_94 {dimension_numbers = #tpu.dot_dimension_numbers<[1], [0], [0], [1], [0, 0, 1, 1], [], []>} : vector<8x8xf32>, vector<8x256xf32>, vector<8x256xf32> -> vector<8x256xf32>
    %c0_95 = arith.constant 0 : index
    %c0_96 = arith.constant 0 : index
    %281 = vector.load %arg9[%c0_95, %c0_96] : memref<8x1xf32, #tpu.memory_space<vmem>>, vector<8x1xf32>
    %282 = vector.broadcast %281 : vector<8x1xf32> to vector<8x256xf32>
    %283 = arith.addf %280, %282 : vector<8x256xf32>
    %c0_97 = arith.constant 0 : index
    %c0_98 = arith.constant 0 : index
    %284 = vector.load %arg10[%c0_97, %c0_98] : memref<72x8xf32, #tpu.memory_space<vmem>>, vector<72x8xf32>
    %cst_99 = arith.constant dense<0.000000e+00> : vector<72x256xf32>
    %285 = tpu.matmul %284, %283, %cst_99 {dimension_numbers = #tpu.dot_dimension_numbers<[1], [0], [0], [1], [0, 0, 1, 1], [], []>} : vector<72x8xf32>, vector<8x256xf32>, vector<72x256xf32> -> vector<72x256xf32>
    %c0_100 = arith.constant 0 : index
    %c0_101 = arith.constant 0 : index
    %286 = vector.load %arg11[%c0_100, %c0_101] : memref<8x1xf32, #tpu.memory_space<vmem>>, vector<8x1xf32>
    %287 = vector.extract_strided_slice %285 {offsets = [32, 0], sizes = [8, 256], strides = [1, 1]} : vector<72x256xf32> to vector<8x256xf32>
    %288 = vector.broadcast %286 : vector<8x1xf32> to vector<8x256xf32>
    %289 = arith.addf %288, %287 : vector<8x256xf32>
    %290 = vector.extract_strided_slice %285 {offsets = [0, 0], sizes = [8, 256], strides = [1, 1]} : vector<72x256xf32> to vector<8x256xf32>
    %c17_i32_102 = arith.constant 17 : i32
    %291 = tpu.dynamic_rotate %290 by %c17_i32_102 dim 1 : vector<8x256xf32>, i32 -> vector<8x256xf32>
    %292 = vector.broadcast %30 : vector<1x256xf32> to vector<8x256xf32>
    %293 = arith.mulf %291, %292 : vector<8x256xf32>
    %294 = arith.addf %289, %293 : vector<8x256xf32>
    %295 = vector.extract_strided_slice %285 {offsets = [8, 0], sizes = [8, 256], strides = [1, 1]} : vector<72x256xf32> to vector<8x256xf32>
    %c16_i32_103 = arith.constant 16 : i32
    %296 = tpu.dynamic_rotate %295 by %c16_i32_103 dim 1 : vector<8x256xf32>, i32 -> vector<8x256xf32>
    %297 = vector.broadcast %51 : vector<1x256xf32> to vector<8x256xf32>
    %298 = arith.mulf %296, %297 : vector<8x256xf32>
    %299 = arith.addf %294, %298 : vector<8x256xf32>
    %300 = vector.extract_strided_slice %285 {offsets = [16, 0], sizes = [8, 256], strides = [1, 1]} : vector<72x256xf32> to vector<8x256xf32>
    %c15_i32_104 = arith.constant 15 : i32
    %301 = tpu.dynamic_rotate %300 by %c15_i32_104 dim 1 : vector<8x256xf32>, i32 -> vector<8x256xf32>
    %302 = vector.broadcast %72 : vector<1x256xf32> to vector<8x256xf32>
    %303 = arith.mulf %301, %302 : vector<8x256xf32>
    %304 = arith.addf %299, %303 : vector<8x256xf32>
    %305 = vector.extract_strided_slice %285 {offsets = [24, 0], sizes = [8, 256], strides = [1, 1]} : vector<72x256xf32> to vector<8x256xf32>
    %c1_i32_105 = arith.constant 1 : i32
    %306 = tpu.dynamic_rotate %305 by %c1_i32_105 dim 1 : vector<8x256xf32>, i32 -> vector<8x256xf32>
    %307 = vector.broadcast %93 : vector<1x256xf32> to vector<8x256xf32>
    %308 = arith.mulf %306, %307 : vector<8x256xf32>
    %309 = arith.addf %304, %308 : vector<8x256xf32>
    %310 = vector.extract_strided_slice %285 {offsets = [40, 0], sizes = [8, 256], strides = [1, 1]} : vector<72x256xf32> to vector<8x256xf32>
    %c255_i32_106 = arith.constant 255 : i32
    %311 = tpu.dynamic_rotate %310 by %c255_i32_106 dim 1 : vector<8x256xf32>, i32 -> vector<8x256xf32>
    %312 = vector.broadcast %114 : vector<1x256xf32> to vector<8x256xf32>
    %313 = arith.mulf %311, %312 : vector<8x256xf32>
    %314 = arith.addf %309, %313 : vector<8x256xf32>
    %315 = vector.extract_strided_slice %285 {offsets = [48, 0], sizes = [8, 256], strides = [1, 1]} : vector<72x256xf32> to vector<8x256xf32>
    %c241_i32_107 = arith.constant 241 : i32
    %316 = tpu.dynamic_rotate %315 by %c241_i32_107 dim 1 : vector<8x256xf32>, i32 -> vector<8x256xf32>
    %317 = vector.broadcast %135 : vector<1x256xf32> to vector<8x256xf32>
    %318 = arith.mulf %316, %317 : vector<8x256xf32>
    %319 = arith.addf %314, %318 : vector<8x256xf32>
    %320 = vector.extract_strided_slice %285 {offsets = [56, 0], sizes = [8, 256], strides = [1, 1]} : vector<72x256xf32> to vector<8x256xf32>
    %c240_i32_108 = arith.constant 240 : i32
    %321 = tpu.dynamic_rotate %320 by %c240_i32_108 dim 1 : vector<8x256xf32>, i32 -> vector<8x256xf32>
    %322 = vector.broadcast %156 : vector<1x256xf32> to vector<8x256xf32>
    %323 = arith.mulf %321, %322 : vector<8x256xf32>
    %324 = arith.addf %319, %323 : vector<8x256xf32>
    %325 = vector.extract_strided_slice %285 {offsets = [64, 0], sizes = [8, 256], strides = [1, 1]} : vector<72x256xf32> to vector<8x256xf32>
    %c239_i32_109 = arith.constant 239 : i32
    %326 = tpu.dynamic_rotate %325 by %c239_i32_109 dim 1 : vector<8x256xf32>, i32 -> vector<8x256xf32>
    %327 = vector.broadcast %177 : vector<1x256xf32> to vector<8x256xf32>
    %328 = arith.mulf %326, %327 : vector<8x256xf32>
    %329 = arith.addf %324, %328 : vector<8x256xf32>
    %c0_110 = arith.constant 0 : index
    %c0_111 = arith.constant 0 : index
    %330 = vector.load %arg12[%c0_110, %c0_111] : memref<72x8xf32, #tpu.memory_space<vmem>>, vector<72x8xf32>
    %cst_112 = arith.constant dense<0.000000e+00> : vector<72x256xf32>
    %331 = tpu.matmul %330, %329, %cst_112 {dimension_numbers = #tpu.dot_dimension_numbers<[1], [0], [0], [1], [0, 0, 1, 1], [], []>} : vector<72x8xf32>, vector<8x256xf32>, vector<72x256xf32> -> vector<72x256xf32>
    %c0_113 = arith.constant 0 : index
    %c0_114 = arith.constant 0 : index
    %332 = vector.load %arg13[%c0_113, %c0_114] : memref<8x1xf32, #tpu.memory_space<vmem>>, vector<8x1xf32>
    %333 = vector.extract_strided_slice %331 {offsets = [32, 0], sizes = [8, 256], strides = [1, 1]} : vector<72x256xf32> to vector<8x256xf32>
    %334 = vector.broadcast %332 : vector<8x1xf32> to vector<8x256xf32>
    %335 = arith.addf %334, %333 : vector<8x256xf32>
    %336 = vector.extract_strided_slice %331 {offsets = [0, 0], sizes = [8, 256], strides = [1, 1]} : vector<72x256xf32> to vector<8x256xf32>
    %c17_i32_115 = arith.constant 17 : i32
    %337 = tpu.dynamic_rotate %336 by %c17_i32_115 dim 1 : vector<8x256xf32>, i32 -> vector<8x256xf32>
    %338 = vector.broadcast %30 : vector<1x256xf32> to vector<8x256xf32>
    %339 = arith.mulf %337, %338 : vector<8x256xf32>
    %340 = arith.addf %335, %339 : vector<8x256xf32>
    %341 = vector.extract_strided_slice %331 {offsets = [8, 0], sizes = [8, 256], strides = [1, 1]} : vector<72x256xf32> to vector<8x256xf32>
    %c16_i32_116 = arith.constant 16 : i32
    %342 = tpu.dynamic_rotate %341 by %c16_i32_116 dim 1 : vector<8x256xf32>, i32 -> vector<8x256xf32>
    %343 = vector.broadcast %51 : vector<1x256xf32> to vector<8x256xf32>
    %344 = arith.mulf %342, %343 : vector<8x256xf32>
    %345 = arith.addf %340, %344 : vector<8x256xf32>
    %346 = vector.extract_strided_slice %331 {offsets = [16, 0], sizes = [8, 256], strides = [1, 1]} : vector<72x256xf32> to vector<8x256xf32>
    %c15_i32_117 = arith.constant 15 : i32
    %347 = tpu.dynamic_rotate %346 by %c15_i32_117 dim 1 : vector<8x256xf32>, i32 -> vector<8x256xf32>
    %348 = vector.broadcast %72 : vector<1x256xf32> to vector<8x256xf32>
    %349 = arith.mulf %347, %348 : vector<8x256xf32>
    %350 = arith.addf %345, %349 : vector<8x256xf32>
    %351 = vector.extract_strided_slice %331 {offsets = [24, 0], sizes = [8, 256], strides = [1, 1]} : vector<72x256xf32> to vector<8x256xf32>
    %c1_i32_118 = arith.constant 1 : i32
    %352 = tpu.dynamic_rotate %351 by %c1_i32_118 dim 1 : vector<8x256xf32>, i32 -> vector<8x256xf32>
    %353 = vector.broadcast %93 : vector<1x256xf32> to vector<8x256xf32>
    %354 = arith.mulf %352, %353 : vector<8x256xf32>
    %355 = arith.addf %350, %354 : vector<8x256xf32>
    %356 = vector.extract_strided_slice %331 {offsets = [40, 0], sizes = [8, 256], strides = [1, 1]} : vector<72x256xf32> to vector<8x256xf32>
    %c255_i32_119 = arith.constant 255 : i32
    %357 = tpu.dynamic_rotate %356 by %c255_i32_119 dim 1 : vector<8x256xf32>, i32 -> vector<8x256xf32>
    %358 = vector.broadcast %114 : vector<1x256xf32> to vector<8x256xf32>
    %359 = arith.mulf %357, %358 : vector<8x256xf32>
    %360 = arith.addf %355, %359 : vector<8x256xf32>
    %361 = vector.extract_strided_slice %331 {offsets = [48, 0], sizes = [8, 256], strides = [1, 1]} : vector<72x256xf32> to vector<8x256xf32>
    %c241_i32_120 = arith.constant 241 : i32
    %362 = tpu.dynamic_rotate %361 by %c241_i32_120 dim 1 : vector<8x256xf32>, i32 -> vector<8x256xf32>
    %363 = vector.broadcast %135 : vector<1x256xf32> to vector<8x256xf32>
    %364 = arith.mulf %362, %363 : vector<8x256xf32>
    %365 = arith.addf %360, %364 : vector<8x256xf32>
    %366 = vector.extract_strided_slice %331 {offsets = [56, 0], sizes = [8, 256], strides = [1, 1]} : vector<72x256xf32> to vector<8x256xf32>
    %c240_i32_121 = arith.constant 240 : i32
    %367 = tpu.dynamic_rotate %366 by %c240_i32_121 dim 1 : vector<8x256xf32>, i32 -> vector<8x256xf32>
    %368 = vector.broadcast %156 : vector<1x256xf32> to vector<8x256xf32>
    %369 = arith.mulf %367, %368 : vector<8x256xf32>
    %370 = arith.addf %365, %369 : vector<8x256xf32>
    %371 = vector.extract_strided_slice %331 {offsets = [64, 0], sizes = [8, 256], strides = [1, 1]} : vector<72x256xf32> to vector<8x256xf32>
    %c239_i32_122 = arith.constant 239 : i32
    %372 = tpu.dynamic_rotate %371 by %c239_i32_122 dim 1 : vector<8x256xf32>, i32 -> vector<8x256xf32>
    %373 = vector.broadcast %177 : vector<1x256xf32> to vector<8x256xf32>
    %374 = arith.mulf %372, %373 : vector<8x256xf32>
    %375 = arith.addf %370, %374 : vector<8x256xf32>
    %cst_123 = arith.constant 0.000000e+00 : f32
    %376 = vector.broadcast %cst_123 : f32 to vector<8x256xf32>
    %377 = arith.maximumf %375, %376 : vector<8x256xf32>
    %c0_124 = arith.constant 0 : index
    %c0_125 = arith.constant 0 : index
    %378 = vector.load %arg18[%c0_124, %c0_125] : memref<256x512xf32, #tpu.memory_space<vmem>>, vector<256x512xf32>
    %cst_126 = arith.constant dense<0.000000e+00> : vector<8x512xf32>
    %379 = tpu.matmul %278, %378, %cst_126 {dimension_numbers = #tpu.dot_dimension_numbers<[1], [0], [0], [1], [0, 0, 1, 1], [], []>} : vector<8x256xf32>, vector<256x512xf32>, vector<8x512xf32> -> vector<8x512xf32>
    %380 = vector.extract_strided_slice %379 {offsets = [0, 0], sizes = [8, 256], strides = [1, 1]} : vector<8x512xf32> to vector<8x256xf32>
    %381 = vector.extract_strided_slice %379 {offsets = [0, 256], sizes = [8, 256], strides = [1, 1]} : vector<8x512xf32> to vector<8x256xf32>
    %c0_127 = arith.constant 0 : index
    %c0_128 = arith.constant 0 : index
    %382 = vector.load %arg14[%c0_127, %c0_128] : memref<8x8xf32, #tpu.memory_space<vmem>>, vector<8x8xf32>
    %cst_129 = arith.constant dense<0.000000e+00> : vector<8x256xf32>
    %383 = tpu.matmul %382, %380, %cst_129 {dimension_numbers = #tpu.dot_dimension_numbers<[1], [0], [0], [1], [0, 0, 1, 1], [], []>} : vector<8x8xf32>, vector<8x256xf32>, vector<8x256xf32> -> vector<8x256xf32>
    %c0_130 = arith.constant 0 : index
    %c0_131 = arith.constant 0 : index
    %384 = vector.load %arg15[%c0_130, %c0_131] : memref<8x1xf32, #tpu.memory_space<vmem>>, vector<8x1xf32>
    %385 = vector.broadcast %384 : vector<8x1xf32> to vector<8x256xf32>
    %386 = arith.addf %383, %385 : vector<8x256xf32>
    %cst_132 = arith.constant 0.000000e+00 : f32
    %387 = vector.broadcast %cst_132 : f32 to vector<8x256xf32>
    %388 = arith.maximumf %386, %387 : vector<8x256xf32>
    %c0_133 = arith.constant 0 : index
    %c0_134 = arith.constant 0 : index
    %389 = vector.load %arg16[%c0_133, %c0_134] : memref<8x8xf32, #tpu.memory_space<vmem>>, vector<8x8xf32>
    %cst_135 = arith.constant dense<0.000000e+00> : vector<8x256xf32>
    %390 = tpu.matmul %389, %388, %cst_135 {dimension_numbers = #tpu.dot_dimension_numbers<[1], [0], [0], [1], [0, 0, 1, 1], [], []>} : vector<8x8xf32>, vector<8x256xf32>, vector<8x256xf32> -> vector<8x256xf32>
    %c0_136 = arith.constant 0 : index
    %c0_137 = arith.constant 0 : index
    %391 = vector.load %arg17[%c0_136, %c0_137] : memref<8x1xf32, #tpu.memory_space<vmem>>, vector<8x1xf32>
    %392 = vector.broadcast %391 : vector<8x1xf32> to vector<8x256xf32>
    %393 = arith.addf %390, %392 : vector<8x256xf32>
    %cst_138 = arith.constant 0.000000e+00 : f32
    %394 = vector.broadcast %cst_138 : f32 to vector<8x256xf32>
    %395 = arith.subf %394, %393 : vector<8x256xf32>
    %396 = math.exp %395 : vector<8x256xf32>
    %cst_139 = arith.constant 1.000000e+00 : f32
    %397 = vector.broadcast %cst_139 : f32 to vector<8x256xf32>
    %398 = arith.addf %397, %396 : vector<8x256xf32>
    %399 = tpu.reciprocal %398 {approx = true} : vector<8x256xf32> -> vector<8x256xf32>
    %400 = arith.mulf %399, %380 : vector<8x256xf32>
    %401 = arith.mulf %399, %381 : vector<8x256xf32>
    %402 = tpu.concatenate %400, %401 in 1 : vector<8x256xf32>, vector<8x256xf32> -> vector<8x512xf32>
    %c0_140 = arith.constant 0 : index
    %c0_141 = arith.constant 0 : index
    %403 = vector.load %arg19[%c0_140, %c0_141] : memref<512x512xf32, #tpu.memory_space<vmem>>, vector<512x512xf32>
    %cst_142 = arith.constant dense<0.000000e+00> : vector<8x512xf32>
    %404 = tpu.matmul %402, %403, %cst_142 {dimension_numbers = #tpu.dot_dimension_numbers<[1], [0], [0], [1], [0, 0, 1, 1], [], []>} : vector<8x512xf32>, vector<512x512xf32>, vector<8x512xf32> -> vector<8x512xf32>
    %405 = vector.extract_strided_slice %404 {offsets = [0, 0], sizes = [8, 256], strides = [1, 1]} : vector<8x512xf32> to vector<8x256xf32>
    %406 = vector.extract_strided_slice %404 {offsets = [0, 256], sizes = [8, 256], strides = [1, 1]} : vector<8x512xf32> to vector<8x256xf32>
    %407 = arith.mulf %405, %405 : vector<8x256xf32>
    %408 = arith.mulf %406, %406 : vector<8x256xf32>
    %409 = arith.addf %407, %408 : vector<8x256xf32>
    %410 = math.sqrt %409 : vector<8x256xf32>
    %c0_143 = arith.constant 0 : index
    %c0_144 = arith.constant 0 : index
    %411 = vector.load %arg20[%c0_143, %c0_144] : memref<8x1xf32, #tpu.memory_space<vmem>>, vector<8x1xf32>
    %412 = vector.broadcast %411 : vector<8x1xf32> to vector<8x256xf32>
    %413 = arith.mulf %410, %412 : vector<8x256xf32>
    %c0_145 = arith.constant 0 : index
    %c0_146 = arith.constant 0 : index
    %414 = vector.load %arg21[%c0_145, %c0_146] : memref<8x1xf32, #tpu.memory_space<vmem>>, vector<8x1xf32>
    %415 = vector.broadcast %414 : vector<8x1xf32> to vector<8x256xf32>
    %416 = arith.addf %413, %415 : vector<8x256xf32>
    %cst_147 = arith.constant 0.000000e+00 : f32
    %417 = vector.broadcast %cst_147 : f32 to vector<8x256xf32>
    %418 = arith.maximumf %416, %417 : vector<8x256xf32>
    %419 = arith.addf %377, %418 : vector<8x256xf32>
    %420 = vector.extract_strided_slice %419 {offsets = [0, 0], sizes = [4, 256], strides = [1, 1]} : vector<8x256xf32> to vector<4x256xf32>
    %c0_148 = arith.constant 0 : index
    %c0_149 = arith.constant 0 : index
    %c0_150 = arith.constant 0 : index
    %421 = vector.load %arg22[%c0_148, %c0_149, %c0_150] : memref<1x4x256xf32, #tpu.memory_space<vmem>>, vector<1x4x256xf32>
    %422 = vector.shape_cast %421 : vector<1x4x256xf32> to vector<4x256xf32>
    %423 = vector.shape_cast %420 : vector<4x256xf32> to vector<1x4x256xf32>
    tpu.vector_store %arg22[%c0_148, %c0_149, %c0_150], %423 {strides = array<i32>} : memref<1x4x256xf32, #tpu.memory_space<vmem>>, vector<1x4x256xf32>,
    return
  }
  func.func @transform_0(%arg0: i32) -> (i32, i32, i32) {
    %c0_i32 = arith.constant 0 : i32
    %c0_i32_0 = arith.constant 0 : i32
    %c0_i32_1 = arith.constant 0 : i32
    return %arg0, %c0_i32, %c0_i32_0 : i32, i32, i32
  }
  func.func @transform_1(%arg0: i32) -> (i32, i32) {
    %c0_i32 = arith.constant 0 : i32
    %c0_i32_0 = arith.constant 0 : i32
    %c0_i32_1 = arith.constant 0 : i32
    return %c0_i32, %c0_i32_0 : i32, i32
  }
  func.func @transform_2(%arg0: i32) -> (i32, i32) {
    %c0_i32 = arith.constant 0 : i32
    %c0_i32_0 = arith.constant 0 : i32
    %c0_i32_1 = arith.constant 0 : i32
    return %c0_i32, %c0_i32_0 : i32, i32
  }
  func.func @transform_3(%arg0: i32) -> (i32, i32) {
    %c0_i32 = arith.constant 0 : i32
    %c0_i32_0 = arith.constant 0 : i32
    %c0_i32_1 = arith.constant 0 : i32
    return %c0_i32, %c0_i32_0 : i32, i32
  }
  func.func @transform_4(%arg0: i32) -> (i32, i32) {
    %c0_i32 = arith.constant 0 : i32
    %c0_i32_0 = arith.constant 0 : i32
    %c0_i32_1 = arith.constant 0 : i32
    return %c0_i32, %c0_i32_0 : i32, i32
  }
  func.func @transform_5(%arg0: i32) -> (i32, i32) {
    %c0_i32 = arith.constant 0 : i32
    %c0_i32_0 = arith.constant 0 : i32
    %c0_i32_1 = arith.constant 0 : i32
    return %c0_i32, %c0_i32_0 : i32, i32
  }
  func.func @transform_6(%arg0: i32) -> (i32, i32) {
    %c0_i32 = arith.constant 0 : i32
    %c0_i32_0 = arith.constant 0 : i32
    %c0_i32_1 = arith.constant 0 : i32
    return %c0_i32, %c0_i32_0 : i32, i32
  }
  func.func @transform_7(%arg0: i32) -> (i32, i32) {
    %c0_i32 = arith.constant 0 : i32
    %c0_i32_0 = arith.constant 0 : i32
    %c0_i32_1 = arith.constant 0 : i32
    return %c0_i32, %c0_i32_0 : i32, i32
  }
  func.func @transform_8(%arg0: i32) -> (i32, i32) {
    %c0_i32 = arith.constant 0 : i32
    %c0_i32_0 = arith.constant 0 : i32
    %c0_i32_1 = arith.constant 0 : i32
    return %c0_i32, %c0_i32_0 : i32, i32
  }
  func.func @transform_9(%arg0: i32) -> (i32, i32) {
    %c0_i32 = arith.constant 0 : i32
    %c0_i32_0 = arith.constant 0 : i32
    %c0_i32_1 = arith.constant 0 : i32
    return %c0_i32, %c0_i32_0 : i32, i32
  }
  func.func @transform_10(%arg0: i32) -> (i32, i32) {
    %c0_i32 = arith.constant 0 : i32
    %c0_i32_0 = arith.constant 0 : i32
    %c0_i32_1 = arith.constant 0 : i32
    return %c0_i32, %c0_i32_0 : i32, i32
  }
  func.func @transform_11(%arg0: i32) -> (i32, i32) {
    %c0_i32 = arith.constant 0 : i32
    %c0_i32_0 = arith.constant 0 : i32
    %c0_i32_1 = arith.constant 0 : i32
    return %c0_i32, %c0_i32_0 : i32, i32
  }
  func.func @transform_12(%arg0: i32) -> (i32, i32) {
    %c0_i32 = arith.constant 0 : i32
    %c0_i32_0 = arith.constant 0 : i32
    %c0_i32_1 = arith.constant 0 : i32
    return %c0_i32, %c0_i32_0 : i32, i32
  }
  func.func @transform_13(%arg0: i32) -> (i32, i32) {
    %c0_i32 = arith.constant 0 : i32
    %c0_i32_0 = arith.constant 0 : i32
    %c0_i32_1 = arith.constant 0 : i32
    return %c0_i32, %c0_i32_0 : i32, i32
  }
  func.func @transform_14(%arg0: i32) -> (i32, i32) {
    %c0_i32 = arith.constant 0 : i32
    %c0_i32_0 = arith.constant 0 : i32
    %c0_i32_1 = arith.constant 0 : i32
    return %c0_i32, %c0_i32_0 : i32, i32
  }
  func.func @transform_15(%arg0: i32) -> (i32, i32) {
    %c0_i32 = arith.constant 0 : i32
    %c0_i32_0 = arith.constant 0 : i32
    %c0_i32_1 = arith.constant 0 : i32
    return %c0_i32, %c0_i32_0 : i32, i32
  }
  func.func @transform_16(%arg0: i32) -> (i32, i32) {
    %c0_i32 = arith.constant 0 : i32
    %c0_i32_0 = arith.constant 0 : i32
    %c0_i32_1 = arith.constant 0 : i32
    return %c0_i32, %c0_i32_0 : i32, i32
  }
  func.func @transform_17(%arg0: i32) -> (i32, i32) {
    %c0_i32 = arith.constant 0 : i32
    %c0_i32_0 = arith.constant 0 : i32
    %c0_i32_1 = arith.constant 0 : i32
    return %c0_i32, %c0_i32_0 : i32, i32
  }
  func.func @transform_18(%arg0: i32) -> (i32, i32) {
    %c0_i32 = arith.constant 0 : i32
    %c0_i32_0 = arith.constant 0 : i32
    %c0_i32_1 = arith.constant 0 : i32
    return %c0_i32, %c0_i32_0 : i32, i32
  }
  func.func @transform_19(%arg0: i32) -> (i32, i32) {
    %c0_i32 = arith.constant 0 : i32
    %c0_i32_0 = arith.constant 0 : i32
    %c0_i32_1 = arith.constant 0 : i32
    return %c0_i32, %c0_i32_0 : i32, i32
  }
  func.func @transform_20(%arg0: i32) -> (i32, i32) {
    %c0_i32 = arith.constant 0 : i32
    %c0_i32_0 = arith.constant 0 : i32
    %c0_i32_1 = arith.constant 0 : i32
    return %c0_i32, %c0_i32_0 : i32, i32
  }
  func.func @transform_21(%arg0: i32) -> (i32, i32, i32) {
    %c0_i32 = arith.constant 0 : i32
    %c0_i32_0 = arith.constant 0 : i32
    %c0_i32_1 = arith.constant 0 : i32
    return %arg0, %c0_i32, %c0_i32_0 : i32, i32, i32
  }
}

</mosaic_0001>

<bundles_post_ra>
// kernel: _lambda_.1
= control target key start
LH: loop header
LB: loop body
LE: loop exit
PB: predicated region body
PF: predicated region fallthrough
CT: control target
= control target key end

     0   :  { %s5431_s0 = inlined_call_operand.vmem [shape: f32[2,8,256], index: 0, kind: input, shape index: {}]   ;;  %s5432_s1 = inlined_call_operand.hbm [shape: f32[8,8], index: 1, kind: input, shape index: {}]   ;;  %s5433_s2 = inlined_call_operand.hbm [shape: f32[8,1], index: 2, kind: input, shape index: {}]   ;;  %s5434_s3 = inlined_call_operand.vmem [shape: f32[72,8], index: 3, kind: input, shape index: {}]   ;;  %s5435_s4 = inlined_call_operand.hbm [shape: f32[8,1], index: 4, kind: input, shape index: {}]   ;;  %s5436_s5 = inlined_call_operand.vmem [shape: f32[72,8], index: 5, kind: input, shape index: {}]   ;;  %s5437_s6 = inlined_call_operand.hbm [shape: f32[8,1], index: 6, kind: input, shape index: {}]   ;;  %s5438_s7 = inlined_call_operand.hbm [shape: f32[8,8], index: 7, kind: input, shape index: {}]   ;;  %s5439_s8 = inlined_call_operand.hbm [shape: f32[8,1], index: 8, kind: input, shape index: {}]   ;;  %s5440_s9 = inlined_call_operand.vmem [shape: f32[72,8], index: 9, kind: input, shape index: {}]   ;;  %s5441_s10 = inlined_call_operand.hbm [shape: f32[8,1], index: 10, kind: input, shape index: {}]   ;;  %s5442_s11 = inlined_call_operand.vmem [shape: f32[72,8], index: 11, kind: input, shape index: {}]   ;;  %s5443_s12 = inlined_call_operand.hbm [shape: f32[8,1], index: 12, kind: input, shape index: {}]   ;;  %s5444_s13 = inlined_call_operand.vmem [shape: f32[8,8], index: 13, kind: input, shape index: {}]   ;;  %s5445_s14 = inlined_call_operand.vmem [shape: f32[8,1], index: 14, kind: input, shape index: {}]   ;;  %s5446_s15 = inlined_call_operand.vmem [shape: f32[8,8], index: 15, kind: input, shape index: {}]   ;;  %s5447_s16 = inlined_call_operand.vmem [shape: f32[8,1], index: 16, kind: input, shape index: {}]   ;;  %s5448_s17 = inlined_call_operand.hbm [shape: f32[256,512], index: 17, kind: input, shape index: {}]   ;;  %s5449_s18 = inlined_call_operand.hbm [shape: f32[512,512], index: 18, kind: input, shape index: {}]   ;;  %s5450_s19 = inlined_call_operand.vmem [shape: f32[8,1], index: 19, kind: input, shape index: {}]   ;;  %s5451_s20 = inlined_call_operand.vmem [shape: f32[8,1], index: 20, kind: input, shape index: {}]   ;;  %s5452_s21 = inlined_call_operand.vmem [shape: f32[2,4,256], index: 21, kind: output, shape index: {}]  }
   0x1   :  { %5476 = sst [smem:[#allocation25_spill]] %s5431_s0 }
   0x2   :  { %5477 = sst [smem:[#allocation26_spill]] %s5432_s1 }
   0x3   :  { %5478 = sst [smem:[#allocation27_spill]] %s5433_s2 }
   0x4   :  { %5479 = sst [smem:[#allocation28_spill]] %s5434_s3 }
   0x5   :  { %5480 = sst [smem:[#allocation29_spill]] %s5435_s4 }
   0x6   :  { %5481 = sst [smem:[#allocation30_spill]] %s5436_s5 }
   0x7   :  { %5482 = sst [smem:[#allocation31_spill]] %s5437_s6 }
   0x8   :  { %5483 = sst [smem:[#allocation32_spill]] %s5438_s7 }
   0x9   :  { %5484 = sst [smem:[#allocation33_spill]] %s5439_s8 }
   0xa   :  { %5485 = sst [smem:[#allocation34_spill]] %s5442_s11 }
   0xb   :  { %5486 = sst [smem:[#allocation35_spill]] %s5446_s15 }
   0xc   :  { %5487 = sst [smem:[#allocation36_spill]] %s5452_s21 }
   0xd   :  { %26 = vsyncpa [#allocation3], 0 }
   0xe   :  { %27 = vsyncpa [#allocation5], 0 }
   0xf   :  { %28 = vsyncpa [#allocation8], 0 }
  0x10   :  { %29 = vsyncpa [#allocation11], 0 }
  0x11   :  { %30 = vsyncpa [#allocation14], 0 }
  0x12   :  { %31 = vsyncpa [#allocation17], 0  ;;  %s4299_s2 = smov 0  }
  0x13 LB: > { %5488 = sst [smem:[#allocation24_spill]] %s4165_s2  ;;  %s4167_s25 = smov [#allocation4]   ;;  %s4165_s2 = sphi %s4299_s2, %s37_s2  }
  0x14   : > { %s538_s26 = sshll.u32 %s4167_s25, 4  ;;  %s4305_s27 = sadd.s32 4294967295, %s4165_s2   ;;  %s4310_s26 = int_to_ptr.vmem [resolvable:$true] %s538_s26 }
  0x15   : > { %p3245_p0 = scmp.ge.s32.totalorder %s4165_s2, 1  ;;  %p514_p1 = scmp.lt.s32.totalorder %s4165_s2, 3 }
  0x16   : > { %p5460_p2 = scmp.eq.s32.totalorder %s4305_s27, 0  ;;  %s4168_s28 = smov [#allocation7]  }
  0x17   : > { %p4312_p3 = pnand %p3245_p0, %p514_p1  ;;  %s566_s29 = sshll.u32 %s4168_s28, 4  ;;  %s4318_s29 = int_to_ptr.vmem [resolvable:$true] %s566_s29 }
  0x18   : > { %s4169_s0 = smov [#allocation10]   ;;  %s4170_s5 = smov [#allocation13]  }
  0x19   : > { %s5489_s3 = scalar_select %p4312_p3, 1, 0 }
  0x1a   : > { %p3760_p4 = pneg %p4312_p3  ;;  %s588_s4 = sshll.u32 %s4169_s0, 4  ;;  %s4326_s4 = int_to_ptr.vmem [resolvable:$true] %s588_s4 }
  0x1b   : > { %s616_s22 = sshll.u32 %s4170_s5, 4  ;;  %s5491_s24 = sld [smem:[#allocation27_spill]]  ;;  %s4328_s22 = int_to_ptr.vmem [resolvable:$true] %s616_s22 }
  0x1c   : > { %p4322_p5 = pnand %p5460_p2, %p3760_p4 }
  0x1e   : > { %p4338_p7 = pneg %p4322_p5 }
  0x21   : > { %s3855_s25 = scalar_lea.hbm %s5491_s24, 128 }
  0x22   : > { %p3856_p6 = scmp.ne.s32.totalorder %s5491_s24, %s3855_s25  ;;  %p3862_p10 = scmp.lt.u32.totalorder %s3855_s25, %s5491_s24 }
  0x24   : > { %p3858_p8 = pnand %p4338_p7, %p3856_p6 }
  0x26   : > { %p3859_p9 = pneg %p3858_p8 }
  0x28   : > { %p3864_p11 = pnand %p3862_p10, %p3859_p9 }
  0x2a   : > { %3867 = shalt.err (!%p3864_p11)
}
  0x2b   : > { %s3868_s2 = scalar_lea.vmem %s4310_s26, 128  ;;  %p3876_p1 = scmp.lt.s32.totalorder %s4310_s26, %s4310_s26 }
  0x2c   : > { %p3869_p12 = scmp.ne.s32.totalorder %s4310_s26, %s3868_s2  ;;  %p3877_p4 = scmp.lt.s32.totalorder %s3868_s2, %s3868_s2 }
  0x2e   : > { %p3871_p13 = pnand %p3869_p12, %p4338_p7  ;;  %p3878_p6 = por %p3877_p4, %p3876_p1 }
  0x30   : > { %p3872_p0 = pneg %p3871_p13 }
  0x32   : > { %p3879_p8 = pnand %p3878_p6, %p3872_p0 }
  0x34   : > { %3882 = shalt.err (!%p3879_p8)
}
  0x35   : > { %3766 = dma.hbm_to_vmem [thread:$0]  (!%p4322_p5), %s5491_s24, 128, %s4310_s26, [#allocation5]  }
  0x36   : > { %s5493_s6 = sld [smem:[#allocation31_spill]] }
  0x3c   : > { %s3883_s28 = scalar_lea.hbm %s5493_s6, 128 }
  0x3d   : > { %p3884_p9 = scmp.ne.s32.totalorder %s5493_s6, %s3883_s28  ;;  %p3890_p12 = scmp.lt.u32.totalorder %s3883_s28, %s5493_s6 }
  0x3f   : > { %p3886_p10 = pnand %p3884_p9, %p4338_p7 }
  0x41   : > { %p3887_p11 = pneg %p3886_p10 }
  0x43   : > { %p3892_p13 = pnand %p3890_p12, %p3887_p11 }
  0x45   : > { %3895 = shalt.err (!%p3892_p13)
}
  0x46   : > { %s3896_s26 = scalar_lea.vmem %s4318_s29, 128  ;;  %p3904_p6 = scmp.lt.s32.totalorder %s4318_s29, %s4318_s29 }
  0x47   : > { %p3897_p0 = scmp.ne.s32.totalorder %s4318_s29, %s3896_s26  ;;  %p3905_p8 = scmp.lt.s32.totalorder %s3896_s26, %s3896_s26 }
  0x49   : > { %p3899_p1 = pnand %p3897_p0, %p4338_p7  ;;  %p3906_p9 = por %p3905_p8, %p3904_p6 }
  0x4b   : > { %p3900_p4 = pneg %p3899_p1 }
  0x4d   : > { %p3907_p10 = pnand %p3906_p9, %p3900_p4 }
  0x4f   : > { %3910 = shalt.err (!%p3907_p10)
}
  0x50   : > { %3772 = dma.hbm_to_vmem [thread:$0]  (!%p4322_p5), %s5493_s6, 128, %s4318_s29, [#allocation8]  }
  0x51   : > { %s5494_s8 = sld [smem:[#allocation33_spill]] }
  0x57   : > { %s3911_s1 = scalar_lea.hbm %s5494_s8, 128 }
  0x58   : > { %p3912_p11 = scmp.ne.s32.totalorder %s5494_s8, %s3911_s1  ;;  %p3918_p0 = scmp.lt.u32.totalorder %s3911_s1, %s5494_s8 }
  0x5a   : > { %p3914_p12 = pnand %p3912_p11, %p4338_p7 }
  0x5c   : > { %p3915_p13 = pneg %p3914_p12 }
  0x5e   : > { %p3920_p1 = pnand %p3918_p0, %p3915_p13 }
  0x60   : > { %3923 = shalt.err (!%p3920_p1)
}
  0x61   : > { %s3924_s29 = scalar_lea.vmem %s4326_s4, 128  ;;  %p3932_p9 = scmp.lt.s32.totalorder %s4326_s4, %s4326_s4 }
  0x62   : > { %p3925_p4 = scmp.ne.s32.totalorder %s4326_s4, %s3924_s29  ;;  %p3933_p10 = scmp.lt.s32.totalorder %s3924_s29, %s3924_s29 }
  0x64   : > { %p3927_p6 = pnand %p3925_p4, %p4338_p7  ;;  %p3934_p11 = por %p3933_p10, %p3932_p9 }
  0x66   : > { %p3928_p8 = pneg %p3927_p6 }
  0x68   : > { %p3935_p12 = pnand %p3934_p11, %p3928_p8 }
  0x6a   : > { %3938 = shalt.err (!%p3935_p12)
}
  0x6b   : > { %3778 = dma.hbm_to_vmem [thread:$0]  (!%p4322_p5), %s5494_s8, 128, %s4326_s4, [#allocation11]  }
  0x6c   : > { %s3939_s23 = scalar_lea.hbm %s5443_s12, 128 }
  0x6d   : > { %p3940_p13 = scmp.ne.s32.totalorder %s5443_s12, %s3939_s23  ;;  %p3946_p4 = scmp.lt.u32.totalorder %s3939_s23, %s5443_s12 }
  0x6f   : > { %p3942_p0 = pnand %p3940_p13, %p4338_p7 }
  0x71   : > { %p3943_p1 = pneg %p3942_p0 }
  0x73   : > { %p3948_p6 = pnand %p3946_p4, %p3943_p1 }
  0x75   : > { %3951 = shalt.err (!%p3948_p6)
}
  0x76   : > { %s3952_s4 = scalar_lea.vmem %s4328_s22, 128  ;;  %p3960_p11 = scmp.lt.s32.totalorder %s4328_s22, %s4328_s22 }
  0x77   : > { %p3953_p8 = scmp.ne.s32.totalorder %s4328_s22, %s3952_s4  ;;  %p3961_p12 = scmp.lt.s32.totalorder %s3952_s4, %s3952_s4 }
  0x79   : > { %p3955_p9 = pnand %p3953_p8, %p4338_p7  ;;  %p3962_p13 = por %p3961_p12, %p3960_p11 }
  0x7b   : > { %p3956_p10 = pneg %p3955_p9 }
  0x7d   : > { %p3963_p0 = pnand %p3962_p13, %p3956_p10 }
  0x7f   : > { %3966 = shalt.err (!%p3963_p0)
}
  0x80   : > { %3784 = dma.hbm_to_vmem [thread:$0]  (!%p4322_p5), %s5443_s12, 128, %s4328_s22, [#allocation14]  }
  0x81   : > { %s4171_s26 = smov [#allocation2]   ;;  %s4172_s15 = smov [#allocation6]  }
  0x82   : > { %s527_s11 = sshll.u32 %s4171_s26, 4  ;;  %s552_s21 = sshll.u32 %s4172_s15, 4  ;;  %s528_s11 = int_to_ptr.vmem [resolvable:$true] %s527_s11  ;;  %s553_s21 = int_to_ptr.vmem [resolvable:$true] %s552_s21 }
  0x83   : > { %s5495_s25 = sld [smem:[#allocation26_spill]] }
  0x89   : > { %s3967_s28 = scalar_lea.hbm %s5495_s25, 128 }
  0x8a   : > { %p3968_p1 = scmp.ne.s32.totalorder %s5495_s25, %s3967_s28  ;;  %p3974_p8 = scmp.lt.u32.totalorder %s3967_s28, %s5495_s25 }
  0x8c   : > { %p3970_p4 = pnand %p3968_p1, %p4338_p7 }
  0x8e   : > { %p3971_p6 = pneg %p3970_p4 }
  0x90   : > { %p3976_p9 = pnand %p3974_p8, %p3971_p6 }
  0x92   : > { %3979 = shalt.err (!%p3976_p9)
}
  0x93   : > { %s3980_s22 = scalar_lea.vmem %s528_s11, 128  ;;  %p3988_p13 = scmp.lt.s32.totalorder %s528_s11, %s528_s11 }
  0x94   : > { %p3981_p10 = scmp.ne.s32.totalorder %s528_s11, %s3980_s22  ;;  %p3989_p0 = scmp.lt.s32.totalorder %s3980_s22, %s3980_s22 }
  0x96   : > { %p3983_p11 = pnand %p3981_p10, %p4338_p7  ;;  %p3990_p2 = por %p3989_p0, %p3988_p13 }
  0x98   : > { %p3984_p12 = pneg %p3983_p11 }
  0x9a   : > { %p3991_p3 = pnand %p3990_p2, %p3984_p12 }
  0x9c   : > { %3994 = shalt.err (!%p3991_p3)
}
  0x9d   : > { %3763 = dma.hbm_to_vmem [thread:$0]  (!%p4322_p5), %s5495_s25, 128, %s528_s11, [#allocation3]  }
  0x9e   : > { %s5496_s23 = sld [smem:[#allocation29_spill]] }
  0xa4   : > { %s3995_s1 = scalar_lea.hbm %s5496_s23, 128 }
  0xa5   : > { %p3996_p1 = scmp.ne.s32.totalorder %s5496_s23, %s3995_s1  ;;  %p4002_p3 = scmp.lt.u32.totalorder %s3995_s1, %s5496_s23 }
  0xa7   : > { %p3998_p4 = pnand %p3996_p1, %p4338_p7 }
  0xa9   : > { %p3999_p2 = pneg %p3998_p4 }
  0xab   : > { %p4004_p6 = pnand %p4002_p3, %p3999_p2 }
  0xad   : > { %4007 = shalt.err (!%p4004_p6)
}
  0xae   : > { %s4008_s22 = scalar_lea.vmem %s553_s21, 128  ;;  %p4016_p11 = scmp.lt.s32.totalorder %s553_s21, %s553_s21 }
  0xaf   : > { %p4009_p8 = scmp.ne.s32.totalorder %s553_s21, %s4008_s22  ;;  %p4017_p12 = scmp.lt.s32.totalorder %s4008_s22, %s4008_s22 }
  0xb1   : > { %p4011_p9 = pnand %p4009_p8, %p4338_p7  ;;  %p4018_p13 = por %p4017_p12, %p4016_p11 }
  0xb3   : > { %p4012_p10 = pneg %p4011_p9 }
  0xb5   : > { %p4019_p0 = pnand %p4018_p13, %p4012_p10 }
  0xb7   : > { %4022 = shalt.err (!%p4019_p0)
}
  0xb8   : > { %3769 = dma.hbm_to_vmem [thread:$0]  (!%p4322_p5), %s5496_s23, 128, %s553_s21, [#allocation5]  }
  0xb9   : > { %s4173_s26 = smov [#allocation9]   ;;  %s4174_s15 = smov [#allocation12]  }
  0xba   : > { %s577_s6 = sshll.u32 %s4173_s26, 4  ;;  %s602_s1 = sshll.u32 %s4174_s15, 4  ;;  %s578_s6 = int_to_ptr.vmem [resolvable:$true] %s577_s6  ;;  %s603_s1 = int_to_ptr.vmem [resolvable:$true] %s602_s1 }
  0xbb   : > { %s5497_s7 = sld [smem:[#allocation32_spill]] }
  0xc1   : > { %s4023_s4 = scalar_lea.hbm %s5497_s7, 128 }
  0xc2   : > { %p4024_p1 = scmp.ne.s32.totalorder %s5497_s7, %s4023_s4  ;;  %p4030_p3 = scmp.lt.u32.totalorder %s4023_s4, %s5497_s7 }
  0xc4   : > { %p4026_p4 = pnand %p4024_p1, %p4338_p7 }
  0xc6   : > { %p4027_p2 = pneg %p4026_p4 }
  0xc8   : > { %p4032_p6 = pnand %p4030_p3, %p4027_p2 }
  0xca   : > { %4035 = shalt.err (!%p4032_p6)
}
  0xcb   : > { %s4036_s21 = scalar_lea.vmem %s578_s6, 128  ;;  %p4044_p11 = scmp.lt.s32.totalorder %s578_s6, %s578_s6 }
  0xcc   : > { %p4037_p8 = scmp.ne.s32.totalorder %s578_s6, %s4036_s21  ;;  %p4045_p12 = scmp.lt.s32.totalorder %s4036_s21, %s4036_s21 }
  0xce   : > { %p4039_p9 = pnand %p4037_p8, %p4338_p7  ;;  %p4046_p13 = por %p4045_p12, %p4044_p11 }
  0xd0   : > { %p4040_p10 = pneg %p4039_p9 }
  0xd2   : > { %p4047_p0 = pnand %p4046_p13, %p4040_p10 }
  0xd4   : > { %4050 = shalt.err (!%p4047_p0)
}
  0xd5   : > { %3775 = dma.hbm_to_vmem [thread:$0]  (!%p4322_p5), %s5497_s7, 128, %s578_s6, [#allocation8]  }
  0xd6   : > { %s4051_s28 = scalar_lea.hbm %s5441_s10, 128 }
  0xd7   : > { %p4052_p1 = scmp.ne.s32.totalorder %s5441_s10, %s4051_s28  ;;  %p4058_p3 = scmp.lt.u32.totalorder %s4051_s28, %s5441_s10 }
  0xd9   : > { %p4054_p4 = pnand %p4052_p1, %p4338_p7 }
  0xdb   : > { %p4055_p2 = pneg %p4054_p4 }
  0xdd   : > { %p4060_p6 = pnand %p4058_p3, %p4055_p2 }
  0xdf   : > { %4063 = shalt.err (!%p4060_p6)
}
  0xe0   : > { %s4064_s11 = scalar_lea.vmem %s603_s1, 128  ;;  %p4072_p11 = scmp.lt.s32.totalorder %s603_s1, %s603_s1 }
  0xe1   : > { %p4065_p8 = scmp.ne.s32.totalorder %s603_s1, %s4064_s11  ;;  %p4073_p12 = scmp.lt.s32.totalorder %s4064_s11, %s4064_s11 }
  0xe3   : > { %p4067_p9 = pnand %p4065_p8, %p4338_p7  ;;  %p4074_p13 = por %p4073_p12, %p4072_p11 }
  0xe5   : > { %p4068_p10 = pneg %p4067_p9 }
  0xe7   : > { %p4075_p0 = pnand %p4074_p13, %p4068_p10 }
  0xe9   : > { %4078 = shalt.err (!%p4075_p0)
}
  0xea   : > { %3781 = dma.hbm_to_vmem [thread:$0]  (!%p4322_p5), %s5441_s10, 128, %s603_s1, [#allocation11]  }
  0xeb   : > { %s4175_s29 = smov [#allocation15]   ;;  %s4079_s28 = scalar_lea.hbm %s5448_s17, 16384 }
  0xec   : > { %s638_s26 = sshll.u32 %s4175_s29, 4  ;;  %p4080_p1 = scmp.ne.s32.totalorder %s5448_s17, %s4079_s28  ;;  %s639_s26 = int_to_ptr.vmem [resolvable:$true] %s638_s26 }
  0xed   : > { %p4086_p3 = scmp.lt.u32.totalorder %s4079_s28, %s5448_s17 }
  0xee   : > { %p4082_p4 = pnand %p4080_p1, %p4338_p7 }
  0xf0   : > { %p4083_p2 = pneg %p4082_p4 }
  0xf2   : > { %p4088_p6 = pnand %p4086_p3, %p4083_p2 }
  0xf4   : > { %4091 = shalt.err (!%p4088_p6)
}
  0xf5   : > { %s4092_s1 = scalar_lea.vmem %s639_s26, 16384  ;;  %p4100_p11 = scmp.lt.s32.totalorder %s639_s26, %s639_s26 }
  0xf6   : > { %p4093_p8 = scmp.ne.s32.totalorder %s639_s26, %s4092_s1  ;;  %p4101_p12 = scmp.lt.s32.totalorder %s4092_s1, %s4092_s1 }
  0xf8   : > { %p4095_p9 = pnand %p4093_p8, %p4338_p7  ;;  %p4102_p13 = por %p4101_p12, %p4100_p11 }
  0xfa   : > { %p4096_p10 = pneg %p4095_p9 }
  0xfc   : > { %p4103_p0 = pnand %p4102_p13, %p4096_p10 }
  0xfe   : > { %4106 = shalt.err (!%p4103_p0)
}
  0xff   : > { %s4176_s11 = smov 512   ;;  %s4177_s6 = smov 32  }
 0x100   : > { %3787 = dma.hbm_to_vmem [thread:$0]  (!%p4322_p5), %s5448_s17, 16384, %s639_s26, [#allocation14], %s4176_s11, %s4176_s11, %s4177_s6  }
 0x101   : > { %s4178_s8 = smov [#allocation16]   ;;  %s4107_s4 = scalar_lea.hbm %s5449_s18, 32768 }
 0x102   : > { %s651_s15 = sshll.u32 %s4178_s8, 4  ;;  %p4108_p1 = scmp.ne.s32.totalorder %s5449_s18, %s4107_s4  ;;  %s652_s15 = int_to_ptr.vmem [resolvable:$true] %s651_s15 }
 0x103   : > { %p4114_p3 = scmp.lt.u32.totalorder %s4107_s4, %s5449_s18 }
 0x104   : > { %p4110_p4 = pnand %p4108_p1, %p4338_p7 }
 0x106   : > { %p4111_p2 = pneg %p4110_p4 }
 0x108   : > { %p4116_p6 = pnand %p4114_p3, %p4111_p2 }
 0x10a   : > { %4119 = shalt.err (!%p4116_p6)
}
 0x10b   : > { %s4120_s26 = scalar_lea.vmem %s652_s15, 32768  ;;  %p4128_p11 = scmp.lt.s32.totalorder %s652_s15, %s652_s15 }
 0x10c   : > { %p4121_p8 = scmp.ne.s32.totalorder %s652_s15, %s4120_s26  ;;  %p4129_p12 = scmp.lt.s32.totalorder %s4120_s26, %s4120_s26 }
 0x10e   : > { %p4123_p9 = pnand %p4121_p8, %p4338_p7  ;;  %p4130_p13 = por %p4129_p12, %p4128_p11 }
 0x110   : > { %p4124_p10 = pneg %p4123_p9 }
 0x112   : > { %p4131_p0 = pnand %p4130_p13, %p4124_p10 }
 0x114   : > { %4134 = shalt.err (!%p4131_p0)
}
 0x115   : > { %3790 = dma.hbm_to_vmem [thread:$0]  (!%p4322_p5), %s5449_s18, 32768, %s652_s15, [#allocation17], %s4176_s11, %s4176_s11, %s4177_s6  }
 0x116   : > { %p5498_p1 = scmp.ne.s32.totalorder %s5489_s3, 0 }
 0x117   : > { %p5499_p4 = scmp.eq.s32.totalorder (!%p5498_p1), %s4305_s27, 0 }
 0x118   : > { %681 = sbr.rel (%p5498_p1) target bundleno = 2534 (0x9e6), region = 104 }
 0x11f   : > { %4140 = dma.done.wait (%p5499_p4), [#allocation3], 128   ;;  %p5500_p7 = pmov %p5499_p4 }
 0x120   : > { %p5501_p2 = pmov %p5499_p4 }
 0x121   : > { %4142 = vsyncadd (%p5500_p7), [#allocation3], 4294967168 }
 0x122   : > { %4144 = dma.done.wait (%p5501_p2), [#allocation5], 256   ;;  %p5502_p3 = pmov %p5501_p2 }
 0x123   : > { %p5503_p6 = pmov %p5501_p2 }
 0x124   : > { %4146 = vsyncadd (%p5502_p3), [#allocation5], 4294967040 }
 0x125   : > { %4148 = dma.done.wait (%p5503_p6), [#allocation8], 256   ;;  %p5504_p5 = pmov %p5501_p2 }
 0x126   : > { %p5505_p8 = pmov %p5501_p2 }
 0x127   : > { %4150 = vsyncadd (%p5504_p5), [#allocation8], 4294967040 }
 0x128   : > { %4152 = dma.done.wait (%p5505_p8), [#allocation11], 256   ;;  %p5506_p9 = pmov %p5501_p2 }
 0x129   : > { %p5507_p10 = pmov %p5501_p2 }
 0x12a   : > { %4154 = vsyncadd (%p5506_p9), [#allocation11], 4294967040 }
 0x12b   : > { %4156 = dma.done.wait (%p5507_p10), [#allocation14], 16512   ;;  %p5508_p11 = pmov %p5501_p2 }
 0x12c   : > { %p5509_p12 = pmov %p5501_p2 }
 0x12d   : > { %4158 = vsyncadd (%p5508_p11), [#allocation14], 4294950784 }
 0x12e   : > { %4160 = dma.done.wait (%p5509_p12), [#allocation17], 32768   ;;  %p5510_p13 = pmov %p5501_p2 }
 0x12f   : > { %p777_p0 = scmp.lt.s32.totalorder %s4305_s27, 1  ;;  %v4179_v0 = vmov 0.0   ;;  %v4180_v1 = vmov 0   ;;  %s5511_s0 = sld [smem:[#allocation25_spill]]  ;;  %v910_v4 = vld [vmem:[#allocation2] sm:$0xff]  ;;  %vm5462_vm0 = vcmask 64512   ;;  %v787_v40 = vlaneseq }
 0x130   : > { %4162 = vsyncadd (%p5510_p13), [#allocation17], 4294934528  ;;  %985 = vmatprep.mubr.f32.mxu0 %v4179_v0  ;;  %3841 = vset.pattern.permute.xlu0 %v4180_v1  ;;  %v911_v5 = vld [vmem:[#allocation4] sm:$0xff]  ;;  %v1147_v6 = vld [vmem:[#allocation6] sm:$0xff]  ;;  %s5512_s15 = sld [smem:[#allocation28_spill]]  ;;  %s4181_s28 = smov 17  }
 0x131   : > { %s5640_s27 = smov (!%p777_p0, %s4305_s27), 1  ;;  %1092 = vmatprep.mubr.f32.mxu1 %v4179_v0  ;;  %3842 = vset.pattern.permute.xlu1 %v4180_v1  ;;  %s4182_s5 = smov 16   ;;  %v1398_v39 = vld [vmem:[#allocation7] sm:$0xff]  ;;  %v4639_v41 = vand.u32 127, %v787_v40 }
 0x132   : > { %s3330_s7 = sshll.u32 %s5640_s27, 4  ;;  %914 = vperm.xlu0 %3841, %v911_v5   ;;  %s4183_s4 = smov 15   ;;  %v5523_v5 = vmov 0 }
 0x133   : > { %s4184_s2 = smov 1   ;;  %s4185_s22 = smov 127   ;;  %v789_v42 = vadd.s32 128, %v4639_v41  ;;  %v790_v43 = vcvt.s32.f32 %v4639_v41 }
 0x134   : > { %s4186_s1 = smov 113   ;;  %s5474_s26 = smov 112  }
 0x135   : > { %s781_s11 = scalar_lea.vmem %s5511_s0, %s3330_s7  ;;  %s4188_s21 = smov 111   ;;  %v791_v44 = vcvt.s32.f32 %v789_v42  ;;  %v792_v45 = vadd.f32 0.5, %v790_v43 }
 0x136   : > { %v909_v2 = vld [vmem:[%s781_s11 + $0x8] sm:$0xff]  ;;  %v908_v3 = vld [vmem:[%s781_s11] sm:$0xff]  ;;  %1150 = vperm.xlu0 %3841, %v1147_v6   ;;  %v994_v14 = vld [vmem:[%s5512_s15 + $0x10] sm:$0xff]  ;;  %s5600_s3 = sld [smem:[#allocation30_spill]]  ;;  %s5623_s11 = sld [smem:[#allocation34_spill]] }
 0x137   : > { %921 = vmatprep.subr.mxu0 %v909_v2  ;;  %v992_v12 = vld [vmem:[%s5512_s15] sm:$0xff]  ;;  %v993_v13 = vld [vmem:[%s5512_s15 + $0x8] sm:$0xff]  ;;  %v995_v15 = vld [vmem:[%s5512_s15 + $0x18] sm:$0xff]  ;;  %v793_v46 = vadd.f32 0.5, %v791_v44  ;;  %v794_v47 = vmul.f32 0.0625, %v792_v45  ;;  %s5632_s30 = sld [smem:[#allocation35_spill]] }
 0x138   : > { %922 = vmatpush1.msra.mxu0 %v908_v3  ;;  %v996_v16 = vld [vmem:[%s5512_s15 + $0x20] sm:$0xff]  ;;  %v997_v17 = vld [vmem:[%s5512_s15 + $0x28] sm:$0xff]  ;;  %v998_v18 = vld [vmem:[%s5512_s15 + $0x30] sm:$0xff] }
 0x139   : > { %3288 = vmatmul.mubr.msk.f32.vlgmr.msra.gmra.mrb[0].mxu0 %vm5462_vm0, %v910_v4  ;;  %v999_v19 = vld [vmem:[%s5512_s15 + $0x38] sm:$0xff]  ;;  %v1000_v20 = vld [vmem:[%s5512_s15 + $0x40] sm:$0xff]  ;;  %v795_v48 = vmul.f32 0.0625, %v793_v46  ;;  %v796_v49 = vfloor.f32 %v794_v47  ;;  %v5521_v4 = vmov 0 }
 0x13a   : > { %1343 = vmatprep.mubr.f32.mxu0 %v4179_v0 }
 0x13b   : > { %v797_v50 = vfloor.f32 %v795_v48  ;;  %v798_v51 = vmul.f32 16.0, %v796_v49  ;;  %v802_v55 = vadd.f32 -1.0, %v796_v49  ;;  %vm854_vm15 = vcmp.ge.f32.partialorder %v796_v49, 0.0 }
 0x13d   : > { %v799_v52 = vmul.f32 16.0, %v797_v50  ;;  %v4643_v53 = vsub.f32 %v790_v43, %v798_v51  ;;  %v803_v56 = vadd.f32 -1.0, %v797_v50  ;;  %vm804_vm1 = vcmp.ge.f32.partialorder %v802_v55, 0.0 }
 0x13e   : > { %vm806_vm2 = vcmp.le.f32.partialorder %v802_v55, 15.0 }
 0x13f   : > { %v4645_v54 = vsub.f32 %v791_v44, %v799_v52  ;;  %v4648_v57 = vadd.f32 -1.0, %v4643_v53  ;;  %vm805_vm3 = vcmp.ge.f32.partialorder %v803_v56, 0.0  ;;  %vm807_vm4 = vcmp.le.f32.partialorder %v803_v56, 15.0  ;;  %vm4653_vm5 = vmand %vm804_vm1, %vm806_vm2 }
 0x140   : > { %v4659_v60 = vadd.f32 1.0, %v4643_v53  ;;  %vm4661_vm7 = vmand %vm805_vm3, %vm807_vm4  ;;  %vm5464_vm9 = vcmp.ge.f32.partialorder %v4643_v53, 0.0  ;;  %vm856_vm1 = vcmp.le.f32.partialorder %v796_v49, 15.0  ;;  %vm855_vm3 = vcmp.ge.f32.partialorder %v797_v50, 0.0 }
 0x141   : > { %v4651_v58 = vadd.f32 -1.0, %v4645_v54  ;;  %vm5465_vm6 = vcmp.ge.f32.partialorder %v4648_v57, 0.0  ;;  %vm5466_vm11 = vcmp.ge.f32.partialorder %v4645_v54, 0.0  ;;  %v4677_v63 = vadd.f32 1.0, %v4645_v54  ;;  %vm4694_vm14 = vmand %vm4653_vm5, %vm5464_vm9 }
 0x142   : > { %vm4671_vm10 = vmand %vm4653_vm5, %vm5465_vm6  ;;  %vm5467_vm13 = vcmp.ge.f32.partialorder %v4659_v60, 0.0  ;;  %v5522_v4 = vsel %vm4694_vm14, 4294967295, %v5521_v4  ;;  %vm857_vm4 = vcmp.le.f32.partialorder %v797_v50, 15.0  ;;  %vm5471_vm9 = vcmp.le.f32.partialorder %v4659_v60, 15.0 }
 0x143   : > { %vm5463_vm8 = vcmp.ge.f32.partialorder %v4651_v58, 0.0  ;;  %vm4702_vm2 = vmand %vm4661_vm7, %vm5466_vm11  ;;  %vm5469_vm11 = vcmp.le.f32.partialorder %v4643_v53, 15.0 }
 0x144   : > { %vm4683_vm12 = vmand %vm4661_vm7, %vm5463_vm8  ;;  %v5524_v5 = vsel %vm4702_vm2, 4294967295, %v5523_v5  ;;  %vm5470_vm2 = vcmp.le.f32.partialorder %v4645_v54, 15.0 }
 0x145   : > { %vm4713_vm6 = vmand %vm4653_vm5, %vm5467_vm13  ;;  %vm5472_vm13 = vcmp.le.f32.partialorder %v4677_v63, 15.0 }
 0x146   : > { %vm4719_vm14 = vmand %vm854_vm15, %vm856_vm1  ;;  %vm5533_vm15 = vcmp.le.f32.partialorder %v4651_v58, 15.0 }
 0x147   : > { %vm4724_vm8 = vmand %vm855_vm3, %vm857_vm4  ;;  %vm5536_vm3 = vcmp.ge.f32.partialorder %v4677_v63, 0.0 }
 0x148   : > { %vm4740_vm1 = vmand %vm4683_vm12, %vm5533_vm15  ;;  %vm5540_vm12 = vnez %v5524_v5 }
 0x149   : > { %vm843_vm4 = vmand %vm4661_vm7, %vm5536_vm3  ;;  %vm5543_vm7 = vcmp.ge.f32.partialorder %v4648_v57, 0.0 }
 0x14a   : > { %vm4761_vm15 = vmand %vm5540_vm12, %vm5470_vm2 }
 0x14b   : > { %vm860_vm3 = vmand %vm4719_vm14, %vm5543_vm7  ;;  %vm5549_vm7 = vcmp.le.f32.partialorder %v4648_v57, 15.0 }
 0x14c   : > { %vm4783_vm2 = vmand %vm843_vm4, %vm5472_vm13  ;;  %vm5555_vm4 = vcmp.ge.f32.partialorder %v4659_v60, 0.0 }
 0x14d   : > { %vm868_vm13 = vmand %vm4719_vm14, %vm5555_vm4  ;;  %vm1170_vm4 = vcmp.lt.s32.totalorder %v4639_v41, 16 }
 0x1b1   : > { %v915_v8 = vpop.permute.xlu0 %914 }
 0x1b5   : > { %v4688_v2 = vpop.permute.xlu0 %1150 }
 0x20c   : > { %v987_v7 = vpop.f32.mrb[0].mxu0 }
 0x20d   : > { %v989_v9 = vpop.f32.mrb[1].mxu0  ;;  %v988_v11 = vadd.f32 %v987_v7, %v915_v8 }
 0x20e   : > { %v990_v10 = vadd.f32 %v989_v9, %v915_v8 }
 0x210   : > { %1028 = vmatprep.subr.mxu1 %v990_v10 }
 0x211   : > { %1029 = vmatpush1.msra.mxu1 %v988_v11 }
 0x212   : > { %3289 = vmatmul.mubr.msk.f32.vlgmr.msra.gmra.mrb[0].mxu1 %vm5462_vm0, %v992_v12 }
 0x213   : > { %1098 = vmatprep.mubr.f32.mxu1 %v4179_v0 }
 0x216   : > { %3290 = vmatmul.mubr.msk.f32.gmra.mrb[2].mxu1 %vm5462_vm0, %v993_v13 }
 0x217   : > { %1104 = vmatprep.mubr.f32.mxu1 %v4179_v0 }
 0x21a   : > { %3291 = vmatmul.mubr.msk.f32.gmra.mrb[4].mxu1 %vm5462_vm0, %v994_v14  ;;  %v5541_v14 = vmov 0 }
 0x21b   : > { %1110 = vmatprep.mubr.f32.mxu1 %v4179_v0  ;;  %v5542_v14 = vsel %vm4761_vm15, 4294967295, %v5541_v14  ;;  %vm4789_vm15 = vmand %vm860_vm3, %vm5549_vm7  ;;  %vm5556_vm3 = vcmp.ge.f32.partialorder %v4677_v63, 0.0 }
 0x21c   : > { %vm4807_vm7 = vmand %vm4724_vm8, %vm5556_vm3 }
 0x21e   : > { %3292 = vmatmul.mubr.msk.f32.gmra.mrb[6].mxu1 %vm5462_vm0, %v995_v15  ;;  %v876_v15 = vadd.f32 1.0, %v796_v49 }
 0x21f   : > { %1116 = vmatprep.mubr.f32.mxu1 %v4179_v0 }
 0x222   : > { %3293 = vmatmul.mubr.msk.f32.gmra.mrb[8].mxu1 %vm5462_vm0, %v996_v16  ;;  %v5544_v16 = vmov 0 }
 0x223   : > { %1122 = vmatprep.mubr.f32.mxu1 %v4179_v0 }
 0x226   : > { %3294 = vmatmul.mubr.msk.f32.gmra.mrb[10].mxu1 %vm5462_vm0, %v997_v17 }
 0x227   : > { %1128 = vmatprep.mubr.f32.mxu1 %v4179_v0 }
 0x22a   : > { %3295 = vmatmul.mubr.msk.f32.gmra.mrb[12].mxu1 %vm5462_vm0, %v998_v18  ;;  %v5547_v18 = vmov 0 }
 0x22b   : > { %1134 = vmatprep.mubr.f32.mxu1 %v4179_v0  ;;  %v5548_v18 = vsel %vm4783_vm2, 4294967295, %v5547_v18  ;;  %vm5561_vm2 = vcmp.le.f32.partialorder %v4659_v60, 15.0 }
 0x22c   : > { %vm4818_vm14 = vmand %vm868_vm13, %vm5561_vm2  ;;  %vm5566_vm13 = vcmp.ge.f32.partialorder %v4648_v57, 0.0  ;;  %vm5572_vm3 = vnez %v5548_v18 }
 0x22d   : > { %v4876_v43 = vsel %vm5572_vm3, 1.0, %v4179_v0 }
 0x22e   : > { %3296 = vmatmul.mubr.msk.f32.gmra.mrb[14].mxu1 %vm5462_vm0, %v999_v19  ;;  %v877_v19 = vadd.f32 1.0, %v797_v50 }
 0x22f   : > { %1140 = vmatprep.mubr.f32.mxu1 %v4179_v0 }
 0x232   : > { %3297 = vmatmul.mubr.msk.f32.gmra.mrb[16].mxu1 %vm5462_vm0, %v1000_v20  ;;  %vm5468_vm0 = vcmp.le.f32.partialorder %v4648_v57, 15.0  ;;  %v5550_v20 = vmov 0 }
 0x233   : > { %1562 = vmatprep.mubr.f32.mxu1 %v4179_v0  ;;  %vm4732_vm5 = vmand %vm4671_vm10, %vm5468_vm0  ;;  %vm5537_vm10 = vnez %v5522_v4  ;;  %v5551_v20 = vsel %vm4789_vm15, 4294967295, %v5550_v20 }
 0x234   : > { %vm4753_vm0 = vmand %vm5537_vm10, %vm5469_vm11  ;;  %vm5546_vm11 = vcmp.ge.f32.partialorder %v4651_v58, 0.0 }
 0x235   : > { %vm4773_vm10 = vmand %vm4713_vm6, %vm5471_vm9  ;;  %vm5552_vm6 = vcmp.le.f32.partialorder %v4651_v58, 15.0 }
 0x236   : > { %v5545_v16 = vsel %vm4773_vm10, 4294967295, %v5544_v16  ;;  %vm861_vm12 = vmand %vm4724_vm8, %vm5546_vm11  ;;  %vm878_vm11 = vcmp.ge.f32.partialorder %v876_v15, 0.0  ;;  %vm880_vm10 = vcmp.le.f32.partialorder %v876_v15, 15.0 }
 0x237   : > { %vm4795_vm9 = vmand %vm861_vm12, %vm5552_vm6  ;;  %vm879_vm12 = vcmp.ge.f32.partialorder %v877_v19, 0.0  ;;  %vm881_vm6 = vcmp.le.f32.partialorder %v877_v19, 15.0 }
 0x238   : > { %vm4812_vm15 = vmand %vm878_vm11, %vm880_vm10  ;;  %vm5568_vm10 = vcmp.le.f32.partialorder %v4677_v63, 15.0 }
 0x239   : > { %vm4823_vm8 = vmand %vm879_vm12, %vm881_vm6  ;;  %vm5473_vm6 = vcmp.lt.s32.totalorder %v4639_v41, 1 }
 0x23a   : > { %vm884_vm2 = vmand %vm4812_vm15, %vm5566_vm13  ;;  %vm1203_vm13 = vcmp.lt.s32.totalorder %v4639_v41, 127 }
 0x23b   : > { %vm4860_vm11 = vmand %vm4807_vm7, %vm5568_vm10  ;;  %vm5573_vm7 = vcmp.ge.f32.partialorder %v4651_v58, 0.0 }
 0x23c   : > { %vm4882_vm12 = vmand %vm4823_vm8, %vm5573_vm7 }
 0x2e5   : > { %v1094_v21 = vpop.f32.mrb[0].mxu1 }
 0x2e6   : > { %1155 = vrot.lane.b32.xlu1 %v1094_v21, %s4181_s28  ;;  %v1096_v22 = vpop.f32.mrb[1].mxu1 }
 0x2e9   : > { %v1100_v23 = vpop.f32.mrb[2].mxu1 }
 0x2ea   : > { %1157 = vrot.lane.b32.xlu1 %v1096_v22, %s4181_s28  ;;  %1166 = vrot.lane.b32.xlu0 %v1100_v23, %s4182_s5  ;;  %v1102_v24 = vpop.f32.mrb[3].mxu1  ;;  %v5553_v22 = vmov 0 }
 0x2eb   : > { %v5554_v22 = vsel %vm4795_vm9, 4294967295, %v5553_v22  ;;  %vm1159_vm9 = vcmp.lt.s32.totalorder %v4639_v41, 17 }
 0x2ec   : > { %vm5580_vm3 = vnez %v5554_v22 }
 0x2ed   : > { %v1106_v25 = vpop.f32.mrb[4].mxu1  ;;  %v4908_v51 = vsel %vm5580_vm3, 1.0, %v4179_v0  ;;  %vm5587_vm3 = vcmp.le.f32.partialorder %v4651_v58, 15.0  ;;  %v1249_v58 = vld [vmem:[%s5600_s3 + $0x30] sm:$0xff] }
 0x2ee   : > { %1168 = vrot.lane.b32.xlu1 %v1102_v24, %s4182_s5  ;;  %1177 = vrot.lane.b32.xlu0 %v1106_v25, %s4183_s4  ;;  %v1108_v26 = vpop.f32.mrb[5].mxu1 }
 0x2f1   : > { %v1112_v27 = vpop.f32.mrb[6].mxu1 }
 0x2f2   : > { %1179 = vrot.lane.b32.xlu1 %v1108_v26, %s4183_s4  ;;  %1188 = vrot.lane.b32.xlu0 %v1112_v27, %s4184_s2  ;;  %v1114_v28 = vpop.f32.mrb[7].mxu1 }
 0x2f5   : > { %v4626_v29 = vpop.f32.mrb[8].mxu1 }
 0x2f6   : > { %1190 = vrot.lane.b32.xlu1 %v1114_v28, %s4184_s2  ;;  %v4629_v30 = vpop.f32.mrb[9].mxu1  ;;  %v4830_v28 = vsel %vm4732_vm5, 1.0, %v4179_v0  ;;  %vm5567_vm5 = vnez %v5542_v14  ;;  %v1153_v56 = vadd.f32 %v4688_v2, %v4626_v29 }
 0x2f9   : > { %v1124_v31 = vpop.f32.mrb[10].mxu1 }
 0x2fa   : > { %1199 = vrot.lane.b32.xlu0 %v1124_v31, %s4185_s22  ;;  %v1126_v32 = vpop.f32.mrb[11].mxu1  ;;  %v4835_v31 = vsel %vm4740_vm1, 1.0, %v4179_v0  ;;  %vm1181_vm1 = vcmp.lt.s32.totalorder %v4639_v41, 15 }
 0x2fb   : > { %1201 = vrot.lane.b32.xlu1 %v1126_v32, %s4185_s22 }
 0x2fd   : > { %v1130_v33 = vpop.f32.mrb[12].mxu1 }
 0x2fe   : > { %1210 = vrot.lane.b32.xlu0 %v1130_v33, %s4186_s1  ;;  %v1132_v34 = vpop.f32.mrb[13].mxu1 }
 0x2ff   : > { %1212 = vrot.lane.b32.xlu1 %v1132_v34, %s4186_s1 }
 0x301   : > { %v1136_v35 = vpop.f32.mrb[14].mxu1 }
 0x302   : > { %1221 = vrot.lane.b32.xlu0 %v1136_v35, %s5474_s26  ;;  %v1138_v36 = vpop.f32.mrb[15].mxu1 }
 0x303   : > { %1223 = vrot.lane.b32.xlu1 %v1138_v36, %s5474_s26  ;;  %v4848_v36 = vsel %vm4753_vm0, 1.0, %v4179_v0  ;;  %vm5571_vm0 = vnez %v5545_v16 }
 0x304   : > { %v4871_v42 = vsel %vm5571_vm0, 1.0, %v4179_v0  ;;  %vm5579_vm0 = vnez %v5551_v20 }
 0x305   : > { %v1142_v37 = vpop.f32.mrb[16].mxu1  ;;  %v4903_v50 = vsel %vm5579_vm0, 1.0, %v4179_v0 }
 0x306   : > { %1232 = vrot.lane.b32.xlu0 %v1142_v37, %s4188_s21  ;;  %v1144_v38 = vpop.f32.mrb[17].mxu1  ;;  %v4853_v37 = vsel %vm5567_vm5, 1.0, %v4179_v0  ;;  %vm5576_vm5 = vcmp.le.f32.partialorder %v4648_v57, 15.0  ;;  %v1154_v57 = vadd.f32 %v4688_v2, %v4629_v30  ;;  %v4939_v30 = vsel %vm4818_vm14, 1.0, %v4179_v0  ;;  %v1244_v2 = vld [vmem:[%s5600_s3 + $0x8] sm:$0xff] }
 0x307   : > { %1234 = vrot.lane.b32.xlu1 %v1144_v38, %s4188_s21  ;;  %vm4892_vm10 = vmand %vm884_vm2, %vm5576_vm5  ;;  %vm5581_vm2 = vcmp.ge.f32.partialorder %v4643_v53, 0.0  ;;  %vm5584_vm5 = vcmp.ge.f32.partialorder %v4645_v54, 0.0 }
 0x308   : > { %vm4914_vm7 = vmand %vm4812_vm15, %vm5581_vm2 }
 0x309   : > { %vm4928_vm0 = vmand %vm4823_vm8, %vm5584_vm5  ;;  %vm1214_vm5 = vcmp.lt.s32.totalorder %v4639_v41, 113 }
 0x30a   : > { %1401 = vperm.xlu0 %3841, %v1398_v39   ;;  %vm4945_vm2 = vmand %vm4882_vm12, %vm5587_vm3  ;;  %vm5593_vm12 = vcmp.le.f32.partialorder %v4645_v54, 15.0  ;;  %v4987_v54 = vsel %vm4892_vm10, 1.0, %v4179_v0  ;;  %vm5598_vm10 = vcmp.le.f32.partialorder %v4659_v60, 15.0 }
 0x358   : > { %v1156_v3 = vpop.permute.xlu1 %1155 }
 0x35c   : > { %v1158_v8 = vpop.permute.xlu1 %1157  ;;  %v1167_v9 = vpop.permute.xlu0 %1166 }
 0x35d   : > { %v1160_v32 = vsel %vm1159_vm9, %v1156_v3, %v1158_v8  ;;  %v1161_v33 = vsel %vm1159_vm9, %v1158_v8, %v1156_v3  ;;  %v4963_v8 = vsel %vm4860_vm11, 1.0, %v4179_v0  ;;  %vm5596_vm11 = vcmp.ge.f32.partialorder %v4659_v60, 0.0 }
 0x35e   : > { %v1162_v45 = vmul.f32 %v4830_v28, %v1161_v33  ;;  %v1163_v46 = vmul.f32 %v4835_v31, %v1160_v32  ;;  %vm900_vm3 = vmand %vm4812_vm15, %vm5596_vm11 }
 0x360   : > { %v1169_v17 = vpop.permute.xlu1 %1168  ;;  %v1178_v21 = vpop.permute.xlu0 %1177  ;;  %v1164_v4 = vadd.f32 %v1162_v45, %v1153_v56  ;;  %v1165_v5 = vadd.f32 %v1163_v46, %v1154_v57 }
 0x361   : > { %v1171_v39 = vsel %vm1170_vm4, %v1167_v9, %v1169_v17  ;;  %v1172_v40 = vsel %vm1170_vm4, %v1169_v17, %v1167_v9  ;;  %v4992_v17 = vsel %vm4945_vm2, 1.0, %v4179_v0  ;;  %vm5599_vm2 = vcmp.le.f32.partialorder %v4677_v63, 15.0 }
 0x362   : > { %v1173_v59 = vmul.f32 %v4848_v36, %v1172_v40  ;;  %v1174_v61 = vmul.f32 %v4853_v37, %v1171_v39 }
 0x364   : > { %v1180_v23 = vpop.permute.xlu1 %1179  ;;  %v1189_v34 = vpop.permute.xlu0 %1188  ;;  %v1175_v12 = vadd.f32 %v1173_v59, %v1164_v4  ;;  %v1176_v13 = vadd.f32 %v1174_v61, %v1165_v5  ;;  %v1245_v4 = vld [vmem:[%s5600_s3 + $0x10] sm:$0xff]  ;;  %v1246_v5 = vld [vmem:[%s5600_s3 + $0x18] sm:$0xff] }
 0x365   : > { %v1182_v48 = vsel %vm1181_vm1, %v1178_v21, %v1180_v23  ;;  %v1183_v49 = vsel %vm1181_vm1, %v1180_v23, %v1178_v21 }
 0x366   : > { %v1184_v6 = vmul.f32 %v4871_v42, %v1183_v49  ;;  %v1185_v7 = vmul.f32 %v4876_v43, %v1182_v48 }
 0x368   : > { %v1191_v35 = vpop.permute.xlu1 %1190  ;;  %v1186_v20 = vadd.f32 %v1184_v6, %v1175_v12  ;;  %v1187_v21 = vadd.f32 %v1185_v7, %v1176_v13  ;;  %v1247_v6 = vld [vmem:[%s5600_s3 + $0x20] sm:$0xff]  ;;  %v1248_v7 = vld [vmem:[%s5600_s3 + $0x28] sm:$0xff] }
 0x369   : > { %v1193_v3 = vsel %vm5473_vm6, %v1189_v34, %v1191_v35  ;;  %v1194_v29 = vsel %vm5473_vm6, %v1191_v35, %v1189_v34  ;;  %vm5590_vm6 = vcmp.le.f32.partialorder %v4643_v53, 15.0 }
 0x36a   : > { %vm4956_vm14 = vmand %vm4914_vm7, %vm5590_vm6  ;;  %vm1225_vm7 = vcmp.lt.s32.totalorder %v4639_v41, 112  ;;  %v1195_v14 = vmul.f32 %v4903_v50, %v1194_v29  ;;  %v1196_v15 = vmul.f32 %v4908_v51, %v1193_v3  ;;  %v1243_v29 = vld [vmem:[%s5600_s3] sm:$0xff] }
 0x36b   : > { %vm4973_vm6 = vmand %vm4928_vm0, %vm5593_vm12  ;;  %vm5597_vm0 = vcmp.ge.f32.partialorder %v4677_v63, 0.0  ;;  %v5007_v25 = vsel %vm4956_vm14, 1.0, %v4179_v0  ;;  %vm1236_vm14 = vcmp.lt.s32.totalorder %v4639_v41, 111 }
 0x36c   : > { %v1200_v52 = vpop.permute.xlu0 %1199  ;;  %vm901_vm15 = vmand %vm4823_vm8, %vm5597_vm0  ;;  %v5012_v26 = vsel %vm4973_vm6, 1.0, %v4179_v0  ;;  %v1197_v27 = vadd.f32 %v1195_v14, %v1186_v20  ;;  %v1198_v32 = vadd.f32 %v1196_v15, %v1187_v21  ;;  %vm5601_vm6 = vcmask 64512  }
 0x36d   : > { %v1202_v62 = vpop.permute.xlu1 %1201  ;;  %vm902_vm8 = vmand %vm900_vm3, %vm5598_vm10 }
 0x36e   : > { %v1204_v9 = vsel %vm1203_vm13, %v1200_v52, %v1202_v62  ;;  %v1205_v10 = vsel %vm1203_vm13, %v1202_v62, %v1200_v52  ;;  %vm903_vm12 = vmand %vm901_vm15, %vm5599_vm2  ;;  %v5028_v47 = vsel %vm902_vm8, 1.0, %v4179_v0 }
 0x36f   : > { %v1206_v22 = vmul.f32 %v4939_v30, %v1204_v9  ;;  %v1207_v23 = vmul.f32 %v4963_v8, %v1205_v10  ;;  %v5031_v63 = vsel %vm903_vm12, 1.0, %v4179_v0  ;;  %vm5602_vm11 = vmmov %vm5601_vm6  ;;  %v1250_v9 = vld [vmem:[%s5600_s3 + $0x38] sm:$0xff]  ;;  %v1251_v10 = vld [vmem:[%s5600_s3 + $0x40] sm:$0xff] }
 0x370   : > { %v1211_v11 = vpop.permute.xlu0 %1210  ;;  %vm5603_vm3 = vmmov %vm5601_vm6 }
 0x371   : > { %v1213_v16 = vpop.permute.xlu1 %1212  ;;  %v1208_v60 = vadd.f32 %v1206_v22, %v1197_v27  ;;  %v1209_v40 = vadd.f32 %v1207_v23, %v1198_v32  ;;  %vm5604_vm0 = vmmov %vm5603_vm3 }
 0x372   : > { %v1215_v18 = vsel %vm1214_vm5, %v1211_v11, %v1213_v16  ;;  %v1216_v19 = vsel %vm1214_vm5, %v1213_v16, %v1211_v11  ;;  %vm5605_vm15 = vmmov %vm5604_vm0 }
 0x373   : > { %v1217_v33 = vmul.f32 %v4987_v54, %v1215_v18  ;;  %v1218_v34 = vmul.f32 %v4992_v17, %v1216_v19  ;;  %vm5606_vm10 = vmmov %vm5604_vm0 }
 0x374   : > { %v1222_v24 = vpop.permute.xlu0 %1221  ;;  %vm5607_vm8 = vmmov %vm5604_vm0 }
 0x375   : > { %v1224_v35 = vpop.permute.xlu1 %1223  ;;  %v1219_v48 = vadd.f32 %v1217_v33, %v1208_v60  ;;  %v1220_v49 = vadd.f32 %v1218_v34, %v1209_v40  ;;  %vm5608_vm2 = vmmov %vm5604_vm0 }
 0x376   : > { %v1226_v38 = vsel %vm1225_vm7, %v1222_v24, %v1224_v35  ;;  %v1227_v39 = vsel %vm1225_vm7, %v1224_v35, %v1222_v24  ;;  %vm5609_vm12 = vmmov %vm5604_vm0  ;;  %v1724_v35 = vld [vmem:[#allocation12] sm:$0xff] }
 0x377   : > { %v1228_v44 = vmul.f32 %v5007_v25, %v1226_v38  ;;  %v1229_v45 = vmul.f32 %v5012_v26, %v1227_v39  ;;  %v1489_v38 = vld [vmem:[#allocation10] sm:$0xff] }
 0x378   : > { %v1233_v46 = vpop.permute.xlu0 %1232 }
 0x379   : > { %v1235_v52 = vpop.permute.xlu1 %1234  ;;  %v1230_v57 = vadd.f32 %v1228_v44, %v1219_v48  ;;  %v1231_v59 = vadd.f32 %v1229_v45, %v1220_v49 }
 0x37a   : > { %v1237_v55 = vsel %vm1236_vm14, %v1233_v46, %v1235_v52  ;;  %v1238_v56 = vsel %vm1236_vm14, %v1235_v52, %v1233_v46 }
 0x37b   : > { %v1239_v61 = vmul.f32 %v5028_v47, %v1237_v55  ;;  %v1240_v62 = vmul.f32 %v5031_v63, %v1238_v56 }
 0x37d   : > { %v1241_v1 = vadd.f32 %v1239_v61, %v1230_v57  ;;  %v1242_v3 = vadd.f32 %v1240_v62, %v1231_v59 }
 0x37f   : > { %1279 = vmatprep.subr.mxu0 %v1242_v3 }
 0x380   : > { %1280 = vmatpush1.msra.mxu0 %v1241_v1 }
 0x381   : > { %3298 = vmatmul.mubr.msk.f32.vlgmr.msra.gmra.mrb[2].mxu0 %vm5601_vm6, %v1243_v29  ;;  %vm5610_vm6 = vcmp.lt.s32.totalorder %v4639_v41, 1 }
 0x382   : > { %1349 = vmatprep.mubr.f32.mxu0 %v4179_v0 }
 0x385   : > { %3299 = vmatmul.mubr.msk.f32.gmra.mrb[4].mxu0 %vm5602_vm11, %v1244_v2  ;;  %vm5611_vm11 = vmmov %vm5610_vm6 }
 0x386   : > { %1355 = vmatprep.mubr.f32.mxu0 %v4179_v0 }
 0x389   : > { %3300 = vmatmul.mubr.msk.f32.gmra.mrb[6].mxu0 %vm5603_vm3, %v1245_v4  ;;  %v1402_v39 = vpop.permute.xlu0 %1401  ;;  %vm5612_vm3 = vmmov %vm5604_vm0 }
 0x38a   : > { %1361 = vmatprep.mubr.f32.mxu0 %v4179_v0 }
 0x38d   : > { %3301 = vmatmul.mubr.msk.f32.gmra.mrb[8].mxu0 %vm5604_vm0, %v1246_v5 }
 0x38e   : > { %1367 = vmatprep.mubr.f32.mxu0 %v4179_v0 }
 0x391   : > { %3302 = vmatmul.mubr.msk.f32.gmra.mrb[10].mxu0 %vm5605_vm15, %v1247_v6  ;;  %vm5613_vm15 = vmmov %vm5604_vm0 }
 0x392   : > { %1373 = vmatprep.mubr.f32.mxu0 %v4179_v0 }
 0x395   : > { %3303 = vmatmul.mubr.msk.f32.gmra.mrb[12].mxu0 %vm5606_vm10, %v1248_v7  ;;  %vm5614_vm10 = vmmov %vm5604_vm0 }
 0x396   : > { %1379 = vmatprep.mubr.f32.mxu0 %v4179_v0 }
 0x399   : > { %3304 = vmatmul.mubr.msk.f32.gmra.mrb[14].mxu0 %vm5607_vm8, %v1249_v58  ;;  %vm5615_vm8 = vmmov %vm5604_vm0 }
 0x39a   : > { %1385 = vmatprep.mubr.f32.mxu0 %v4179_v0 }
 0x39d   : > { %3305 = vmatmul.mubr.msk.f32.gmra.mrb[16].mxu0 %vm5608_vm2, %v1250_v9  ;;  %vm5616_vm2 = vmmov %vm5604_vm0 }
 0x39e   : > { %1391 = vmatprep.mubr.f32.mxu0 %v4179_v0 }
 0x3a1   : > { %3306 = vmatmul.mubr.msk.f32.gmra.mrb[18].mxu0 %vm5609_vm12, %v1251_v10  ;;  %vm5617_vm12 = vmmov %vm5604_vm0 }
 0x3a2   : > { %1669 = vmatprep.mubr.f32.mxu0 %v4179_v0 }
 0x454   : > { %v1345_v11 = vpop.f32.mrb[2].mxu0 }
 0x455   : > { %1406 = vrot.lane.b32.xlu1 %v1345_v11, %s4181_s28  ;;  %v1347_v53 = vpop.f32.mrb[3].mxu0 }
 0x456   : > { %1408 = vrot.lane.b32.xlu0 %v1347_v53, %s4181_s28 }
 0x458   : > { %v1351_v12 = vpop.f32.mrb[4].mxu0 }
 0x459   : > { %1416 = vrot.lane.b32.xlu1 %v1351_v12, %s4182_s5  ;;  %v1353_v13 = vpop.f32.mrb[5].mxu0 }
 0x45a   : > { %1418 = vrot.lane.b32.xlu0 %v1353_v13, %s4182_s5 }
 0x45c   : > { %v1357_v14 = vpop.f32.mrb[6].mxu0 }
 0x45d   : > { %1426 = vrot.lane.b32.xlu1 %v1357_v14, %s4183_s4  ;;  %v1359_v15 = vpop.f32.mrb[7].mxu0 }
 0x45e   : > { %1428 = vrot.lane.b32.xlu0 %v1359_v15, %s4183_s4 }
 0x460   : > { %v1363_v16 = vpop.f32.mrb[8].mxu0 }
 0x461   : > { %1436 = vrot.lane.b32.xlu1 %v1363_v16, %s4184_s2  ;;  %v1365_v18 = vpop.f32.mrb[9].mxu0 }
 0x462   : > { %1438 = vrot.lane.b32.xlu0 %v1365_v18, %s4184_s2 }
 0x464   : > { %v1369_v19 = vpop.f32.mrb[10].mxu0 }
 0x465   : > { %v1371_v20 = vpop.f32.mrb[11].mxu0  ;;  %v1404_v2 = vadd.f32 %v1402_v39, %v1369_v19 }
 0x466   : > { %v1405_v4 = vadd.f32 %v1402_v39, %v1371_v20 }
 0x468   : > { %v1375_v21 = vpop.f32.mrb[12].mxu0 }
 0x469   : > { %1446 = vrot.lane.b32.xlu1 %v1375_v21, %s4185_s22  ;;  %v1377_v22 = vpop.f32.mrb[13].mxu0 }
 0x46a   : > { %1448 = vrot.lane.b32.xlu0 %v1377_v22, %s4185_s22 }
 0x46c   : > { %v1381_v23 = vpop.f32.mrb[14].mxu0 }
 0x46d   : > { %1456 = vrot.lane.b32.xlu1 %v1381_v23, %s4186_s1  ;;  %v1383_v24 = vpop.f32.mrb[15].mxu0 }
 0x46e   : > { %1458 = vrot.lane.b32.xlu0 %v1383_v24, %s4186_s1 }
 0x470   : > { %v1387_v27 = vpop.f32.mrb[16].mxu0 }
 0x471   : > { %1466 = vrot.lane.b32.xlu1 %v1387_v27, %s5474_s26  ;;  %v1389_v32 = vpop.f32.mrb[17].mxu0 }
 0x472   : > { %1468 = vrot.lane.b32.xlu0 %v1389_v32, %s5474_s26 }
 0x474   : > { %v1393_v33 = vpop.f32.mrb[18].mxu0 }
 0x475   : > { %1476 = vrot.lane.b32.xlu1 %v1393_v33, %s4188_s21  ;;  %v1395_v34 = vpop.f32.mrb[19].mxu0 }
 0x476   : > { %1478 = vrot.lane.b32.xlu0 %v1395_v34, %s4188_s21 }
 0x479   : > { %1492 = vperm.xlu1 %3842, %v1489_v38  }
 0x47a   : > { %1727 = vperm.xlu0 %3841, %v1724_v35  }
 0x4c7   : > { %v1407_v60 = vpop.permute.xlu1 %1406 }
 0x4c8   : > { %v1409_v40 = vpop.permute.xlu0 %1408 }
 0x4c9   : > { %v1410_v49 = vsel %vm1159_vm9, %v1407_v60, %v1409_v40  ;;  %v1411_v52 = vsel %vm1159_vm9, %v1409_v40, %v1407_v60 }
 0x4ca   : > { %v1412_v61 = vmul.f32 %v4830_v28, %v1411_v52  ;;  %v1413_v62 = vmul.f32 %v4835_v31, %v1410_v49 }
 0x4cb   : > { %v1417_v44 = vpop.permute.xlu1 %1416 }
 0x4cc   : > { %v1419_v45 = vpop.permute.xlu0 %1418  ;;  %v1414_v10 = vadd.f32 %v1412_v61, %v1404_v2  ;;  %v1415_v11 = vadd.f32 %v1413_v62, %v1405_v4 }
 0x4cd   : > { %v1420_v57 = vsel %vm1170_vm4, %v1417_v44, %v1419_v45  ;;  %v1421_v59 = vsel %vm1170_vm4, %v1419_v45, %v1417_v44 }
 0x4ce   : > { %v1422_v5 = vmul.f32 %v4848_v36, %v1421_v59  ;;  %v1423_v6 = vmul.f32 %v4853_v37, %v1420_v57 }
 0x4cf   : > { %v1427_v46 = vpop.permute.xlu1 %1426 }
 0x4d0   : > { %v1429_v48 = vpop.permute.xlu0 %1428  ;;  %v1424_v16 = vadd.f32 %v1422_v5, %v1414_v10  ;;  %v1425_v18 = vadd.f32 %v1423_v6, %v1415_v11  ;;  %v2058_v10 = vld [vmem:[#allocation15 + $0x8] sm:$0xff] }
 0x4d1   : > { %v1430_v1 = vsel %vm1181_vm1, %v1427_v46, %v1429_v48  ;;  %v1431_v3 = vsel %vm1181_vm1, %v1429_v48, %v1427_v46  ;;  %v2062_v11 = vld [vmem:[#allocation15 + $0x28] sm:$0xff] }
 0x4d2   : > { %v1432_v53 = vmul.f32 %v4871_v42, %v1431_v3  ;;  %v1433_v12 = vmul.f32 %v4876_v43, %v1430_v1 }
 0x4d3   : > { %v1437_v55 = vpop.permute.xlu1 %1436 }
 0x4d4   : > { %v1439_v56 = vpop.permute.xlu0 %1438  ;;  %v1434_v24 = vadd.f32 %v1432_v53, %v1424_v16  ;;  %v1435_v27 = vadd.f32 %v1433_v12, %v1425_v18  ;;  %v2057_v12 = vld [vmem:[#allocation15] sm:$0xff]  ;;  %v2070_v16 = vld [vmem:[#allocation15 + $0x68] sm:$0xff] }
 0x4d5   : > { %v1440_v58 = vsel %vm5610_vm6, %v1437_v55, %v1439_v56  ;;  %v1441_v9 = vsel %vm5611_vm11, %v1439_v56, %v1437_v55  ;;  %vm5618_vm6 = vmmov %vm5604_vm0 }
 0x4d6   : > { %v1442_v19 = vmul.f32 %v4903_v50, %v1441_v9  ;;  %v1443_v20 = vmul.f32 %v4908_v51, %v1440_v58  ;;  %v1488_v58 = vld [vmem:[#allocation9] sm:$0xff]  ;;  %vm5619_vm11 = vmmov %vm5604_vm0 }
 0x4d8   : > { %v1444_v35 = vadd.f32 %v1442_v19, %v1434_v24  ;;  %v1445_v38 = vadd.f32 %v1443_v20, %v1435_v27  ;;  %v3332_v19 = vpack.c.bf16 %v2062_v11, %v2058_v10  ;;  %v2065_v24 = vld [vmem:[#allocation15 + $0x40] sm:$0xff]  ;;  %v2106_v10 = vld [vmem:[#allocation15 + $0x188] sm:$0xff] }
 0x4d9   : > { %v2069_v27 = vld [vmem:[#allocation15 + $0x60] sm:$0xff]  ;;  %v2110_v11 = vld [vmem:[#allocation15 + $0x1a8] sm:$0xff] }
 0x4db   : > { %v1447_v29 = vpop.permute.xlu1 %1446 }
 0x4dc   : > { %v1449_v7 = vpop.permute.xlu0 %1448 }
 0x4dd   : > { %v1450_v13 = vsel %vm1203_vm13, %v1447_v29, %v1449_v7  ;;  %v1451_v14 = vsel %vm1203_vm13, %v1449_v7, %v1447_v29 }
 0x4de   : > { %v1452_v32 = vmul.f32 %v4939_v30, %v1450_v13  ;;  %v1453_v33 = vmul.f32 %v4963_v8, %v1451_v14  ;;  %v2061_v13 = vld [vmem:[#allocation15 + $0x20] sm:$0xff] }
 0x4df   : > { %v1457_v15 = vpop.permute.xlu1 %1456 }
 0x4e0   : > { %v1459_v21 = vpop.permute.xlu0 %1458  ;;  %v1454_v46 = vadd.f32 %v1452_v32, %v1444_v35  ;;  %v1455_v48 = vadd.f32 %v1453_v33, %v1445_v38  ;;  %v2074_v32 = vld [vmem:[#allocation15 + $0x88] sm:$0xff]  ;;  %v3338_v35 = vpack.c.bf16 %v2069_v27, %v2065_v24 }
 0x4e1   : > { %v1460_v22 = vsel %vm1214_vm5, %v1457_v15, %v1459_v21  ;;  %v1461_v23 = vsel %vm1214_vm5, %v1459_v21, %v1457_v15  ;;  %v2066_v15 = vld [vmem:[#allocation15 + $0x48] sm:$0xff]  ;;  %v1569_v21 = vld [vmem:[%s5440_s9] sm:$0xff] }
 0x4e2   : > { %v1462_v39 = vmul.f32 %v4987_v54, %v1460_v22  ;;  %v1463_v60 = vmul.f32 %v4992_v17, %v1461_v23  ;;  %v3334_v22 = vpack.c.bf16 %v2061_v13, %v2057_v12  ;;  %v3336_v23 = vpack.c.bf16 %v2070_v16, %v2066_v15  ;;  %v2078_v33 = vld [vmem:[#allocation15 + $0xa8] sm:$0xff]  ;;  %v2109_v15 = vld [vmem:[#allocation15 + $0x1a0] sm:$0xff] }
 0x4e3   : > { %v1467_v34 = vpop.permute.xlu1 %1466  ;;  %v3340_v38 = vpack.c.bf16 %v2078_v33, %v2074_v32  ;;  %v3356_v13 = vpack.c.bf16 %v2110_v11, %v2106_v10  ;;  %v2114_v16 = vld [vmem:[#allocation15 + $0x1c8] sm:$0xff]  ;;  %v1576_v32 = vld [vmem:[%s5440_s9 + $0x38] sm:$0xff]  ;;  %v2153_v10 = vld [vmem:[#allocation15 + $0x300] sm:$0xff] }
 0x4e4   : > { %v1469_v40 = vpop.permute.xlu0 %1468  ;;  %v1464_v56 = vadd.f32 %v1462_v39, %v1454_v46  ;;  %v1465_v57 = vadd.f32 %v1463_v60, %v1455_v48  ;;  %v2073_v39 = vld [vmem:[#allocation15 + $0x80] sm:$0xff]  ;;  %v2122_v24 = vld [vmem:[#allocation15 + $0x208] sm:$0xff] }
 0x4e5   : > { %v1470_v44 = vsel %vm1225_vm7, %v1467_v34, %v1469_v40  ;;  %v1471_v45 = vsel %vm1225_vm7, %v1469_v40, %v1467_v34  ;;  %v1570_v34 = vld [vmem:[%s5440_s9 + $0x8] sm:$0xff]  ;;  %v2077_v60 = vld [vmem:[#allocation15 + $0xa0] sm:$0xff] }
 0x4e6   : > { %v1472_v49 = vmul.f32 %v5007_v25, %v1470_v44  ;;  %v1473_v52 = vmul.f32 %v5012_v26, %v1471_v45  ;;  %v2082_v40 = vld [vmem:[#allocation15 + $0xc8] sm:$0xff]  ;;  %v1571_v45 = vld [vmem:[%s5440_s9 + $0x10] sm:$0xff]  ;;  %v3342_v46 = vpack.c.bf16 %v2077_v60, %v2073_v39  ;;  %v2157_v11 = vld [vmem:[#allocation15 + $0x320] sm:$0xff] }
 0x4e7   : > { %v1477_v55 = vpop.permute.xlu1 %1476  ;;  %v2086_v44 = vld [vmem:[#allocation15 + $0xe8] sm:$0xff] }
 0x4e8   : > { %v1479_v59 = vpop.permute.xlu0 %1478  ;;  %v1474_v1 = vadd.f32 %v1472_v49, %v1464_v56  ;;  %v1475_v3 = vadd.f32 %v1473_v52, %v1465_v57  ;;  %v3344_v48 = vpack.c.bf16 %v2086_v44, %v2082_v40  ;;  %v2081_v49 = vld [vmem:[#allocation15 + $0xc0] sm:$0xff]  ;;  %v2094_v56 = vld [vmem:[#allocation15 + $0x128] sm:$0xff]  ;;  %v1572_v57 = vld [vmem:[%s5440_s9 + $0x18] sm:$0xff] }
 0x4e9   : > { %v1480_v61 = vsel %vm1236_vm14, %v1477_v55, %v1479_v59  ;;  %v1481_v62 = vsel %vm1236_vm14, %v1479_v59, %v1477_v55  ;;  %v2085_v52 = vld [vmem:[#allocation15 + $0xe0] sm:$0xff]  ;;  %v2090_v55 = vld [vmem:[#allocation15 + $0x108] sm:$0xff] }
 0x4ea   : > { %v1482_v29 = vmul.f32 %v5028_v47, %v1480_v61  ;;  %v1483_v2 = vmul.f32 %v5031_v63, %v1481_v62  ;;  %v3346_v59 = vpack.c.bf16 %v2085_v52, %v2081_v49  ;;  %v3348_v61 = vpack.c.bf16 %v2094_v56, %v2090_v55  ;;  %v2089_v62 = vld [vmem:[#allocation15 + $0x100] sm:$0xff]  ;;  %v2126_v27 = vld [vmem:[#allocation15 + $0x228] sm:$0xff] }
 0x4eb   : > { %v2130_v39 = vld [vmem:[#allocation15 + $0x248] sm:$0xff]  ;;  %v1577_v40 = vld [vmem:[%s5440_s9 + $0x40] sm:$0xff] }
 0x4ec   : > { %v1484_v4 = vadd.f32 %v1482_v29, %v1474_v1  ;;  %v1485_v5 = vadd.f32 %v1483_v2, %v1475_v3  ;;  %v2093_v1 = vld [vmem:[#allocation15 + $0x120] sm:$0xff]  ;;  %v2098_v3 = vld [vmem:[#allocation15 + $0x148] sm:$0xff] }
 0x4ed   : > { %v2102_v29 = vld [vmem:[#allocation15 + $0x168] sm:$0xff]  ;;  %v1573_v2 = vld [vmem:[%s5440_s9 + $0x20] sm:$0xff] }
 0x4ee   : > { %v5148_v6 = vmax.f32 %v1484_v4, 0.0  ;;  %v5150_v7 = vmax.f32 %v1485_v5, 0.0  ;;  %v3350_v4 = vpack.c.bf16 %v2093_v1, %v2089_v62  ;;  %v3352_v5 = vpack.c.bf16 %v2102_v29, %v2098_v3  ;;  %v2134_v60 = vld [vmem:[#allocation15 + $0x268] sm:$0xff]  ;;  %v2145_v29 = vld [vmem:[#allocation15 + $0x2c0] sm:$0xff] }
 0x4ef   : > { %v2138_v49 = vld [vmem:[#allocation15 + $0x288] sm:$0xff] }
 0x4f0   : > { %1498 = vmatprep.subr.mxu1 %v5150_v7  ;;  %v2142_v52 = vld [vmem:[#allocation15 + $0x2a8] sm:$0xff] }
 0x4f1   : > { %1499 = vmatpush1.msra.mxu1 %v5148_v6  ;;  %v3372_v56 = vpack.c.bf16 %v2142_v52, %v2138_v49  ;;  %v2150_v62 = vld [vmem:[#allocation15 + $0x2e8] sm:$0xff] }
 0x4f2   : > { %3307 = vmatmul.mubr.msk.f32.vlgmr.msra.gmra.mrb[18].mxu1 %vm5612_vm3, %v1488_v58  ;;  %v2097_v58 = vld [vmem:[#allocation15 + $0x140] sm:$0xff]  ;;  %vm5620_vm3 = vmmov %vm5604_vm0 }
 0x4f3   : > { %1912 = vmatprep.mubr.f32.mxu1 %v4179_v0 }
 0x4f8   : > { %v1493_v9 = vpop.permute.xlu1 %1492 }
 0x5c5   : > { %v1564_v53 = vpop.f32.mrb[18].mxu1 }
 0x5c6   : > { %v1566_v14 = vpop.f32.mrb[19].mxu1  ;;  %v1565_v20 = vadd.f32 %v1564_v53, %v1493_v9  ;;  %v1574_v53 = vld [vmem:[%s5440_s9 + $0x28] sm:$0xff] }
 0x5c7   : > { %v1567_v18 = vadd.f32 %v1566_v14, %v1493_v9  ;;  %v2101_v9 = vld [vmem:[#allocation15 + $0x160] sm:$0xff] }
 0x5c8   : > { %v3354_v12 = vpack.c.bf16 %v2101_v9, %v2097_v58  ;;  %v2105_v14 = vld [vmem:[#allocation15 + $0x180] sm:$0xff] }
 0x5c9   : > { %1605 = vmatprep.subr.mxu0 %v1567_v18  ;;  %v2118_v18 = vld [vmem:[#allocation15 + $0x1e8] sm:$0xff] }
 0x5ca   : > { %1606 = vmatpush1.msra.mxu0 %v1565_v20  ;;  %v3358_v20 = vpack.c.bf16 %v2109_v15, %v2105_v14  ;;  %v2161_v15 = vld [vmem:[#allocation15 + $0x340] sm:$0xff] }
 0x5cb   : > { %3308 = vmatmul.mubr.msk.f32.vlgmr.msra.gmra.mrb[20].mxu0 %vm5604_vm0, %v1569_v21  ;;  %3333 = vmatprep.subr.bf16.mxu0 %v3332_v19  ;;  %v1575_v19 = vld [vmem:[%s5440_s9 + $0x30] sm:$0xff]  ;;  %v3360_v21 = vpack.c.bf16 %v2118_v18, %v2114_v16  ;;  %v2165_v16 = vld [vmem:[#allocation15 + $0x360] sm:$0xff]  ;;  %v2170_v18 = vld [vmem:[#allocation15 + $0x388] sm:$0xff] }
 0x5cc   : > { %3335 = vmatpush1.bf16.msra.mxu0 %v3334_v22  ;;  %1675 = vmatprep.mubr.f32.mxu0 %v4179_v0  ;;  %v2113_v22 = vld [vmem:[#allocation15 + $0x1c0] sm:$0xff] }
 0x5cd   : > { %3337 = vmatprep.subr.bf16.mxu0 %v3336_v23  ;;  %v2117_v23 = vld [vmem:[#allocation15 + $0x1e0] sm:$0xff] }
 0x5ce   : > { %v3362_v33 = vpack.c.bf16 %v2117_v23, %v2113_v22  ;;  %v2169_v22 = vld [vmem:[#allocation15 + $0x380] sm:$0xff] }
 0x5cf   : > { %3309 = vmatmul.mubr.msk.f32.gmra.mrb[22].mxu0 %vm5613_vm15, %v1570_v34  ;;  %v3364_v34 = vpack.c.bf16 %v2126_v27, %v2122_v24  ;;  %v2173_v23 = vld [vmem:[#allocation15 + $0x3a0] sm:$0xff]  ;;  %v2178_v24 = vld [vmem:[#allocation15 + $0x3c8] sm:$0xff]  ;;  %vm5621_vm15 = vcmp.lt.s32.totalorder %v4639_v41, 1 }
 0x5d0   : > { %3339 = vmatpush1.bf16.msra.mxu0 %v3338_v35  ;;  %1681 = vmatprep.mubr.f32.mxu0 %v4179_v0  ;;  %v2121_v35 = vld [vmem:[#allocation15 + $0x200] sm:$0xff]  ;;  %v2182_v27 = vld [vmem:[#allocation15 + $0x3e8] sm:$0xff] }
 0x5d1   : > { %3341 = vmatprep.subr.bf16.mxu0 %v3340_v38  ;;  %v2125_v38 = vld [vmem:[#allocation15 + $0x220] sm:$0xff] }
 0x5d2   : > { %v3366_v44 = vpack.c.bf16 %v2125_v38, %v2121_v35  ;;  %v2181_v35 = vld [vmem:[#allocation15 + $0x3e0] sm:$0xff] }
 0x5d3   : > { %3310 = vmatmul.mubr.msk.f32.gmra.mrb[24].mxu0 %vm5614_vm10, %v1571_v45  ;;  %v3368_v45 = vpack.c.bf16 %v2134_v60, %v2130_v39  ;;  %vm5622_vm10 = vmmov %vm5621_vm15 }
 0x5d4   : > { %3343 = vmatpush1.bf16.msra.mxu0 %v3342_v46  ;;  %1687 = vmatprep.mubr.f32.mxu0 %v4179_v0  ;;  %v2129_v46 = vld [vmem:[#allocation15 + $0x240] sm:$0xff] }
 0x5d5   : > { %3345 = vmatprep.subr.bf16.mxu0 %v3344_v48  ;;  %v2133_v48 = vld [vmem:[#allocation15 + $0x260] sm:$0xff] }
 0x5d6   : > { %v3370_v55 = vpack.c.bf16 %v2133_v48, %v2129_v46 }
 0x5d7   : > { %3311 = vmatmul.mubr.msk.f32.gmra.mrb[26].mxu0 %vm5615_vm8, %v1572_v57  ;;  %v2137_v57 = vld [vmem:[#allocation15 + $0x280] sm:$0xff]  ;;  %vm5624_vm8 = vmmov %vm5604_vm0 }
 0x5d8   : > { %3347 = vmatpush1.bf16.msra.mxu0 %v3346_v59  ;;  %1693 = vmatprep.mubr.f32.mxu0 %v4179_v0  ;;  %v2141_v59 = vld [vmem:[#allocation15 + $0x2a0] sm:$0xff] }
 0x5d9   : > { %3349 = vmatprep.subr.bf16.mxu0 %v3348_v61  ;;  %v2146_v61 = vld [vmem:[#allocation15 + $0x2c8] sm:$0xff]  ;;  %v3374_v1 = vpack.c.bf16 %v2141_v59, %v2137_v57 }
 0x5da   : > { %v3376_v3 = vpack.c.bf16 %v2150_v62, %v2146_v61 }
 0x5db   : > { %3312 = vmatmul.mubr.msk.f32.gmra.mrb[28].mxu0 %vm5616_vm2, %v1573_v2  ;;  %v2149_v2 = vld [vmem:[#allocation15 + $0x2e0] sm:$0xff]  ;;  %vm5625_vm2 = vmmov %vm5604_vm0 }
 0x5dc   : > { %3351 = vmatpush1.bf16.msra.mxu0 %v3350_v4  ;;  %1699 = vmatprep.mubr.f32.mxu0 %v4179_v0  ;;  %v2154_v4 = vld [vmem:[#allocation15 + $0x308] sm:$0xff]  ;;  %v3378_v58 = vpack.c.bf16 %v2149_v2, %v2145_v29  ;;  %v2328_v2 = vld [vmem:[%s5445_s14] sm:$0xff] }
 0x5dd   : > { %3353 = vmatprep.subr.bf16.mxu0 %v3352_v5  ;;  %v2158_v5 = vld [vmem:[#allocation15 + $0x328] sm:$0xff] }
 0x5de   : > { %v3380_v9 = vpack.c.bf16 %v2158_v5, %v2154_v4  ;;  %v2411_v4 = vld [vmem:[%s5447_s16] sm:$0xff]  ;;  %v1967_v5 = vld [vmem:[#allocation13] sm:$0xff] }
 0x5df   : > { %3313 = vmatmul.mubr.msk.f32.gmra.mrb[30].mxu0 %vm5617_vm12, %v1574_v53  ;;  %v2162_v53 = vld [vmem:[#allocation15 + $0x348] sm:$0xff]  ;;  %vm5626_vm12 = vmmov %vm5604_vm0 }
 0x5e0   : > { %3355 = vmatpush1.bf16.msra.mxu0 %v3354_v12  ;;  %1705 = vmatprep.mubr.f32.mxu0 %v4179_v0  ;;  %v2166_v12 = vld [vmem:[#allocation15 + $0x368] sm:$0xff] }
 0x5e1   : > { %3357 = vmatprep.subr.bf16.mxu0 %v3356_v13  ;;  %v3382_v13 = vpack.c.bf16 %v2157_v11, %v2153_v10  ;;  %v3384_v14 = vpack.c.bf16 %v2166_v12, %v2162_v53  ;;  %v2327_v53 = vld [vmem:[%s5444_s13] sm:$0xff]  ;;  %v1728_v12 = vpop.permute.xlu0 %1727 }
 0x5e3   : > { %3314 = vmatmul.mubr.msk.f32.gmra.mrb[32].mxu0 %vm5618_vm6, %v1575_v19  ;;  %v2174_v19 = vld [vmem:[#allocation15 + $0x3a8] sm:$0xff]  ;;  %vm5627_vm6 = vmmov %vm5604_vm0 }
 0x5e4   : > { %3359 = vmatpush1.bf16.msra.mxu0 %v3358_v20  ;;  %1711 = vmatprep.mubr.f32.mxu0 %v4179_v0  ;;  %v3386_v20 = vpack.c.bf16 %v2165_v16, %v2161_v15 }
 0x5e5   : > { %3361 = vmatprep.subr.bf16.mxu0 %v3360_v21  ;;  %v3388_v21 = vpack.c.bf16 %v2174_v19, %v2170_v18 }
 0x5e7   : > { %3315 = vmatmul.mubr.msk.f32.gmra.mrb[34].mxu0 %vm5619_vm11, %v1576_v32  ;;  %v3390_v32 = vpack.c.bf16 %v2173_v23, %v2169_v22  ;;  %vm5628_vm11 = vmmov %vm5604_vm0 }
 0x5e8   : > { %3363 = vmatpush1.bf16.msra.mxu0 %v3362_v33  ;;  %1717 = vmatprep.mubr.f32.mxu0 %v4179_v0  ;;  %v3392_v33 = vpack.c.bf16 %v2182_v27, %v2178_v24 }
 0x5e9   : > { %3365 = vmatprep.subr.bf16.mxu0 %v3364_v34  ;;  %v2177_v34 = vld [vmem:[#allocation15 + $0x3c0] sm:$0xff] }
 0x5ea   : > { %v3394_v38 = vpack.c.bf16 %v2181_v35, %v2177_v34 }
 0x5eb   : > { %3316 = vmatmul.mubr.msk.f32.gmra.mrb[36].mxu0 %vm5620_vm3, %v1577_v40  ;;  %vm5629_vm3 = vmmov %vm5604_vm0 }
 0x5ec   : > { %3367 = vmatpush1.bf16.msra.mxu0 %v3366_v44  ;;  %2249 = vmatprep.mubr.f32.mxu0 %v5150_v7 }
 0x5ed   : > { %3369 = vmatprep.subr.bf16.mxu0 %v3368_v45 }
 0x5f0   : > { %3371 = vmatpush1.bf16.msra.mxu0 %v3370_v55 }
 0x5f1   : > { %3373 = vmatprep.subr.bf16.mxu0 %v3372_v56 }
 0x5f4   : > { %3375 = vmatpush1.bf16.msra.mxu0 %v3374_v1 }
 0x5f5   : > { %3377 = vmatprep.subr.bf16.mxu0 %v3376_v3 }
 0x5f8   : > { %3379 = vmatpush1.bf16.msra.mxu0 %v3378_v58  ;;  %v3065_v58 = vld [vmem:[%s5450_s19] sm:$0xff] }
 0x5f9   : > { %3381 = vmatprep.subr.bf16.mxu0 %v3380_v9  ;;  %v3073_v9 = vld [vmem:[%s5451_s20] sm:$0xff] }
 0x5fc   : > { %3383 = vmatpush1.bf16.msra.mxu0 %v3382_v13 }
 0x5fd   : > { %3385 = vmatprep.subr.bf16.mxu0 %v3384_v14 }
 0x600   : > { %3387 = vmatpush1.bf16.msra.mxu0 %v3386_v20 }
 0x601   : > { %3389 = vmatprep.subr.bf16.mxu0 %v3388_v21 }
 0x604   : > { %3391 = vmatpush1.bf16.msra.mxu0 %v3390_v32 }
 0x605   : > { %3393 = vmatprep.subr.bf16.mxu0 %v3392_v33 }
 0x608   : > { %3395 = vmatpush1.bf16.msra.mxu0 %v3394_v38 }
 0x60b   : > { %2250 = vmatmul.mubr.f32.vlgmr.msra.gmra.mrb[38].mxu0 %v5148_v6 }
 0x60c   : > { %2401 = vmatprep.mubr.f32.mxu0 %v4179_v0 }
 0x69e   : > { %v1671_v39 = vpop.f32.mrb[20].mxu0 }
 0x69f   : > { %v1673_v60 = vpop.f32.mrb[21].mxu0  ;;  %1732 = vrot.lane.b32.xlu1 %v1671_v39, %s4181_s28 }
 0x6a0   : > { %1734 = vrot.lane.b32.xlu0 %v1673_v60, %s4181_s28 }
 0x6a2   : > { %v1677_v40 = vpop.f32.mrb[22].mxu0 }
 0x6a3   : > { %v1679_v44 = vpop.f32.mrb[23].mxu0  ;;  %1742 = vrot.lane.b32.xlu1 %v1677_v40, %s4182_s5 }
 0x6a4   : > { %1744 = vrot.lane.b32.xlu0 %v1679_v44, %s4182_s5 }
 0x6a6   : > { %v1683_v45 = vpop.f32.mrb[24].mxu0 }
 0x6a7   : > { %v1685_v46 = vpop.f32.mrb[25].mxu0  ;;  %1752 = vrot.lane.b32.xlu1 %v1683_v45, %s4183_s4 }
 0x6a8   : > { %1754 = vrot.lane.b32.xlu0 %v1685_v46, %s4183_s4 }
 0x6aa   : > { %v1689_v48 = vpop.f32.mrb[26].mxu0 }
 0x6ab   : > { %v1691_v49 = vpop.f32.mrb[27].mxu0  ;;  %1762 = vrot.lane.b32.xlu1 %v1689_v48, %s4184_s2 }
 0x6ac   : > { %1764 = vrot.lane.b32.xlu0 %v1691_v49, %s4184_s2 }
 0x6ae   : > { %v1695_v52 = vpop.f32.mrb[28].mxu0 }
 0x6af   : > { %v1697_v55 = vpop.f32.mrb[29].mxu0  ;;  %v1730_v39 = vadd.f32 %v1728_v12, %v1695_v52 }
 0x6b0   : > { %v1731_v60 = vadd.f32 %v1728_v12, %v1697_v55 }
 0x6b2   : > { %v1701_v56 = vpop.f32.mrb[30].mxu0 }
 0x6b3   : > { %1772 = vrot.lane.b32.xlu1 %v1701_v56, %s4185_s22  ;;  %v1703_v57 = vpop.f32.mrb[31].mxu0 }
 0x6b4   : > { %1774 = vrot.lane.b32.xlu0 %v1703_v57, %s4185_s22 }
 0x6b6   : > { %v1707_v59 = vpop.f32.mrb[32].mxu0 }
 0x6b7   : > { %1782 = vrot.lane.b32.xlu1 %v1707_v59, %s4186_s1  ;;  %v1709_v61 = vpop.f32.mrb[33].mxu0 }
 0x6b8   : > { %1784 = vrot.lane.b32.xlu0 %v1709_v61, %s4186_s1 }
 0x6ba   : > { %v1713_v62 = vpop.f32.mrb[34].mxu0 }
 0x6bb   : > { %1792 = vrot.lane.b32.xlu1 %v1713_v62, %s5474_s26  ;;  %v1715_v1 = vpop.f32.mrb[35].mxu0 }
 0x6bc   : > { %1794 = vrot.lane.b32.xlu0 %v1715_v1, %s5474_s26 }
 0x6be   : > { %v1719_v3 = vpop.f32.mrb[36].mxu0 }
 0x6bf   : > { %1802 = vrot.lane.b32.xlu1 %v1719_v3, %s4188_s21  ;;  %v1721_v29 = vpop.f32.mrb[37].mxu0 }
 0x6c0   : > { %1804 = vrot.lane.b32.xlu0 %v1721_v29, %s4188_s21 }
 0x6c3   : > { %2331 = vperm.xlu1 %3842, %v2328_v2  }
 0x6c4   : > { %2414 = vperm.xlu0 %3841, %v2411_v4  }
 0x6c7   : > { %1970 = vperm.xlu1 %3842, %v1967_v5  }
 0x6c8   : > { %3068 = vperm.xlu0 %3841, %v3065_v58  }
 0x6cb   : > { %3076 = vperm.xlu1 %3842, %v3073_v9  }
 0x6de   : > { %v5231_v10 = vpop.f32.mrb[38].mxu0 }
 0x6df   : > { %v5233_v11 = vpop.f32.mrb[39].mxu0 }
 0x6e0   : > { %2337 = vmatprep.subr.mxu0 %v5233_v11 }
 0x6e1   : > { %2338 = vmatpush1.msra.mxu0 %v5231_v10 }
 0x6e2   : > { %3326 = vmatmul.mubr.msk.f32.vlgmr.msra.gmra.mrb[40].mxu0 %vm5604_vm0, %v2327_v53 }
 0x711   : > { %v1733_v13 = vpop.permute.xlu1 %1732 }
 0x712   : > { %v1735_v14 = vpop.permute.xlu0 %1734 }
 0x713   : > { %v1736_v20 = vsel %vm1159_vm9, %v1733_v13, %v1735_v14  ;;  %v1737_v21 = vsel %vm1159_vm9, %v1735_v14, %v1733_v13 }
 0x714   : > { %v1738_v32 = vmul.f32 %v4830_v28, %v1737_v21  ;;  %v1739_v33 = vmul.f32 %v4835_v31, %v1736_v20 }
 0x715   : > { %v1743_v15 = vpop.permute.xlu1 %1742 }
 0x716   : > { %v1745_v16 = vpop.permute.xlu0 %1744  ;;  %v1740_v49 = vadd.f32 %v1738_v32, %v1730_v39  ;;  %v1741_v56 = vadd.f32 %v1739_v33, %v1731_v60  ;;  %v2060_v60 = vld [vmem:[#allocation15 + $0x18] sm:$0xff] }
 0x717   : > { %v1746_v24 = vsel %vm1170_vm4, %v1743_v15, %v1745_v16  ;;  %v1747_v27 = vsel %vm1170_vm4, %v1745_v16, %v1743_v15 }
 0x718   : > { %v1748_v40 = vmul.f32 %v4848_v36, %v1747_v27  ;;  %v1749_v44 = vmul.f32 %v4853_v37, %v1746_v24 }
 0x719   : > { %v1753_v18 = vpop.permute.xlu1 %1752 }
 0x71a   : > { %v1755_v19 = vpop.permute.xlu0 %1754  ;;  %v1750_v62 = vadd.f32 %v1748_v40, %v1740_v49  ;;  %v1751_v1 = vadd.f32 %v1749_v44, %v1741_v56  ;;  %v2064_v40 = vld [vmem:[#allocation15 + $0x38] sm:$0xff]  ;;  %v2059_v49 = vld [vmem:[#allocation15 + $0x10] sm:$0xff] }
 0x71b   : > { %v1756_v34 = vsel %vm1181_vm1, %v1753_v18, %v1755_v19  ;;  %v1757_v35 = vsel %vm1181_vm1, %v1755_v19, %v1753_v18  ;;  %v2063_v56 = vld [vmem:[#allocation15 + $0x30] sm:$0xff] }
 0x71c   : > { %v1758_v57 = vmul.f32 %v4871_v42, %v1757_v35  ;;  %v1759_v59 = vmul.f32 %v4876_v43, %v1756_v34 }
 0x71d   : > { %v1763_v22 = vpop.permute.xlu1 %1762 }
 0x71e   : > { %v1765_v23 = vpop.permute.xlu0 %1764  ;;  %v1760_v58 = vadd.f32 %v1758_v57, %v1750_v62  ;;  %v1761_v9 = vadd.f32 %v1759_v59, %v1751_v1  ;;  %v2068_v57 = vld [vmem:[#allocation15 + $0x58] sm:$0xff]  ;;  %v1812_v62 = vld [vmem:[%s5623_s11] sm:$0xff]  ;;  %v3398_v1 = vpack.c.bf16 %v2063_v56, %v2059_v49  ;;  %v1817_v49 = vld [vmem:[%s5623_s11 + $0x28] sm:$0xff] }
 0x71f   : > { %v1766_v46 = vsel %vm5621_vm15, %v1763_v22, %v1765_v23  ;;  %v1767_v48 = vsel %vm5622_vm10, %v1765_v23, %v1763_v22  ;;  %v2072_v59 = vld [vmem:[#allocation15 + $0x78] sm:$0xff]  ;;  %vm5630_vm15 = vmmov %vm5604_vm0 }
 0x720   : > { %v1768_v3 = vmul.f32 %v4903_v50, %v1767_v48  ;;  %v1769_v29 = vmul.f32 %v4908_v51, %v1766_v46  ;;  %vm5631_vm10 = vmmov %vm5604_vm0 }
 0x722   : > { %v1770_v14 = vadd.f32 %v1768_v3, %v1760_v58  ;;  %v1771_v15 = vadd.f32 %v1769_v29, %v1761_v9  ;;  %v3400_v3 = vpack.c.bf16 %v2072_v59, %v2068_v57  ;;  %v2067_v29 = vld [vmem:[#allocation15 + $0x50] sm:$0xff]  ;;  %v1813_v58 = vld [vmem:[%s5623_s11 + $0x8] sm:$0xff] }
 0x723   : > { %v2107_v59 = vld [vmem:[#allocation15 + $0x190] sm:$0xff] }
 0x725   : > { %v1773_v38 = vpop.permute.xlu1 %1772 }
 0x726   : > { %v1775_v45 = vpop.permute.xlu0 %1774 }
 0x727   : > { %v1776_v52 = vsel %vm1203_vm13, %v1773_v38, %v1775_v45  ;;  %v1777_v55 = vsel %vm1203_vm13, %v1775_v45, %v1773_v38 }
 0x728   : > { %v1778_v53 = vmul.f32 %v4939_v30, %v1776_v52  ;;  %v1779_v12 = vmul.f32 %v4963_v8, %v1777_v55 }
 0x729   : > { %v1783_v61 = vpop.permute.xlu1 %1782 }
 0x72a   : > { %v1785_v2 = vpop.permute.xlu0 %1784  ;;  %v1780_v22 = vadd.f32 %v1778_v53, %v1770_v14  ;;  %v1781_v23 = vadd.f32 %v1779_v12, %v1771_v15  ;;  %v2075_v12 = vld [vmem:[#allocation15 + $0x90] sm:$0xff]  ;;  %v2084_v14 = vld [vmem:[#allocation15 + $0xd8] sm:$0xff] }
 0x72b   : > { %v1786_v4 = vsel %vm1214_vm5, %v1783_v61, %v1785_v2  ;;  %v1787_v5 = vsel %vm1214_vm5, %v1785_v2, %v1783_v61  ;;  %v3396_v61 = vpack.c.bf16 %v2064_v40, %v2060_v60  ;;  %v2071_v2 = vld [vmem:[#allocation15 + $0x70] sm:$0xff]  ;;  %v2088_v15 = vld [vmem:[#allocation15 + $0xf8] sm:$0xff] }
 0x72c   : > { %v1788_v16 = vmul.f32 %v4987_v54, %v1786_v4  ;;  %v1789_v18 = vmul.f32 %v4992_v17, %v1787_v5  ;;  %v2076_v4 = vld [vmem:[#allocation15 + $0x98] sm:$0xff]  ;;  %v3402_v9 = vpack.c.bf16 %v2071_v2, %v2067_v29  ;;  %v2115_v29 = vld [vmem:[#allocation15 + $0x1d0] sm:$0xff] }
 0x72d   : > { %v1793_v13 = vpop.permute.xlu1 %1792  ;;  %v2080_v5 = vld [vmem:[#allocation15 + $0xb8] sm:$0xff]  ;;  %v2119_v2 = vld [vmem:[#allocation15 + $0x1f0] sm:$0xff] }
 0x72e   : > { %v1795_v19 = vpop.permute.xlu0 %1794  ;;  %v1790_v33 = vadd.f32 %v1788_v16, %v1780_v22  ;;  %v1791_v34 = vadd.f32 %v1789_v18, %v1781_v23  ;;  %v3404_v53 = vpack.c.bf16 %v2080_v5, %v2076_v4  ;;  %v1814_v16 = vld [vmem:[%s5623_s11 + $0x10] sm:$0xff]  ;;  %v2092_v22 = vld [vmem:[#allocation15 + $0x118] sm:$0xff] }
 0x72f   : > { %v1796_v20 = vsel %vm1225_vm7, %v1793_v13, %v1795_v19  ;;  %v1797_v21 = vsel %vm1225_vm7, %v1795_v19, %v1793_v13  ;;  %v2079_v13 = vld [vmem:[#allocation15 + $0xb0] sm:$0xff]  ;;  %v3408_v19 = vpack.c.bf16 %v2088_v15, %v2084_v14  ;;  %v2096_v23 = vld [vmem:[#allocation15 + $0x138] sm:$0xff] }
 0x730   : > { %v1798_v24 = vmul.f32 %v5007_v25, %v1796_v20  ;;  %v1799_v27 = vmul.f32 %v5012_v26, %v1797_v21  ;;  %v3406_v18 = vpack.c.bf16 %v2079_v13, %v2075_v12  ;;  %v2083_v20 = vld [vmem:[#allocation15 + $0xd0] sm:$0xff]  ;;  %v2124_v4 = vld [vmem:[#allocation15 + $0x218] sm:$0xff] }
 0x731   : > { %v1803_v32 = vpop.permute.xlu1 %1802  ;;  %v2087_v21 = vld [vmem:[#allocation15 + $0xf0] sm:$0xff]  ;;  %v2128_v5 = vld [vmem:[#allocation15 + $0x238] sm:$0xff] }
 0x732   : > { %v1805_v35 = vpop.permute.xlu0 %1804  ;;  %v1800_v44 = vadd.f32 %v1798_v24, %v1790_v33  ;;  %v1801_v45 = vadd.f32 %v1799_v27, %v1791_v34  ;;  %v1815_v24 = vld [vmem:[%s5623_s11 + $0x18] sm:$0xff]  ;;  %v3410_v27 = vpack.c.bf16 %v2087_v21, %v2083_v20  ;;  %v2091_v33 = vld [vmem:[#allocation15 + $0x110] sm:$0xff] }
 0x733   : > { %v1806_v38 = vsel %vm1236_vm14, %v1803_v32, %v1805_v35  ;;  %v1807_v39 = vsel %vm1236_vm14, %v1805_v35, %v1803_v32  ;;  %v3412_v32 = vpack.c.bf16 %v2096_v23, %v2092_v22  ;;  %v2095_v34 = vld [vmem:[#allocation15 + $0x130] sm:$0xff]  ;;  %v2100_v35 = vld [vmem:[#allocation15 + $0x158] sm:$0xff] }
 0x734   : > { %v1808_v46 = vmul.f32 %v5028_v47, %v1806_v38  ;;  %v1809_v48 = vmul.f32 %v5031_v63, %v1807_v39  ;;  %v2104_v38 = vld [vmem:[#allocation15 + $0x178] sm:$0xff]  ;;  %v1816_v39 = vld [vmem:[%s5623_s11 + $0x20] sm:$0xff]  ;;  %v3414_v60 = vpack.c.bf16 %v2095_v34, %v2091_v33  ;;  %v2123_v12 = vld [vmem:[#allocation15 + $0x210] sm:$0xff] }
 0x735   : > { %v3416_v40 = vpack.c.bf16 %v2104_v38, %v2100_v35  ;;  %v2127_v13 = vld [vmem:[#allocation15 + $0x230] sm:$0xff]  ;;  %v2132_v14 = vld [vmem:[#allocation15 + $0x258] sm:$0xff] }
 0x736   : > { %v1810_v52 = vadd.f32 %v1808_v46, %v1800_v44  ;;  %v1811_v55 = vadd.f32 %v1809_v48, %v1801_v45  ;;  %v2099_v44 = vld [vmem:[#allocation15 + $0x150] sm:$0xff]  ;;  %v2108_v46 = vld [vmem:[#allocation15 + $0x198] sm:$0xff] }
 0x737   : > { %v2103_v45 = vld [vmem:[#allocation15 + $0x170] sm:$0xff]  ;;  %v2112_v48 = vld [vmem:[#allocation15 + $0x1b8] sm:$0xff] }
 0x738   : > { %1848 = vmatprep.subr.mxu1 %v1811_v55  ;;  %v3418_v56 = vpack.c.bf16 %v2103_v45, %v2099_v44  ;;  %v3420_v57 = vpack.c.bf16 %v2112_v48, %v2108_v46  ;;  %v2116_v55 = vld [vmem:[#allocation15 + $0x1d8] sm:$0xff]  ;;  %v2131_v20 = vld [vmem:[#allocation15 + $0x250] sm:$0xff] }
 0x739   : > { %1849 = vmatpush1.msra.mxu1 %v1810_v52  ;;  %v2111_v52 = vld [vmem:[#allocation15 + $0x1b0] sm:$0xff]  ;;  %v2136_v15 = vld [vmem:[#allocation15 + $0x278] sm:$0xff] }
 0x73a   : > { %3317 = vmatmul.mubr.msk.f32.vlgmr.msra.gmra.mrb[20].mxu1 %vm5624_vm8, %v1812_v62  ;;  %3397 = vmatprep.subr.bf16.mxu1 %v3396_v61  ;;  %v2120_v61 = vld [vmem:[#allocation15 + $0x1f8] sm:$0xff]  ;;  %v1818_v62 = vld [vmem:[%s5623_s11 + $0x30] sm:$0xff]  ;;  %vm5633_vm8 = vmmov %vm5604_vm0 }
 0x73b   : > { %3399 = vmatpush1.bf16.msra.mxu1 %v3398_v1  ;;  %1918 = vmatprep.mubr.f32.mxu1 %v4179_v0  ;;  %v3422_v1 = vpack.c.bf16 %v2111_v52, %v2107_v59  ;;  %v2135_v21 = vld [vmem:[#allocation15 + $0x270] sm:$0xff]  ;;  %v2140_v22 = vld [vmem:[#allocation15 + $0x298] sm:$0xff] }
 0x73c   : > { %3401 = vmatprep.subr.bf16.mxu1 %v3400_v3  ;;  %v3424_v3 = vpack.c.bf16 %v2120_v61, %v2116_v55  ;;  %v2144_v23 = vld [vmem:[#allocation15 + $0x2b8] sm:$0xff]  ;;  %v2143_v33 = vld [vmem:[#allocation15 + $0x2b0] sm:$0xff] }
 0x73d   : > { %v2148_v34 = vld [vmem:[#allocation15 + $0x2d8] sm:$0xff]  ;;  %v2163_v55 = vld [vmem:[#allocation15 + $0x350] sm:$0xff] }
 0x73e   : > { %3318 = vmatmul.mubr.msk.f32.gmra.mrb[22].mxu1 %vm5625_vm2, %v1813_v58  ;;  %v1819_v58 = vld [vmem:[%s5623_s11 + $0x38] sm:$0xff]  ;;  %v2167_v61 = vld [vmem:[#allocation15 + $0x370] sm:$0xff] }
 0x73f   : > { %3403 = vmatpush1.bf16.msra.mxu1 %v3402_v9  ;;  %1924 = vmatprep.mubr.f32.mxu1 %v4179_v0  ;;  %v3426_v9 = vpack.c.bf16 %v2119_v2, %v2115_v29  ;;  %v2152_v35 = vld [vmem:[#allocation15 + $0x2f8] sm:$0xff]  ;;  %v2171_v2 = vld [vmem:[#allocation15 + $0x390] sm:$0xff] }
 0x740   : > { %3405 = vmatprep.subr.bf16.mxu1 %v3404_v53  ;;  %v3428_v53 = vpack.c.bf16 %v2128_v5, %v2124_v4  ;;  %v2156_v44 = vld [vmem:[#allocation15 + $0x318] sm:$0xff]  ;;  %v2175_v4 = vld [vmem:[#allocation15 + $0x3b0] sm:$0xff] }
 0x741   : > { %v2160_v45 = vld [vmem:[#allocation15 + $0x338] sm:$0xff] }
 0x742   : > { %3319 = vmatmul.mubr.msk.f32.gmra.mrb[24].mxu1 %vm5626_vm12, %v1814_v16  ;;  %v1820_v16 = vld [vmem:[%s5623_s11 + $0x40] sm:$0xff]  ;;  %v3444_v48 = vpack.c.bf16 %v2160_v45, %v2156_v44  ;;  %v2180_v5 = vld [vmem:[#allocation15 + $0x3d8] sm:$0xff]  ;;  %v2518_v45 = vld [vmem:[#allocation16 + $0x68] sm:$0xff] }
 0x743   : > { %3407 = vmatpush1.bf16.msra.mxu1 %v3406_v18  ;;  %1930 = vmatprep.mubr.f32.mxu1 %v4179_v0  ;;  %v3430_v18 = vpack.c.bf16 %v2127_v13, %v2123_v12  ;;  %v2179_v12 = vld [vmem:[#allocation15 + $0x3d0] sm:$0xff] }
 0x744   : > { %3409 = vmatprep.subr.bf16.mxu1 %v3408_v19  ;;  %v3432_v19 = vpack.c.bf16 %v2136_v15, %v2132_v14  ;;  %v2183_v13 = vld [vmem:[#allocation15 + $0x3f0] sm:$0xff]  ;;  %v2332_v15 = vpop.permute.xlu1 %2331 }
 0x745   : > { %v3458_v14 = vpack.c.bf16 %v2183_v13, %v2179_v12  ;;  %v2530_v13 = vld [vmem:[#allocation16 + $0xc8] sm:$0xff] }
 0x746   : > { %3320 = vmatmul.mubr.msk.f32.gmra.mrb[26].mxu1 %vm5627_vm6, %v1815_v24  ;;  %v3434_v24 = vpack.c.bf16 %v2135_v21, %v2131_v20 }
 0x747   : > { %3411 = vmatpush1.bf16.msra.mxu1 %v3410_v27  ;;  %1936 = vmatprep.mubr.f32.mxu1 %v4179_v0  ;;  %v3436_v27 = vpack.c.bf16 %v2144_v23, %v2140_v22  ;;  %v2410_v23 = vld [vmem:[%s5632_s30] sm:$0xff] }
 0x748   : > { %3413 = vmatprep.subr.bf16.mxu1 %v3412_v32  ;;  %v2139_v32 = vld [vmem:[#allocation15 + $0x290] sm:$0xff] }
 0x749   : > { %v3438_v38 = vpack.c.bf16 %v2143_v33, %v2139_v32  ;;  %v2505_v33 = vld [vmem:[#allocation16] sm:$0xff] }
 0x74a   : > { %3321 = vmatmul.mubr.msk.f32.gmra.mrb[28].mxu1 %vm5628_vm11, %v1816_v39  ;;  %v3440_v39 = vpack.c.bf16 %v2152_v35, %v2148_v34  ;;  %v2509_v34 = vld [vmem:[#allocation16 + $0x20] sm:$0xff] }
 0x74b   : > { %3415 = vmatpush1.bf16.msra.mxu1 %v3414_v60  ;;  %1942 = vmatprep.mubr.f32.mxu1 %v4179_v0  ;;  %v2147_v60 = vld [vmem:[#allocation15 + $0x2d0] sm:$0xff] }
 0x74c   : > { %3417 = vmatprep.subr.bf16.mxu1 %v3416_v40  ;;  %v2151_v40 = vld [vmem:[#allocation15 + $0x2f0] sm:$0xff] }
 0x74d   : > { %v3442_v46 = vpack.c.bf16 %v2151_v40, %v2147_v60  ;;  %v2511_v60 = vld [vmem:[#allocation16 + $0x30] sm:$0xff]  ;;  %v2514_v40 = vld [vmem:[#allocation16 + $0x48] sm:$0xff] }
 0x74e   : > { %3322 = vmatmul.mubr.msk.f32.gmra.mrb[30].mxu1 %vm5629_vm3, %v1817_v49  ;;  %v2159_v49 = vld [vmem:[#allocation15 + $0x330] sm:$0xff] }
 0x74f   : > { %3419 = vmatpush1.bf16.msra.mxu1 %v3418_v56  ;;  %1948 = vmatprep.mubr.f32.mxu1 %v4179_v0  ;;  %v2164_v56 = vld [vmem:[#allocation15 + $0x358] sm:$0xff] }
 0x750   : > { %3421 = vmatprep.subr.bf16.mxu1 %v3420_v57  ;;  %v2168_v57 = vld [vmem:[#allocation15 + $0x378] sm:$0xff] }
 0x751   : > { %v3448_v52 = vpack.c.bf16 %v2168_v57, %v2164_v56  ;;  %v2513_v56 = vld [vmem:[#allocation16 + $0x40] sm:$0xff] }
 0x752   : > { %3323 = vmatmul.mubr.msk.f32.gmra.mrb[32].mxu1 %vm5604_vm0, %v1818_v62  ;;  %v2172_v62 = vld [vmem:[#allocation15 + $0x398] sm:$0xff]  ;;  %v2517_v57 = vld [vmem:[#allocation16 + $0x60] sm:$0xff] }
 0x753   : > { %3423 = vmatpush1.bf16.msra.mxu1 %v3422_v1  ;;  %1954 = vmatprep.mubr.f32.mxu1 %v4179_v0  ;;  %v2176_v1 = vld [vmem:[#allocation15 + $0x3b8] sm:$0xff] }
 0x754   : > { %3425 = vmatprep.subr.bf16.mxu1 %v3424_v3  ;;  %v3450_v3 = vpack.c.bf16 %v2167_v61, %v2163_v55  ;;  %v3452_v29 = vpack.c.bf16 %v2176_v1, %v2172_v62  ;;  %v2519_v55 = vld [vmem:[#allocation16 + $0x70] sm:$0xff]  ;;  %v2522_v61 = vld [vmem:[#allocation16 + $0x88] sm:$0xff] }
 0x755   : > { %v2526_v62 = vld [vmem:[#allocation16 + $0xa8] sm:$0xff] }
 0x756   : > { %3324 = vmatmul.mubr.msk.f32.gmra.mrb[34].mxu1 %vm5630_vm15, %v1819_v58  ;;  %v2184_v58 = vld [vmem:[#allocation15 + $0x3f8] sm:$0xff] }
 0x757   : > { %3427 = vmatpush1.bf16.msra.mxu1 %v3426_v9  ;;  %1960 = vmatprep.mubr.f32.mxu1 %v4179_v0  ;;  %v3454_v9 = vpack.c.bf16 %v2175_v4, %v2171_v2  ;;  %v2528_v2 = vld [vmem:[#allocation16 + $0xb8] sm:$0xff]  ;;  %v2521_v4 = vld [vmem:[#allocation16 + $0x80] sm:$0xff] }
 0x758   : > { %3429 = vmatprep.subr.bf16.mxu1 %v3428_v53  ;;  %v3456_v53 = vpack.c.bf16 %v2184_v58, %v2180_v5  ;;  %v2525_v58 = vld [vmem:[#allocation16 + $0xa0] sm:$0xff] }
 0x759   : > { %v3470_v12 = vpack.c.bf16 %v2525_v58, %v2521_v4  ;;  %v2556_v4 = vld [vmem:[#allocation16 + $0x198] sm:$0xff] }
 0x75a   : > { %3325 = vmatmul.mubr.msk.f32.gmra.mrb[36].mxu1 %vm5631_vm10, %v1820_v16  ;;  %v2560_v58 = vld [vmem:[#allocation16 + $0x1b8] sm:$0xff] }
 0x75b   : > { %3431 = vmatpush1.bf16.msra.mxu1 %v3430_v18  ;;  %2320 = vmatprep.mubr.f32.mxu1 %v5150_v7  ;;  %v2155_v7 = vld [vmem:[#allocation15 + $0x310] sm:$0xff] }
 0x75c   : > { %3433 = vmatprep.subr.bf16.mxu1 %v3432_v19  ;;  %v3446_v59 = vpack.c.bf16 %v2159_v49, %v2155_v7  ;;  %v3464_v7 = vpack.c.bf16 %v2518_v45, %v2514_v40  ;;  %v2543_v45 = vld [vmem:[#allocation16 + $0x130] sm:$0xff] }
 0x75f   : > { %3435 = vmatpush1.bf16.msra.mxu1 %v3434_v24  ;;  %v2506_v24 = vld [vmem:[#allocation16 + $0x8] sm:$0xff] }
 0x760   : > { %3437 = vmatprep.subr.bf16.mxu1 %v3436_v27  ;;  %v2510_v27 = vld [vmem:[#allocation16 + $0x28] sm:$0xff] }
 0x761   : > { %v3460_v32 = vpack.c.bf16 %v2510_v27, %v2506_v24  ;;  %v2535_v24 = vld [vmem:[#allocation16 + $0xf0] sm:$0xff] }
 0x763   : > { %3439 = vmatpush1.bf16.msra.mxu1 %v3438_v38  ;;  %v3462_v38 = vpack.c.bf16 %v2509_v34, %v2505_v33  ;;  %3461 = vmatprep.subr.bf16.mxu0 %v3460_v32  ;;  %v2538_v32 = vld [vmem:[#allocation16 + $0x108] sm:$0xff]  ;;  %v2540_v33 = vld [vmem:[#allocation16 + $0x118] sm:$0xff] }
 0x764   : > { %3441 = vmatprep.subr.bf16.mxu1 %v3440_v39  ;;  %v2507_v39 = vld [vmem:[#allocation16 + $0x10] sm:$0xff] }
 0x765   : > { %v3590_v44 = vpack.c.bf16 %v2511_v60, %v2507_v39  ;;  %3463 = vmatpush1.bf16.msra.mxu0 %v3462_v38  ;;  %v2537_v38 = vld [vmem:[#allocation16 + $0x100] sm:$0xff] }
 0x766   : > { %3465 = vmatprep.subr.bf16.mxu0 %v3464_v7  ;;  %v2541_v39 = vld [vmem:[#allocation16 + $0x120] sm:$0xff]  ;;  %v2550_v7 = vld [vmem:[#allocation16 + $0x168] sm:$0xff] }
 0x767   : > { %3443 = vmatpush1.bf16.msra.mxu1 %v3442_v46  ;;  %v2516_v46 = vld [vmem:[#allocation16 + $0x58] sm:$0xff]  ;;  %v3478_v40 = vpack.c.bf16 %v2541_v39, %v2537_v38  ;;  %v2570_v38 = vld [vmem:[#allocation16 + $0x208] sm:$0xff] }
 0x768   : > { %3445 = vmatprep.subr.bf16.mxu1 %v3444_v48  ;;  %v2520_v48 = vld [vmem:[#allocation16 + $0x78] sm:$0xff]  ;;  %v2574_v39 = vld [vmem:[#allocation16 + $0x228] sm:$0xff] }
 0x769   : > { %v3592_v49 = vpack.c.bf16 %v2520_v48, %v2516_v46  ;;  %v2546_v48 = vld [vmem:[#allocation16 + $0x148] sm:$0xff] }
 0x76b   : > { %3447 = vmatpush1.bf16.msra.mxu1 %v3446_v59  ;;  %v2515_v59 = vld [vmem:[#allocation16 + $0x50] sm:$0xff] }
 0x76c   : > { %3449 = vmatprep.subr.bf16.mxu1 %v3448_v52  ;;  %v3466_v52 = vpack.c.bf16 %v2517_v57, %v2513_v56  ;;  %v3594_v1 = vpack.c.bf16 %v2519_v55, %v2515_v59  ;;  %v3480_v56 = vpack.c.bf16 %v2550_v7, %v2546_v48  ;;  %v2552_v57 = vld [vmem:[#allocation16 + $0x178] sm:$0xff]  ;;  %v2545_v59 = vld [vmem:[#allocation16 + $0x140] sm:$0xff] }
 0x76e   : > { %3467 = vmatpush1.bf16.msra.mxu0 %v3466_v52  ;;  %v2549_v52 = vld [vmem:[#allocation16 + $0x160] sm:$0xff] }
 0x76f   : > { %3451 = vmatpush1.bf16.msra.mxu1 %v3450_v3  ;;  %v3468_v3 = vpack.c.bf16 %v2526_v62, %v2522_v61  ;;  %v3482_v61 = vpack.c.bf16 %v2549_v52, %v2545_v59  ;;  %v2547_v62 = vld [vmem:[#allocation16 + $0x150] sm:$0xff] }
 0x770   : > { %3453 = vmatprep.subr.bf16.mxu1 %v3452_v29  ;;  %v2524_v29 = vld [vmem:[#allocation16 + $0x98] sm:$0xff] }
 0x771   : > { %v3596_v5 = vpack.c.bf16 %v2528_v2, %v2524_v29  ;;  %3469 = vmatprep.subr.bf16.mxu0 %v3468_v3  ;;  %v2554_v29 = vld [vmem:[#allocation16 + $0x188] sm:$0xff] }
 0x772   : > { %3471 = vmatpush1.bf16.msra.mxu0 %v3470_v12  ;;  %v2558_v2 = vld [vmem:[#allocation16 + $0x1a8] sm:$0xff]  ;;  %v3612_v12 = vpack.c.bf16 %v2560_v58, %v2556_v4 }
 0x773   : > { %3455 = vmatpush1.bf16.msra.mxu1 %v3454_v9  ;;  %v2523_v9 = vld [vmem:[#allocation16 + $0x90] sm:$0xff] }
 0x774   : > { %3457 = vmatprep.subr.bf16.mxu1 %v3456_v53  ;;  %v2527_v53 = vld [vmem:[#allocation16 + $0xb0] sm:$0xff] }
 0x777   : > { %3459 = vmatpush1.bf16.msra.mxu1 %v3458_v14  ;;  %v2534_v14 = vld [vmem:[#allocation16 + $0xe8] sm:$0xff] }
 0x77a   : > { %2321 = vmatmul.mubr.f32.vlgmr.msra.gmra.mrb[38].mxu1 %v5148_v6  ;;  %v2508_v6 = vld [vmem:[#allocation16 + $0x18] sm:$0xff] }
 0x77b   : > { %2484 = vmatprep.mubr.f32.mxu1 %v4179_v0  ;;  %v2512_v0 = vld [vmem:[#allocation16 + $0x38] sm:$0xff] }
 0x77c   : > { %v3588_v35 = vpack.c.bf16 %v2512_v0, %v2508_v6  ;;  %v2542_v0 = vld [vmem:[#allocation16 + $0x128] sm:$0xff] }
 0x77d   : > { %v3476_v34 = vpack.c.bf16 %v2542_v0, %v2538_v32  ;;  %v2563_v0 = vld [vmem:[#allocation16 + $0x1d0] sm:$0xff] }
 0x7b5   : > { %v2403_v16 = vpop.f32.mrb[40].mxu0 }
 0x7b6   : > { %v2404_v18 = vadd.f32 %v2403_v16, %v2332_v15  ;;  %v2405_v19 = vpop.f32.mrb[41].mxu0  ;;  %v3598_v16 = vpack.c.bf16 %v2527_v53, %v2523_v9  ;;  %v2553_v9 = vld [vmem:[#allocation16 + $0x180] sm:$0xff] }
 0x7b7   : > { %v2406_v20 = vadd.f32 %v2405_v19, %v2332_v15  ;;  %v2532_v15 = vld [vmem:[#allocation16 + $0xd8] sm:$0xff]  ;;  %v2557_v53 = vld [vmem:[#allocation16 + $0x1a0] sm:$0xff] }
 0x7b8   : > { %v2408_v22 = vmax.f32 %v2404_v18, 0.0  ;;  %v3472_v18 = vpack.c.bf16 %v2534_v14, %v2530_v13  ;;  %v2536_v19 = vld [vmem:[#allocation16 + $0xf8] sm:$0xff]  ;;  %v3486_v13 = vpack.c.bf16 %v2557_v53, %v2553_v9  ;;  %v2555_v14 = vld [vmem:[#allocation16 + $0x190] sm:$0xff] }
 0x7b9   : > { %v2409_v21 = vmax.f32 %v2406_v20, 0.0  ;;  %v2529_v20 = vld [vmem:[#allocation16 + $0xc0] sm:$0xff]  ;;  %v2579_v9 = vld [vmem:[#allocation16 + $0x250] sm:$0xff] }
 0x7ba   : > { %3473 = vmatprep.subr.bf16.mxu0 %v3472_v18  ;;  %v2562_v18 = vld [vmem:[#allocation16 + $0x1c8] sm:$0xff]  ;;  %v2583_v53 = vld [vmem:[#allocation16 + $0x270] sm:$0xff] }
 0x7bb   : > { %2420 = vmatprep.subr.mxu1 %v2409_v21  ;;  %v2533_v21 = vld [vmem:[#allocation16 + $0xe0] sm:$0xff] }
 0x7bc   : > { %2421 = vmatpush1.msra.mxu1 %v2408_v22  ;;  %v3600_v22 = vpack.c.bf16 %v2536_v19, %v2532_v15  ;;  %v3474_v27 = vpack.c.bf16 %v2533_v21, %v2529_v20  ;;  %v2559_v15 = vld [vmem:[#allocation16 + $0x1b0] sm:$0xff]  ;;  %v2566_v19 = vld [vmem:[#allocation16 + $0x1e8] sm:$0xff]  ;;  %v2564_v20 = vld [vmem:[#allocation16 + $0x1d8] sm:$0xff] }
 0x7bd   : > { %3327 = vmatmul.mubr.msk.f32.vlgmr.msra.gmra.mrb[40].mxu1 %vm5633_vm8, %v2410_v23  ;;  %3589 = vmatprep.subr.bf16.mxu1 %v3588_v35  ;;  %v2531_v23 = vld [vmem:[#allocation16 + $0xd0] sm:$0xff]  ;;  %v2544_v35 = vld [vmem:[#allocation16 + $0x138] sm:$0xff]  ;;  %v3488_v21 = vpack.c.bf16 %v2566_v19, %v2562_v18 }
 0x7be   : > { %3591 = vmatpush1.bf16.msra.mxu1 %v3590_v44  ;;  %v3602_v6 = vpack.c.bf16 %v2535_v24, %v2531_v23  ;;  %3475 = vmatpush1.bf16.msra.mxu0 %v3474_v27  ;;  %v3604_v60 = vpack.c.bf16 %v2544_v35, %v2540_v33  ;;  %v2539_v44 = vld [vmem:[#allocation16 + $0x110] sm:$0xff]  ;;  %v2561_v23 = vld [vmem:[#allocation16 + $0x1c0] sm:$0xff]  ;;  %v2592_v19 = vld [vmem:[#allocation16 + $0x2b8] sm:$0xff] }
 0x7bf   : > { %3593 = vmatprep.subr.bf16.mxu1 %v3592_v49  ;;  %3477 = vmatprep.subr.bf16.mxu0 %v3476_v34  ;;  %v3606_v46 = vpack.c.bf16 %v2543_v45, %v2539_v44  ;;  %v2548_v49 = vld [vmem:[#allocation16 + $0x158] sm:$0xff]  ;;  %v2565_v24 = vld [vmem:[#allocation16 + $0x1e0] sm:$0xff]  ;;  %v2567_v33 = vld [vmem:[#allocation16 + $0x1f0] sm:$0xff] }
 0x7c0   : > { %v3608_v55 = vpack.c.bf16 %v2552_v57, %v2548_v49  ;;  %v3490_v32 = vpack.c.bf16 %v2565_v24, %v2561_v23  ;;  %v3618_v35 = vpack.c.bf16 %v2567_v33, %v2563_v0  ;;  %v2576_v44 = vld [vmem:[#allocation16 + $0x238] sm:$0xff]  ;;  %v2569_v45 = vld [vmem:[#allocation16 + $0x200] sm:$0xff]  ;;  %v2575_v57 = vld [vmem:[#allocation16 + $0x230] sm:$0xff] }
 0x7c1   : > { %v2594_v33 = vld [vmem:[#allocation16 + $0x2c8] sm:$0xff] }
 0x7c2   : > { %3595 = vmatpush1.bf16.msra.mxu1 %v3594_v1  ;;  %3479 = vmatpush1.bf16.msra.mxu0 %v3478_v40  ;;  %v2551_v1 = vld [vmem:[#allocation16 + $0x170] sm:$0xff]  ;;  %v3492_v40 = vpack.c.bf16 %v2574_v39, %v2570_v38  ;;  %v2600_v39 = vld [vmem:[#allocation16 + $0x2f8] sm:$0xff] }
 0x7c3   : > { %3597 = vmatprep.subr.bf16.mxu1 %v3596_v5  ;;  %3481 = vmatprep.subr.bf16.mxu0 %v3480_v56  ;;  %v3610_v3 = vpack.c.bf16 %v2551_v1, %v2547_v62  ;;  %v3484_v5 = vpack.c.bf16 %v2558_v2, %v2554_v29  ;;  %v2571_v56 = vld [vmem:[#allocation16 + $0x210] sm:$0xff]  ;;  %v2580_v62 = vld [vmem:[#allocation16 + $0x258] sm:$0xff]  ;;  %v2577_v29 = vld [vmem:[#allocation16 + $0x240] sm:$0xff] }
 0x7c4   : > { %v3622_v52 = vpack.c.bf16 %v2575_v57, %v2571_v56  ;;  %v2581_v2 = vld [vmem:[#allocation16 + $0x260] sm:$0xff]  ;;  %v2602_v57 = vld [vmem:[#allocation16 + $0x308] sm:$0xff] }
 0x7c5   : > { %v3498_v58 = vpack.c.bf16 %v2581_v2, %v2577_v29 }
 0x7c6   : > { %3599 = vmatpush1.bf16.msra.mxu1 %v3598_v16  ;;  %3483 = vmatpush1.bf16.msra.mxu0 %v3482_v61  ;;  %v3614_v16 = vpack.c.bf16 %v2559_v15, %v2555_v14  ;;  %v2582_v61 = vld [vmem:[#allocation16 + $0x268] sm:$0xff] }
 0x7c7   : > { %3601 = vmatprep.subr.bf16.mxu1 %v3600_v22  ;;  %3485 = vmatprep.subr.bf16.mxu0 %v3484_v5  ;;  %v2568_v22 = vld [vmem:[#allocation16 + $0x1f8] sm:$0xff]  ;;  %v2586_v14 = vld [vmem:[#allocation16 + $0x288] sm:$0xff] }
 0x7c8   : > { %v2590_v15 = vld [vmem:[#allocation16 + $0x2a8] sm:$0xff] }
 0x7c9   : > { %v3500_v18 = vpack.c.bf16 %v2590_v15, %v2586_v14  ;;  %v2616_v15 = vld [vmem:[#allocation16 + $0x378] sm:$0xff] }
 0x7ca   : > { %3603 = vmatpush1.bf16.msra.mxu1 %v3602_v6  ;;  %3487 = vmatpush1.bf16.msra.mxu0 %v3486_v13  ;;  %v3616_v6 = vpack.c.bf16 %v2568_v22, %v2564_v20  ;;  %v3626_v13 = vpack.c.bf16 %v2583_v53, %v2579_v9  ;;  %v2585_v20 = vld [vmem:[#allocation16 + $0x280] sm:$0xff]  ;;  %v2610_v53 = vld [vmem:[#allocation16 + $0x348] sm:$0xff] }
 0x7cb   : > { %3605 = vmatprep.subr.bf16.mxu1 %v3604_v60  ;;  %3489 = vmatprep.subr.bf16.mxu0 %v3488_v21  ;;  %v2572_v60 = vld [vmem:[#allocation16 + $0x218] sm:$0xff]  ;;  %v2589_v21 = vld [vmem:[#allocation16 + $0x2a0] sm:$0xff] }
 0x7cc   : > { %v3620_v7 = vpack.c.bf16 %v2576_v44, %v2572_v60  ;;  %v3502_v24 = vpack.c.bf16 %v2589_v21, %v2585_v20  ;;  %v2593_v60 = vld [vmem:[#allocation16 + $0x2c0] sm:$0xff] }
 0x7ce   : > { %3607 = vmatpush1.bf16.msra.mxu1 %v3606_v46  ;;  %3491 = vmatpush1.bf16.msra.mxu0 %v3490_v32  ;;  %v2573_v46 = vld [vmem:[#allocation16 + $0x220] sm:$0xff] }
 0x7cf   : > { %3609 = vmatprep.subr.bf16.mxu1 %v3608_v55  ;;  %v3494_v49 = vpack.c.bf16 %v2573_v46, %v2569_v45  ;;  %3493 = vmatprep.subr.bf16.mxu0 %v3492_v40  ;;  %v2578_v55 = vld [vmem:[#allocation16 + $0x248] sm:$0xff]  ;;  %v2597_v40 = vld [vmem:[#allocation16 + $0x2e0] sm:$0xff] }
 0x7d0   : > { %v3496_v1 = vpack.c.bf16 %v2582_v61, %v2578_v55  ;;  %v3506_v46 = vpack.c.bf16 %v2597_v40, %v2593_v60  ;;  %v2608_v61 = vld [vmem:[#allocation16 + $0x338] sm:$0xff] }
 0x7d2   : > { %3611 = vmatpush1.bf16.msra.mxu1 %v3610_v3  ;;  %3495 = vmatpush1.bf16.msra.mxu0 %v3494_v49  ;;  %v2584_v3 = vld [vmem:[#allocation16 + $0x278] sm:$0xff] }
 0x7d3   : > { %3613 = vmatprep.subr.bf16.mxu1 %v3612_v12  ;;  %v3624_v5 = vpack.c.bf16 %v2584_v3, %v2580_v62  ;;  %3497 = vmatprep.subr.bf16.mxu0 %v3496_v1  ;;  %v2601_v62 = vld [vmem:[#allocation16 + $0x300] sm:$0xff] }
 0x7d4   : > { %v2605_v1 = vld [vmem:[#allocation16 + $0x320] sm:$0xff] }
 0x7d5   : > { %v3510_v2 = vpack.c.bf16 %v2605_v1, %v2601_v62  ;;  %v2625_v62 = vld [vmem:[#allocation16 + $0x3c0] sm:$0xff] }
 0x7d6   : > { %3615 = vmatpush1.bf16.msra.mxu1 %v3614_v16  ;;  %v2588_v16 = vld [vmem:[#allocation16 + $0x298] sm:$0xff]  ;;  %3499 = vmatpush1.bf16.msra.mxu0 %v3498_v58  ;;  %v2629_v1 = vld [vmem:[#allocation16 + $0x3e0] sm:$0xff] }
 0x7d7   : > { %3617 = vmatprep.subr.bf16.mxu1 %v3616_v6  ;;  %v3628_v23 = vpack.c.bf16 %v2592_v19, %v2588_v16  ;;  %v2591_v6 = vld [vmem:[#allocation16 + $0x2b0] sm:$0xff]  ;;  %3501 = vmatprep.subr.bf16.mxu0 %v3500_v18  ;;  %v2609_v16 = vld [vmem:[#allocation16 + $0x340] sm:$0xff] }
 0x7d8   : > { %v2613_v18 = vld [vmem:[#allocation16 + $0x360] sm:$0xff] }
 0x7d9   : > { %v3514_v21 = vpack.c.bf16 %v2613_v18, %v2609_v16 }
 0x7da   : > { %3619 = vmatpush1.bf16.msra.mxu1 %v3618_v35  ;;  %v2596_v35 = vld [vmem:[#allocation16 + $0x2d8] sm:$0xff]  ;;  %3503 = vmatpush1.bf16.msra.mxu0 %v3502_v24 }
 0x7db   : > { %3621 = vmatprep.subr.bf16.mxu1 %v3620_v7  ;;  %v3632_v45 = vpack.c.bf16 %v2600_v39, %v2596_v35  ;;  %v2599_v7 = vld [vmem:[#allocation16 + $0x2f0] sm:$0xff]  ;;  %v2617_v35 = vld [vmem:[#allocation16 + $0x380] sm:$0xff] }
 0x7de   : > { %3623 = vmatpush1.bf16.msra.mxu1 %v3622_v52  ;;  %v2604_v52 = vld [vmem:[#allocation16 + $0x318] sm:$0xff] }
 0x7df   : > { %3625 = vmatprep.subr.bf16.mxu1 %v3624_v5  ;;  %v3636_v29 = vpack.c.bf16 %v2608_v61, %v2604_v52  ;;  %v2607_v5 = vld [vmem:[#allocation16 + $0x330] sm:$0xff]  ;;  %v2632_v52 = vld [vmem:[#allocation16 + $0x3f8] sm:$0xff] }
 0x7e2   : > { %3627 = vmatpush1.bf16.msra.mxu1 %v3626_v13  ;;  %v2612_v13 = vld [vmem:[#allocation16 + $0x358] sm:$0xff] }
 0x7e3   : > { %3629 = vmatprep.subr.bf16.mxu1 %v3628_v23  ;;  %v3640_v20 = vpack.c.bf16 %v2616_v15, %v2612_v13  ;;  %v2615_v23 = vld [vmem:[#allocation16 + $0x370] sm:$0xff] }
 0x80d   : > { %v1914_v27 = vpop.f32.mrb[20].mxu1 }
 0x80e   : > { %v1916_v34 = vpop.f32.mrb[21].mxu1  ;;  %1975 = vrot.lane.b32.xlu0 %v1914_v27, %s4181_s28  ;;  %v2587_v27 = vld [vmem:[#allocation16 + $0x290] sm:$0xff] }
 0x80f   : > { %1977 = vrot.lane.b32.xlu1 %v1916_v34, %s4181_s28  ;;  %v3630_v0 = vpack.c.bf16 %v2591_v6, %v2587_v27  ;;  %v2598_v34 = vld [vmem:[#allocation16 + $0x2e8] sm:$0xff]  ;;  %s5634_s28 = smov 112  }
 0x810   : > { %v3504_v38 = vpack.c.bf16 %v2598_v34, %v2594_v33  ;;  %v2618_v6 = vld [vmem:[#allocation16 + $0x388] sm:$0xff]  ;;  %v2624_v34 = vld [vmem:[#allocation16 + $0x3b8] sm:$0xff] }
 0x811   : > { %v1920_v48 = vpop.f32.mrb[22].mxu1  ;;  %3631 = vmatpush1.bf16.msra.mxu1 %v3630_v0  ;;  %v2620_v0 = vld [vmem:[#allocation16 + $0x398] sm:$0xff] }
 0x812   : > { %v1922_v59 = vpop.f32.mrb[23].mxu1  ;;  %1985 = vrot.lane.b32.xlu0 %v1920_v48, %s4182_s5  ;;  %v2595_v48 = vld [vmem:[#allocation16 + $0x2d0] sm:$0xff]  ;;  %3505 = vmatprep.subr.bf16.mxu0 %v3504_v38  ;;  %v2621_v38 = vld [vmem:[#allocation16 + $0x3a0] sm:$0xff]  ;;  %v3644_v60 = vpack.c.bf16 %v2624_v34, %v2620_v0 }
 0x813   : > { %1987 = vrot.lane.b32.xlu1 %v1922_v59, %s4182_s5  ;;  %v3634_v56 = vpack.c.bf16 %v2599_v7, %v2595_v48  ;;  %3633 = vmatprep.subr.bf16.mxu1 %v3632_v45  ;;  %v2606_v59 = vld [vmem:[#allocation16 + $0x328] sm:$0xff]  ;;  %v3518_v40 = vpack.c.bf16 %v2621_v38, %v2617_v35  ;;  %v2619_v45 = vld [vmem:[#allocation16 + $0x390] sm:$0xff]  ;;  %v2633_v38 = vld [vmem:[#allocation16 + $0x400] sm:$0xff]  ;;  %s3331_s5 = sshll.u32 %s5640_s27, 3 }
 0x814   : > { %3507 = vmatpush1.bf16.msra.mxu0 %v3506_v46  ;;  %v3508_v55 = vpack.c.bf16 %v2606_v59, %v2602_v57  ;;  %v2623_v46 = vld [vmem:[#allocation16 + $0x3b0] sm:$0xff]  ;;  %v2626_v48 = vld [vmem:[#allocation16 + $0x3c8] sm:$0xff]  ;;  %v2628_v59 = vld [vmem:[#allocation16 + $0x3d8] sm:$0xff] }
 0x815   : > { %v1926_v4 = vpop.f32.mrb[24].mxu1  ;;  %3635 = vmatpush1.bf16.msra.mxu1 %v3634_v56  ;;  %v3646_v56 = vpack.c.bf16 %v2623_v46, %v2619_v45  ;;  %v2630_v57 = vld [vmem:[#allocation16 + $0x3e8] sm:$0xff]  ;;  %v3648_v61 = vpack.c.bf16 %v2632_v52, %v2628_v59  ;;  %v2648_v59 = vld [vmem:[#allocation16 + $0x478] sm:$0xff] }
 0x816   : > { %v1928_v12 = vpop.f32.mrb[25].mxu1  ;;  %1995 = vrot.lane.b32.xlu0 %v1926_v4, %s4183_s4  ;;  %v2603_v4 = vld [vmem:[#allocation16 + $0x310] sm:$0xff]  ;;  %3509 = vmatprep.subr.bf16.mxu0 %v3508_v55  ;;  %v3520_v55 = vpack.c.bf16 %v2630_v57, %v2626_v48  ;;  %v2642_v46 = vld [vmem:[#allocation16 + $0x448] sm:$0xff]  ;;  %v2644_v57 = vld [vmem:[#allocation16 + $0x458] sm:$0xff] }
 0x817   : > { %1997 = vrot.lane.b32.xlu1 %v1928_v12, %s4183_s4  ;;  %v3638_v9 = vpack.c.bf16 %v2607_v5, %v2603_v4  ;;  %3637 = vmatprep.subr.bf16.mxu1 %v3636_v29  ;;  %v2614_v12 = vld [vmem:[#allocation16 + $0x368] sm:$0xff]  ;;  %v3522_v29 = vpack.c.bf16 %v2629_v1, %v2625_v62 }
 0x818   : > { %3511 = vmatpush1.bf16.msra.mxu0 %v3510_v2  ;;  %v3512_v14 = vpack.c.bf16 %v2614_v12, %v2610_v53  ;;  %v2631_v2 = vld [vmem:[#allocation16 + $0x3f0] sm:$0xff]  ;;  %v2638_v53 = vld [vmem:[#allocation16 + $0x428] sm:$0xff]  ;;  %v2636_v12 = vld [vmem:[#allocation16 + $0x418] sm:$0xff] }
 0x819   : > { %v1932_v22 = vpop.f32.mrb[26].mxu1  ;;  %3639 = vmatpush1.bf16.msra.mxu1 %v3638_v9  ;;  %v2634_v9 = vld [vmem:[#allocation16 + $0x408] sm:$0xff] }
 0x81a   : > { %v1934_v32 = vpop.f32.mrb[27].mxu1  ;;  %2005 = vrot.lane.b32.xlu0 %v1932_v22, %s4184_s2  ;;  %v2611_v22 = vld [vmem:[#allocation16 + $0x350] sm:$0xff]  ;;  %3513 = vmatprep.subr.bf16.mxu0 %v3512_v14  ;;  %v3524_v13 = vpack.c.bf16 %v2638_v53, %v2634_v9  ;;  %v2640_v14 = vld [vmem:[#allocation16 + $0x438] sm:$0xff]  ;;  %v3656_v9 = vpack.c.bf16 %v2648_v59, %v2644_v57 }
 0x81b   : > { %2007 = vrot.lane.b32.xlu1 %v1934_v32, %s4184_s2  ;;  %v3642_v27 = vpack.c.bf16 %v2615_v23, %v2611_v22  ;;  %v2622_v32 = vld [vmem:[#allocation16 + $0x3a8] sm:$0xff]  ;;  %3641 = vmatprep.subr.bf16.mxu1 %v3640_v20  ;;  %v3652_v15 = vpack.c.bf16 %v2640_v14, %v2636_v12  ;;  %v2652_v53 = vld [vmem:[#allocation16 + $0x498] sm:$0xff]  ;;  %v2649_v14 = vld [vmem:[#allocation16 + $0x480] sm:$0xff] }
 0x81c   : > { %3515 = vmatpush1.bf16.msra.mxu0 %v3514_v21  ;;  %v3516_v33 = vpack.c.bf16 %v2622_v32, %v2618_v6  ;;  %v2656_v12 = vld [vmem:[#allocation16 + $0x4b8] sm:$0xff] }
 0x81d   : > { %v5348_v44 = vpop.f32.mrb[28].mxu1  ;;  %3643 = vmatpush1.bf16.msra.mxu1 %v3642_v27 }
 0x81e   : > { %v5350_v49 = vpop.f32.mrb[29].mxu1  ;;  %3517 = vmatprep.subr.bf16.mxu0 %v3516_v33  ;;  %3645 = vmatprep.subr.bf16.mxu1 %v3644_v60  ;;  %v2635_v60 = vld [vmem:[#allocation16 + $0x410] sm:$0xff] }
 0x820   : > { %3519 = vmatpush1.bf16.msra.mxu0 %v3518_v40  ;;  %v2639_v40 = vld [vmem:[#allocation16 + $0x430] sm:$0xff] }
 0x821   : > { %v1944_v3 = vpop.f32.mrb[30].mxu1  ;;  %3647 = vmatpush1.bf16.msra.mxu1 %v3646_v56  ;;  %3521 = vmatprep.subr.bf16.mxu0 %v3520_v55  ;;  %v2646_v56 = vld [vmem:[#allocation16 + $0x468] sm:$0xff]  ;;  %v3654_v62 = vpack.c.bf16 %v2639_v40, %v2635_v60  ;;  %v2668_v40 = vld [vmem:[#allocation16 + $0x518] sm:$0xff] }
 0x822   : > { %v1946_v58 = vpop.f32.mrb[31].mxu1  ;;  %2015 = vrot.lane.b32.xlu0 %v1944_v3, %s4185_s22  ;;  %v2627_v3 = vld [vmem:[#allocation16 + $0x3d0] sm:$0xff]  ;;  %3649 = vmatprep.subr.bf16.mxu1 %v3648_v61  ;;  %v2670_v60 = vld [vmem:[#allocation16 + $0x528] sm:$0xff] }
 0x823   : > { %2017 = vrot.lane.b32.xlu1 %v1946_v58, %s4185_s22  ;;  %v3650_v5 = vpack.c.bf16 %v2631_v2, %v2627_v3  ;;  %v2641_v3 = vld [vmem:[#allocation16 + $0x440] sm:$0xff]  ;;  %v2643_v2 = vld [vmem:[#allocation16 + $0x450] sm:$0xff]  ;;  %s5637_s22 = sld [smem:[#allocation36_spill]] }
 0x824   : > { %3523 = vmatpush1.bf16.msra.mxu0 %v3522_v29  ;;  %v2645_v29 = vld [vmem:[#allocation16 + $0x460] sm:$0xff] }
 0x825   : > { %v1950_v19 = vpop.f32.mrb[32].mxu1  ;;  %3651 = vmatpush1.bf16.msra.mxu1 %v3650_v5  ;;  %3525 = vmatprep.subr.bf16.mxu0 %v3524_v13  ;;  %v2650_v5 = vld [vmem:[#allocation16 + $0x488] sm:$0xff] }
 0x826   : > { %v1952_v24 = vpop.f32.mrb[33].mxu1  ;;  %3653 = vmatprep.subr.bf16.mxu1 %v3652_v15  ;;  %v2653_v15 = vld [vmem:[#allocation16 + $0x4a0] sm:$0xff] }
 0x827   : > { %2025 = vrot.lane.b32.xlu1 %v1950_v19, %s4186_s1  ;;  %2027 = vrot.lane.b32.xlu0 %v1952_v24, %s4186_s1  ;;  %v2415_v19 = vpop.permute.xlu0 %2414 }
 0x829   : > { %v1956_v39 = vpop.f32.mrb[34].mxu1  ;;  %s786_s1 = scalar_lea.vmem %s5637_s22, %s3331_s5 }
 0x82a   : > { %v1958_v7 = vpop.f32.mrb[35].mxu1 }
 0x82b   : > { %2035 = vrot.lane.b32.xlu0 %v1956_v39, %s5634_s28  ;;  %2037 = vrot.lane.b32.xlu1 %v1958_v7, %s5634_s28  ;;  %v2637_v39 = vld [vmem:[#allocation16 + $0x420] sm:$0xff] }
 0x82c   : > { %v3526_v61 = vpack.c.bf16 %v2637_v39, %v2633_v38  ;;  %v2663_v38 = vld [vmem:[#allocation16 + $0x4f0] sm:$0xff]  ;;  %v2666_v39 = vld [vmem:[#allocation16 + $0x508] sm:$0xff] }
 0x82d   : > { %v1962_v4 = vpop.f32.mrb[36].mxu1  ;;  %v3540_v57 = vpack.c.bf16 %v2670_v60, %v2666_v39 }
 0x82e   : > { %v1964_v58 = vpop.f32.mrb[37].mxu1 }
 0x82f   : > { %2045 = vrot.lane.b32.xlu0 %v1962_v4, %s4188_s21  ;;  %2047 = vrot.lane.b32.xlu1 %v1964_v58, %s4188_s21  ;;  %v2647_v4 = vld [vmem:[#allocation16 + $0x470] sm:$0xff]  ;;  %v3528_v58 = vpack.c.bf16 %v2646_v56, %v2642_v46  ;;  %v2669_v56 = vld [vmem:[#allocation16 + $0x520] sm:$0xff] }
 0x830   : > { %v3658_v13 = vpack.c.bf16 %v2647_v4, %v2643_v2 }
 0x84d   : > { %v2322_v16 = vpop.f32.mrb[38].mxu1 }
 0x84e   : > { %v2324_v18 = vpop.f32.mrb[39].mxu1 }
 0x890   : > { %v2486_v20 = vpop.f32.mrb[40].mxu1 }
 0x891   : > { %v2487_v21 = vadd.f32 %v2486_v20, %v2415_v19  ;;  %v2488_v22 = vpop.f32.mrb[41].mxu1  ;;  %v2655_v20 = vld [vmem:[#allocation16 + $0x4b0] sm:$0xff] }
 0x892   : > { %v2489_v23 = vadd.f32 %v2488_v22, %v2415_v19  ;;  %v2651_v19 = vld [vmem:[#allocation16 + $0x490] sm:$0xff]  ;;  %v2662_v22 = vld [vmem:[#allocation16 + $0x4e8] sm:$0xff] }
 0x893   : > { %v2491_v24 = vsub.f32 0.0, %v2487_v21  ;;  %v2658_v21 = vld [vmem:[#allocation16 + $0x4c8] sm:$0xff] }
 0x894   : > { %v2492_v27 = vsub.f32 0.0, %v2489_v23  ;;  %v2660_v23 = vld [vmem:[#allocation16 + $0x4d8] sm:$0xff] }
 0x895   : > { %v2493_v6 = vmul.f32 1.442695, %v2491_v24  ;;  %v2664_v24 = vld [vmem:[#allocation16 + $0x4f8] sm:$0xff] }
 0x896   : > { %v2495_v32 = vmul.f32 1.442695, %v2492_v27  ;;  %v3534_v27 = vpack.c.bf16 %v2653_v15, %v2649_v14  ;;  %v2684_v14 = vld [vmem:[#allocation16 + $0x598] sm:$0xff] }
 0x897   : > { %3843 = vpow2.f32 %v2493_v6  ;;  %v3662_v6 = vpack.c.bf16 %v2655_v20, %v2651_v19  ;;  %v2688_v15 = vld [vmem:[#allocation16 + $0x5b8] sm:$0xff]  ;;  %v2681_v19 = vld [vmem:[#allocation16 + $0x580] sm:$0xff] }
 0x898   : > { %3845 = vpow2.f32 %v2495_v32  ;;  %v2657_v32 = vld [vmem:[#allocation16 + $0x4c0] sm:$0xff] }
 0x899   : > { %v2685_v20 = vld [vmem:[#allocation16 + $0x5a0] sm:$0xff] }
 0x8a1   : > { %v3844_v0 = vpop.eup %3843 }
 0x8a2   : > { %v3846_v33 = vpop.eup %3845  ;;  %v2497_v34 = vadd.f32 1.0, %v3844_v0  ;;  %v2661_v0 = vld [vmem:[#allocation16 + $0x4e0] sm:$0xff] }
 0x8a3   : > { %v2498_v35 = vadd.f32 1.0, %v3846_v33  ;;  %v3536_v33 = vpack.c.bf16 %v2662_v22, %v2658_v21  ;;  %v3538_v46 = vpack.c.bf16 %v2661_v0, %v2657_v32  ;;  %v3676_v22 = vpack.c.bf16 %v2688_v15, %v2684_v14  ;;  %v2692_v32 = vld [vmem:[#allocation16 + $0x5d8] sm:$0xff]  ;;  %v2707_v14 = vld [vmem:[#allocation16 + $0x650] sm:$0xff] }
 0x8a4   : > { %3847 = vrcp.f32 %v2497_v34  ;;  %v3664_v34 = vpack.c.bf16 %v2664_v24, %v2660_v23  ;;  %v2683_v23 = vld [vmem:[#allocation16 + $0x590] sm:$0xff]  ;;  %v2696_v0 = vld [vmem:[#allocation16 + $0x5f8] sm:$0xff] }
 0x8a5   : > { %3849 = vrcp.f32 %v2498_v35  ;;  %v2659_v35 = vld [vmem:[#allocation16 + $0x4d0] sm:$0xff]  ;;  %v3680_v60 = vpack.c.bf16 %v2696_v0, %v2692_v32 }
 0x8a6   : > { %v2687_v24 = vld [vmem:[#allocation16 + $0x5b0] sm:$0xff] }
 0x8a7   : > { %v2711_v15 = vld [vmem:[#allocation16 + $0x670] sm:$0xff] }
 0x8a8   : > { %v2715_v32 = vld [vmem:[#allocation16 + $0x690] sm:$0xff] }
 0x8a9   : > { %v2719_v0 = vld [vmem:[#allocation16 + $0x6b0] sm:$0xff] }
 0x8ae   : > { %v3848_v45 = vpop.eup %3847 }
 0x8af   : > { %v3850_v48 = vpop.eup %3849  ;;  %v2501_v7 = vmul.f32 %v3848_v45, %v5231_v10  ;;  %v5361_v52 = vmul.f32 %v3848_v45, %v2322_v16  ;;  %v2654_v10 = vld [vmem:[#allocation16 + $0x4a8] sm:$0xff]  ;;  %v2672_v45 = vld [vmem:[#allocation16 + $0x538] sm:$0xff] }
 0x8b0   : > { %v2502_v55 = vmul.f32 %v3850_v48, %v5233_v11  ;;  %v2504_v1 = vmul.f32 %v3850_v48, %v2324_v18  ;;  %v3530_v11 = vpack.c.bf16 %v2645_v29, %v2641_v3  ;;  %v3532_v16 = vpack.c.bf16 %v2654_v10, %v2650_v5  ;;  %v2676_v3 = vld [vmem:[#allocation16 + $0x558] sm:$0xff]  ;;  %v2673_v5 = vld [vmem:[#allocation16 + $0x540] sm:$0xff] }
 0x8b1   : > { %v3660_v18 = vpack.c.bf16 %v2656_v12, %v2652_v53  ;;  %v3666_v48 = vpack.c.bf16 %v2663_v38, %v2659_v35  ;;  %v3668_v59 = vpack.c.bf16 %v2672_v45, %v2668_v40  ;;  %v2680_v29 = vld [vmem:[#allocation16 + $0x578] sm:$0xff]  ;;  %v2675_v53 = vld [vmem:[#allocation16 + $0x550] sm:$0xff]  ;;  %v2689_v35 = vld [vmem:[#allocation16 + $0x5c0] sm:$0xff] }
 0x8b2   : > { %2825 = vmatprep.mubr.f32.mxu0 %v2502_v55  ;;  %2967 = vmatprep.mubr.f32.mxu1 %v2502_v55  ;;  %v2667_v55 = vld [vmem:[#allocation16 + $0x510] sm:$0xff]  ;;  %v3672_v10 = vpack.c.bf16 %v2680_v29, %v2676_v3  ;;  %v2693_v38 = vld [vmem:[#allocation16 + $0x5e0] sm:$0xff] }
 0x8b3   : > { %2826 = vmatmul.mubr.f32.vlgmr.msra.gmra.mrb[42].mxu0 %v2501_v7  ;;  %2968 = vmatmul.mubr.f32.vlgmr.msra.gmra.mrb[42].mxu1 %v2501_v7  ;;  %v2665_v7 = vld [vmem:[#allocation16 + $0x500] sm:$0xff]  ;;  %v2679_v12 = vld [vmem:[#allocation16 + $0x570] sm:$0xff] }
 0x8b4   : > { %3527 = vmatpush1.bf16.msra.mxu0 %v3526_v61  ;;  %3655 = vmatpush1.bf16.msra.mxu1 %v3654_v62  ;;  %v2671_v61 = vld [vmem:[#allocation16 + $0x530] sm:$0xff]  ;;  %v2674_v62 = vld [vmem:[#allocation16 + $0x548] sm:$0xff]  ;;  %v3542_v2 = vpack.c.bf16 %v2669_v56, %v2665_v7  ;;  %v2700_v7 = vld [vmem:[#allocation16 + $0x618] sm:$0xff] }
 0x8b5   : > { %2896 = vmatprep.mubr.f32.mxu0 %v2504_v1  ;;  %3038 = vmatprep.mubr.f32.mxu1 %v2504_v1  ;;  %v2678_v1 = vld [vmem:[#allocation16 + $0x568] sm:$0xff]  ;;  %v3670_v4 = vpack.c.bf16 %v2671_v61, %v2667_v55  ;;  %v2691_v40 = vld [vmem:[#allocation16 + $0x5d0] sm:$0xff]  ;;  %v2704_v56 = vld [vmem:[#allocation16 + $0x638] sm:$0xff] }
 0x8b6   : > { %3529 = vmatprep.subr.bf16.mxu0 %v3528_v58  ;;  %3657 = vmatprep.subr.bf16.mxu1 %v3656_v9  ;;  %v2677_v58 = vld [vmem:[#allocation16 + $0x560] sm:$0xff]  ;;  %v3544_v9 = vpack.c.bf16 %v2678_v1, %v2674_v62  ;;  %v2695_v45 = vld [vmem:[#allocation16 + $0x5f0] sm:$0xff]  ;;  %v3684_v1 = vpack.c.bf16 %v2704_v56, %v2700_v7 }
 0x8b7   : > { %v2697_v55 = vld [vmem:[#allocation16 + $0x600] sm:$0xff]  ;;  %v2699_v3 = vld [vmem:[#allocation16 + $0x610] sm:$0xff] }
 0x8b8   : > { %3531 = vmatpush1.bf16.msra.mxu0 %v3530_v11  ;;  %3659 = vmatpush1.bf16.msra.mxu1 %v3658_v13  ;;  %v2682_v11 = vld [vmem:[#allocation16 + $0x588] sm:$0xff]  ;;  %v2701_v61 = vld [vmem:[#allocation16 + $0x620] sm:$0xff]  ;;  %v2703_v29 = vld [vmem:[#allocation16 + $0x630] sm:$0xff] }
 0x8b9   : > { %3533 = vmatprep.subr.bf16.mxu0 %v3532_v16  ;;  %3661 = vmatprep.subr.bf16.mxu1 %v3660_v18  ;;  %v2686_v13 = vld [vmem:[#allocation16 + $0x5a8] sm:$0xff]  ;;  %v3546_v16 = vpack.c.bf16 %v2677_v58, %v2673_v5  ;;  %v3674_v18 = vpack.c.bf16 %v2679_v12, %v2675_v53  ;;  %v2708_v5 = vld [vmem:[#allocation16 + $0x658] sm:$0xff]  ;;  %v2705_v53 = vld [vmem:[#allocation16 + $0x640] sm:$0xff] }
 0x8ba   : > { %v3548_v21 = vpack.c.bf16 %v2686_v13, %v2682_v11  ;;  %v2712_v58 = vld [vmem:[#allocation16 + $0x678] sm:$0xff]  ;;  %v2709_v12 = vld [vmem:[#allocation16 + $0x660] sm:$0xff]  ;;  %v2723_v7 = vld [vmem:[#allocation16 + $0x6d0] sm:$0xff] }
 0x8bb   : > { %v3688_v13 = vpack.c.bf16 %v2712_v58, %v2708_v5  ;;  %v2727_v56 = vld [vmem:[#allocation16 + $0x6f0] sm:$0xff] }
 0x8bc   : > { %3535 = vmatpush1.bf16.msra.mxu0 %v3534_v27  ;;  %3663 = vmatpush1.bf16.msra.mxu1 %v3662_v6  ;;  %v2690_v27 = vld [vmem:[#allocation16 + $0x5c8] sm:$0xff]  ;;  %v2731_v5 = vld [vmem:[#allocation16 + $0x710] sm:$0xff] }
 0x8bd   : > { %3537 = vmatprep.subr.bf16.mxu0 %v3536_v33  ;;  %3665 = vmatprep.subr.bf16.mxu1 %v3664_v34  ;;  %v2694_v6 = vld [vmem:[#allocation16 + $0x5e8] sm:$0xff]  ;;  %v3550_v33 = vpack.c.bf16 %v2685_v20, %v2681_v19  ;;  %v3678_v34 = vpack.c.bf16 %v2687_v24, %v2683_v23  ;;  %v2716_v19 = vld [vmem:[#allocation16 + $0x698] sm:$0xff]  ;;  %v2713_v23 = vld [vmem:[#allocation16 + $0x680] sm:$0xff] }
 0x8be   : > { %v3552_v39 = vpack.c.bf16 %v2694_v6, %v2690_v27  ;;  %v2720_v20 = vld [vmem:[#allocation16 + $0x6b8] sm:$0xff]  ;;  %v2717_v24 = vld [vmem:[#allocation16 + $0x6a0] sm:$0xff]  ;;  %v2735_v58 = vld [vmem:[#allocation16 + $0x730] sm:$0xff] }
 0x8bf   : > { %v3692_v6 = vpack.c.bf16 %v2720_v20, %v2716_v19  ;;  %v2739_v19 = vld [vmem:[#allocation16 + $0x750] sm:$0xff] }
 0x8c0   : > { %3539 = vmatpush1.bf16.msra.mxu0 %v3538_v46  ;;  %3667 = vmatpush1.bf16.msra.mxu1 %v3666_v48  ;;  %v2698_v46 = vld [vmem:[#allocation16 + $0x608] sm:$0xff]  ;;  %v2743_v20 = vld [vmem:[#allocation16 + $0x770] sm:$0xff] }
 0x8c1   : > { %3541 = vmatprep.subr.bf16.mxu0 %v3540_v57  ;;  %3669 = vmatprep.subr.bf16.mxu1 %v3668_v59  ;;  %v2702_v48 = vld [vmem:[#allocation16 + $0x628] sm:$0xff]  ;;  %v3554_v57 = vpack.c.bf16 %v2693_v38, %v2689_v35  ;;  %v3682_v59 = vpack.c.bf16 %v2695_v45, %v2691_v40  ;;  %v2724_v35 = vld [vmem:[#allocation16 + $0x6d8] sm:$0xff]  ;;  %v2721_v40 = vld [vmem:[#allocation16 + $0x6c0] sm:$0xff] }
 0x8c2   : > { %v3556_v62 = vpack.c.bf16 %v2702_v48, %v2698_v46  ;;  %v2728_v38 = vld [vmem:[#allocation16 + $0x6f8] sm:$0xff]  ;;  %v2725_v45 = vld [vmem:[#allocation16 + $0x6e0] sm:$0xff] }
 0x8c3   : > { %v3696_v48 = vpack.c.bf16 %v2728_v38, %v2724_v35  ;;  %v2747_v35 = vld [vmem:[#allocation16 + $0x790] sm:$0xff] }
 0x8c4   : > { %3543 = vmatpush1.bf16.msra.mxu0 %v3542_v2  ;;  %3671 = vmatpush1.bf16.msra.mxu1 %v3670_v4  ;;  %v2706_v2 = vld [vmem:[#allocation16 + $0x648] sm:$0xff]  ;;  %v2751_v38 = vld [vmem:[#allocation16 + $0x7b0] sm:$0xff] }
 0x8c5   : > { %3545 = vmatprep.subr.bf16.mxu0 %v3544_v9  ;;  %3673 = vmatprep.subr.bf16.mxu1 %v3672_v10  ;;  %v2710_v4 = vld [vmem:[#allocation16 + $0x668] sm:$0xff]  ;;  %v3558_v9 = vpack.c.bf16 %v2701_v61, %v2697_v55  ;;  %v3686_v10 = vpack.c.bf16 %v2703_v29, %v2699_v3  ;;  %v2732_v55 = vld [vmem:[#allocation16 + $0x718] sm:$0xff]  ;;  %v2729_v3 = vld [vmem:[#allocation16 + $0x700] sm:$0xff] }
 0x8c6   : > { %v3560_v11 = vpack.c.bf16 %v2710_v4, %v2706_v2  ;;  %v2736_v61 = vld [vmem:[#allocation16 + $0x738] sm:$0xff]  ;;  %v2733_v29 = vld [vmem:[#allocation16 + $0x720] sm:$0xff] }
 0x8c7   : > { %v3700_v4 = vpack.c.bf16 %v2736_v61, %v2732_v55  ;;  %v2755_v55 = vld [vmem:[#allocation16 + $0x7d0] sm:$0xff] }
 0x8c8   : > { %3547 = vmatpush1.bf16.msra.mxu0 %v3546_v16  ;;  %3675 = vmatpush1.bf16.msra.mxu1 %v3674_v18  ;;  %v2714_v16 = vld [vmem:[#allocation16 + $0x688] sm:$0xff]  ;;  %v2759_v61 = vld [vmem:[#allocation16 + $0x7f0] sm:$0xff] }
 0x8c9   : > { %3549 = vmatprep.subr.bf16.mxu0 %v3548_v21  ;;  %3677 = vmatprep.subr.bf16.mxu1 %v3676_v22  ;;  %v2718_v18 = vld [vmem:[#allocation16 + $0x6a8] sm:$0xff]  ;;  %v3562_v21 = vpack.c.bf16 %v2709_v12, %v2705_v53  ;;  %v3690_v22 = vpack.c.bf16 %v2711_v15, %v2707_v14  ;;  %v2740_v53 = vld [vmem:[#allocation16 + $0x758] sm:$0xff]  ;;  %v2737_v14 = vld [vmem:[#allocation16 + $0x740] sm:$0xff] }
 0x8ca   : > { %v3564_v27 = vpack.c.bf16 %v2718_v18, %v2714_v16  ;;  %v2744_v12 = vld [vmem:[#allocation16 + $0x778] sm:$0xff]  ;;  %v2741_v15 = vld [vmem:[#allocation16 + $0x760] sm:$0xff] }
 0x8cb   : > { %v3704_v18 = vpack.c.bf16 %v2744_v12, %v2740_v53 }
 0x8cc   : > { %3551 = vmatpush1.bf16.msra.mxu0 %v3550_v33  ;;  %3679 = vmatpush1.bf16.msra.mxu1 %v3678_v34  ;;  %v2722_v33 = vld [vmem:[#allocation16 + $0x6c8] sm:$0xff] }
 0x8cd   : > { %3553 = vmatprep.subr.bf16.mxu0 %v3552_v39  ;;  %3681 = vmatprep.subr.bf16.mxu1 %v3680_v60  ;;  %v2726_v34 = vld [vmem:[#allocation16 + $0x6e8] sm:$0xff]  ;;  %v3566_v39 = vpack.c.bf16 %v2717_v24, %v2713_v23  ;;  %v3694_v60 = vpack.c.bf16 %v2719_v0, %v2715_v32  ;;  %v2748_v23 = vld [vmem:[#allocation16 + $0x798] sm:$0xff]  ;;  %v2745_v32 = vld [vmem:[#allocation16 + $0x780] sm:$0xff] }
 0x8ce   : > { %v3568_v46 = vpack.c.bf16 %v2726_v34, %v2722_v33  ;;  %v2752_v24 = vld [vmem:[#allocation16 + $0x7b8] sm:$0xff]  ;;  %v2749_v0 = vld [vmem:[#allocation16 + $0x7a0] sm:$0xff] }
 0x8cf   : > { %v3708_v34 = vpack.c.bf16 %v2752_v24, %v2748_v23 }
 0x8d0   : > { %3555 = vmatpush1.bf16.msra.mxu0 %v3554_v57  ;;  %3683 = vmatpush1.bf16.msra.mxu1 %v3682_v59  ;;  %v2730_v57 = vld [vmem:[#allocation16 + $0x708] sm:$0xff] }
 0x8d1   : > { %3557 = vmatprep.subr.bf16.mxu0 %v3556_v62  ;;  %3685 = vmatprep.subr.bf16.mxu1 %v3684_v1  ;;  %v2734_v59 = vld [vmem:[#allocation16 + $0x728] sm:$0xff]  ;;  %v3570_v62 = vpack.c.bf16 %v2725_v45, %v2721_v40  ;;  %v3698_v1 = vpack.c.bf16 %v2727_v56, %v2723_v7  ;;  %v2756_v40 = vld [vmem:[#allocation16 + $0x7d8] sm:$0xff]  ;;  %v2753_v7 = vld [vmem:[#allocation16 + $0x7c0] sm:$0xff] }
 0x8d2   : > { %v3572_v2 = vpack.c.bf16 %v2734_v59, %v2730_v57  ;;  %v2760_v45 = vld [vmem:[#allocation16 + $0x7f8] sm:$0xff]  ;;  %v2757_v59 = vld [vmem:[#allocation16 + $0x7e0] sm:$0xff] }
 0x8d3   : > { %v3712_v57 = vpack.c.bf16 %v2760_v45, %v2756_v40 }
 0x8d4   : > { %3559 = vmatpush1.bf16.msra.mxu0 %v3558_v9  ;;  %3687 = vmatpush1.bf16.msra.mxu1 %v3686_v10  ;;  %v2738_v9 = vld [vmem:[#allocation16 + $0x748] sm:$0xff] }
 0x8d5   : > { %3561 = vmatprep.subr.bf16.mxu0 %v3560_v11  ;;  %3689 = vmatprep.subr.bf16.mxu1 %v3688_v13  ;;  %v2742_v10 = vld [vmem:[#allocation16 + $0x768] sm:$0xff]  ;;  %v3574_v11 = vpack.c.bf16 %v2733_v29, %v2729_v3  ;;  %v3702_v13 = vpack.c.bf16 %v2735_v58, %v2731_v5  ;;  %v1971_v3 = vpop.permute.xlu1 %1970  ;;  %v5366_v29 = vpop.permute.xlu0 %3068 }
 0x8d6   : > { %v3576_v16 = vpack.c.bf16 %v2742_v10, %v2738_v9 }
 0x8d8   : > { %3563 = vmatpush1.bf16.msra.mxu0 %v3562_v21  ;;  %3691 = vmatpush1.bf16.msra.mxu1 %v3690_v22  ;;  %v2746_v21 = vld [vmem:[#allocation16 + $0x788] sm:$0xff] }
 0x8d9   : > { %3565 = vmatprep.subr.bf16.mxu0 %v3564_v27  ;;  %3693 = vmatprep.subr.bf16.mxu1 %v3692_v6  ;;  %v2750_v22 = vld [vmem:[#allocation16 + $0x7a8] sm:$0xff]  ;;  %v3578_v27 = vpack.c.bf16 %v2741_v15, %v2737_v14  ;;  %v3706_v6 = vpack.c.bf16 %v2743_v20, %v2739_v19  ;;  %v1976_v5 = vpop.permute.xlu0 %1975  ;;  %v1973_v20 = vadd.f32 %v1971_v3, %v5348_v44 }
 0x8da   : > { %v3580_v33 = vpack.c.bf16 %v2750_v22, %v2746_v21 }
 0x8dc   : > { %3567 = vmatpush1.bf16.msra.mxu0 %v3566_v39  ;;  %3695 = vmatpush1.bf16.msra.mxu1 %v3694_v60  ;;  %v2754_v39 = vld [vmem:[#allocation16 + $0x7c8] sm:$0xff] }
 0x8dd   : > { %3569 = vmatprep.subr.bf16.mxu0 %v3568_v46  ;;  %3697 = vmatprep.subr.bf16.mxu1 %v3696_v48  ;;  %v2758_v60 = vld [vmem:[#allocation16 + $0x7e8] sm:$0xff]  ;;  %v3582_v46 = vpack.c.bf16 %v2749_v0, %v2745_v32  ;;  %v3710_v48 = vpack.c.bf16 %v2751_v38, %v2747_v35  ;;  %v1986_v9 = vpop.permute.xlu0 %1985 }
 0x8de   : > { %v3584_v56 = vpack.c.bf16 %v2758_v60, %v2754_v39  ;;  %v1974_v39 = vadd.f32 %v1971_v3, %v5350_v49 }
 0x8e0   : > { %3571 = vmatpush1.bf16.msra.mxu0 %v3570_v62  ;;  %3699 = vmatpush1.bf16.msra.mxu1 %v3698_v1  ;;  %v3586_v62 = vpack.c.bf16 %v2757_v59, %v2753_v7  ;;  %v3714_v1 = vpack.c.bf16 %v2759_v61, %v2755_v55 }
 0x8e1   : > { %3573 = vmatprep.subr.bf16.mxu0 %v3572_v2  ;;  %3701 = vmatprep.subr.bf16.mxu1 %v3700_v4  ;;  %v5368_v2 = vpop.permute.xlu1 %3076  ;;  %v1996_v53 = vpop.permute.xlu0 %1995 }
 0x8e4   : > { %3575 = vmatpush1.bf16.msra.mxu0 %v3574_v11  ;;  %3703 = vmatpush1.bf16.msra.mxu1 %v3702_v13 }
 0x8e5   : > { %3577 = vmatprep.subr.bf16.mxu0 %v3576_v16  ;;  %3705 = vmatprep.subr.bf16.mxu1 %v3704_v18  ;;  %v1978_v4 = vpop.permute.xlu1 %1977  ;;  %v2006_v11 = vpop.permute.xlu0 %2005 }
 0x8e6   : > { %v1980_v15 = vsel %vm1159_vm9, %v1978_v4, %v1976_v5 }
 0x8e7   : > { %v1981_v21 = vmul.f32 %v4830_v28, %v1980_v15 }
 0x8e8   : > { %3579 = vmatpush1.bf16.msra.mxu0 %v3578_v27  ;;  %3707 = vmatpush1.bf16.msra.mxu1 %v3706_v6 }
 0x8e9   : > { %3581 = vmatprep.subr.bf16.mxu0 %v3580_v33  ;;  %3709 = vmatprep.subr.bf16.mxu1 %v3708_v34  ;;  %v1988_v58 = vpop.permute.xlu1 %1987  ;;  %v2016_v14 = vpop.permute.xlu0 %2015  ;;  %v1983_v45 = vadd.f32 %v1981_v21, %v1973_v20 }
 0x8ea   : > { %v1990_v19 = vsel %vm1170_vm4, %v1988_v58, %v1986_v9  ;;  %v1989_v22 = vsel %vm1170_vm4, %v1986_v9, %v1988_v58 }
 0x8eb   : > { %v1991_v35 = vmul.f32 %v4848_v36, %v1990_v19  ;;  %v1992_v60 = vmul.f32 %v4853_v37, %v1989_v22 }
 0x8ec   : > { %3583 = vmatpush1.bf16.msra.mxu0 %v3582_v46  ;;  %3711 = vmatpush1.bf16.msra.mxu1 %v3710_v48 }
 0x8ed   : > { %3585 = vmatprep.subr.bf16.mxu0 %v3584_v56  ;;  %3713 = vmatprep.subr.bf16.mxu1 %v3712_v57  ;;  %v1998_v10 = vpop.permute.xlu1 %1997  ;;  %v2028_v18 = vpop.permute.xlu0 %2027  ;;  %v1993_v37 = vadd.f32 %v1991_v35, %v1983_v45 }
 0x8ee   : > { %v2000_v6 = vsel %vm1181_vm1, %v1998_v10, %v1996_v53  ;;  %v1999_v44 = vsel %vm1181_vm1, %v1996_v53, %v1998_v10 }
 0x8ef   : > { %v2001_v46 = vmul.f32 %v4871_v42, %v2000_v6  ;;  %v2002_v59 = vmul.f32 %v4876_v43, %v1999_v44 }
 0x8f0   : > { %3587 = vmatpush1.bf16.msra.mxu0 %v3586_v62  ;;  %3715 = vmatpush1.bf16.msra.mxu1 %v3714_v1 }
 0x8f1   : > { %v2008_v12 = vpop.permute.xlu1 %2007  ;;  %v2036_v7 = vpop.permute.xlu0 %2035  ;;  %v2003_v3 = vadd.f32 %v2001_v46, %v1993_v37 }
 0x8f3   : > { %2897 = vmatmul.mubr.f32.vlgmr.msra.gmra.mrb[42].mxu0 %v5361_v52  ;;  %3039 = vmatmul.mubr.f32.vlgmr.msra.gmra.mrb[42].mxu1 %v5361_v52  ;;  %v1979_v52 = vsel %vm1159_vm9, %v1976_v5, %v1978_v4  ;;  %vm5635_vm9 = vcmp.lt.s32.totalorder %v4639_v41, 1 }
 0x8f4   : > { %v1982_v27 = vmul.f32 %v4835_v31, %v1979_v52  ;;  %v2010_v31 = vsel %vm5635_vm9, %v2008_v12, %v2006_v11  ;;  %vm5636_vm4 = vmmov %vm5635_vm9 }
 0x8f5   : > { %v2018_v13 = vpop.permute.xlu1 %2017  ;;  %v2009_v48 = vsel %vm5636_vm4, %v2006_v11, %v2008_v12  ;;  %v2011_v55 = vmul.f32 %v4903_v50, %v2010_v31  ;;  %v2046_v53 = vpop.permute.xlu0 %2045 }
 0x8f6   : > { %v1984_v57 = vadd.f32 %v1982_v27, %v1974_v39  ;;  %v2019_v49 = vsel %vm1203_vm13, %v2016_v14, %v2018_v13  ;;  %v2012_v42 = vmul.f32 %v4908_v51, %v2009_v48  ;;  %v2020_v62 = vsel %vm1203_vm13, %v2018_v13, %v2016_v14 }
 0x8f7   : > { %v2021_v43 = vmul.f32 %v4939_v30, %v2019_v49  ;;  %v2013_v58 = vadd.f32 %v2011_v55, %v2003_v3  ;;  %v2022_v9 = vmul.f32 %v4963_v8, %v2020_v62 }
 0x8f8   : > { %v1994_v61 = vadd.f32 %v1992_v60, %v1984_v57 }
 0x8f9   : > { %v2026_v16 = vpop.permute.xlu1 %2025  ;;  %v2023_v11 = vadd.f32 %v2021_v43, %v2013_v58 }
 0x8fa   : > { %v2029_v1 = vsel %vm1214_vm5, %v2026_v16, %v2028_v18  ;;  %v2004_v4 = vadd.f32 %v2002_v59, %v1994_v61  ;;  %v2030_v5 = vsel %vm1214_vm5, %v2028_v18, %v2026_v16 }
 0x8fb   : > { %v2031_v51 = vmul.f32 %v4987_v54, %v2029_v1  ;;  %v2032_v13 = vmul.f32 %v4992_v17, %v2030_v5 }
 0x8fc   : > { %v2014_v12 = vadd.f32 %v2012_v42, %v2004_v4 }
 0x8fd   : > { %v2038_v36 = vpop.permute.xlu1 %2037  ;;  %v2033_v16 = vadd.f32 %v2031_v51, %v2023_v11 }
 0x8fe   : > { %v2039_v50 = vsel %vm1225_vm7, %v2036_v7, %v2038_v36  ;;  %v2040_v30 = vsel %vm1225_vm7, %v2038_v36, %v2036_v7  ;;  %v2024_v52 = vadd.f32 %v2022_v9, %v2014_v12 }
 0x8ff   : > { %v2041_v14 = vmul.f32 %v5007_v25, %v2039_v50  ;;  %v2042_v18 = vmul.f32 %v5012_v26, %v2040_v30 }
 0x900   : > { %v2034_v20 = vadd.f32 %v2032_v13, %v2024_v52 }
 0x901   : > { %v2048_v10 = vpop.permute.xlu1 %2047  ;;  %v2043_v21 = vadd.f32 %v2041_v14, %v2033_v16 }
 0x902   : > { %v2049_v15 = vsel %vm1236_vm14, %v2046_v53, %v2048_v10  ;;  %v2050_v8 = vsel %vm1236_vm14, %v2048_v10, %v2046_v53  ;;  %v2044_v6 = vadd.f32 %v2042_v18, %v2034_v20 }
 0x903   : > { %v2051_v17 = vmul.f32 %v5028_v47, %v2049_v15 }
 0x905   : > { %v2053_v26 = vadd.f32 %v2051_v17, %v2043_v21 }
 0x9c6   : > { %v2898_v23 = vpop.f32.mrb[42].mxu0  ;;  %v3040_v24 = vpop.f32.mrb[42].mxu1 }
 0x9c7   : > { %v3045_v32 = vmul.f32 %v2898_v23, %v2898_v23  ;;  %v3047_v0 = vmul.f32 %v3040_v24, %v3040_v24  ;;  %v2900_v33 = vpop.f32.mrb[43].mxu0  ;;  %v3042_v34 = vpop.f32.mrb[43].mxu1  ;;  %v2052_v23 = vmul.f32 %v5031_v63, %v2050_v8 }
 0x9c8   : > { %v3046_v28 = vmul.f32 %v2900_v33, %v2900_v33  ;;  %v3048_v38 = vmul.f32 %v3042_v34, %v3042_v34 }
 0x9c9   : > { %v3049_v40 = vadd.f32 %v3047_v0, %v3045_v32  ;;  %v2054_v47 = vadd.f32 %v2052_v23, %v2044_v6 }
 0x9ca   : > { %v3050_v56 = vadd.f32 %v3048_v38, %v3046_v28  ;;  %v2055_v28 = vmax.f32 %v2053_v26, 0.0 }
 0x9cb   : > { %3851 = vrsqrt.f32 %v3049_v40  ;;  %vm3053_vm1 = vcmp.eq.f32.partialorder %v3049_v40, inf  ;;  %v3056_v25 = vand.u32 2147483648, %v3049_v40  ;;  %vm3055_vm13 = vcmp.eq.f32.partialorder %v3049_v40, 0.0 }
 0x9cc   : > { %3853 = vrsqrt.f32 %v3050_v56  ;;  %vm3060_vm5 = vcmp.eq.f32.partialorder %v3050_v56, inf  ;;  %v3063_v41 = vand.u32 2147483648, %v3050_v56  ;;  %vm3062_vm7 = vcmp.eq.f32.partialorder %v3050_v56, 0.0 }
 0x9cd   : > { %v2056_v39 = vmax.f32 %v2054_v47, 0.0 }
 0x9d5   : > { %v3852_v54 = vpop.eup %3851 }
 0x9d6   : > { %v3854_v19 = vpop.eup %3853  ;;  %v3052_v22 = vmul.f32 %v3852_v54, %v3049_v40 }
 0x9d7   : > { %v3059_v24 = vmul.f32 %v3854_v19, %v3050_v56 }
 0x9d8   : > { %v3054_v27 = vsel %vm3053_vm1, %v3049_v40, %v3052_v22 }
 0x9d9   : > { %v3057_v32 = vsel %vm3055_vm13, %v3056_v25, %v3054_v27  ;;  %v3061_v0 = vsel %vm3060_vm5, %v3050_v56, %v3059_v24 }
 0x9da   : > { %v3071_v33 = vmul.f32 %v5366_v29, %v3057_v32  ;;  %v3064_v34 = vsel %vm3062_vm7, %v3063_v41, %v3061_v0 }
 0x9db   : > { %v3072_v35 = vmul.f32 %v5366_v29, %v3064_v34 }
 0x9dc   : > { %v3079_v63 = vadd.f32 %v5368_v2, %v3071_v33 }
 0x9dd   : > { %v3080_v44 = vadd.f32 %v5368_v2, %v3072_v35 }
 0x9de   : > { %v3081_v38 = vmax.f32 %v3079_v63, 0.0 }
 0x9df   : > { %v3082_v60 = vmax.f32 %v3080_v44, 0.0 }
 0x9e0   : > { %v3083_v31 = vadd.f32 %v3081_v38, %v2055_v28 }
 0x9e1   : > { %v3084_v40 = vadd.f32 %v3082_v60, %v2056_v39 }
 0x9e3   : > { %v3087_v45 = vcombine.low %v3083_v31, %v3084_v40 }
 0x9e5   : > { %3089 = vst [vmem:[%s786_s1] sm:$0xff] %v3087_v45 }
 0x9e6 PF: > { %s5638_s21 = sld [smem:[#allocation24_spill]] }
 0x9ec   : > { %s37_s2 = sadd.s32 1, %s5638_s21  }
 0x9ed   : > { %p34_p1 = scmp.ge.s32.totalorder %s37_s2, 4  }
 0x9ef   :  { %36 = sbr.rel (!%p34_p1) target bundleno = 19 (0x13), region = 175 }
 0x9f6   :  { %3111 = vsyncpa [#allocation3], 1 }
 0x9f7   :  { %3113 = vsyncpa [#allocation3 + $0x1], 1 }
 0x9f8   :  { %3114 = vsyncpa [#allocation5], 1 }
 0x9f9   :  { %3115 = vsyncpa [#allocation8], 1 }
 0x9fa   :  { %3116 = vsyncpa [#allocation11], 1 }
 0x9fb   :  { %3117 = vsyncpa [#allocation14], 1 }
 0x9fc   :  { %3118 = vsyncpa [#allocation17], 1 }

</bundles_post_ra>
